<compile_context>
chip_gen: v6e
topology: v6e:2x2x1
jax: 0.10.0
libtpu: 0.0.40
codegen_flags: <defaults>
</compile_context>

<pallas_src>
import jax
import jax.numpy as jnp
from jax.experimental import pallas as pl
from jax.experimental.pallas import tpu as pltpu


IN_DIM = 28 * 28          # 784 (kept un-padded: block equals full array dim)
H1 = 512
H2 = 512
OUT_DIM = 10
OUT_PAD = 128             # lane-dense output block (padded columns are zero)


def _mlp_kernel(x_ref, w1_ref, b1_ref, w2_ref, b2_ref, w3_ref, b3_ref, o_ref):
    # x_ref: (TB, 784) fp32 batch tile straight from HBM; cast to bf16 in VMEM
    # (avoids a separate fp32->bf16 pre-pass + re-read through HBM).
    # Weights resident in VMEM (bf16, constant index_maps); biases fp32.
    x = x_ref[...].astype(jnp.bfloat16)
    h1 = jnp.dot(x, w1_ref[...], preferred_element_type=jnp.float32) + b1_ref[...]
    h1 = jnp.maximum(h1, 0.0).astype(jnp.bfloat16)        # ReLU (fc1)
    # dropout(0.2) -> identity in eval mode
    h2 = jnp.dot(h1, w2_ref[...], preferred_element_type=jnp.float32) + b2_ref[...]
    h2 = jnp.maximum(h2, 0.0).astype(jnp.bfloat16)        # ReLU (fc2)
    # dropout(0.2) -> identity in eval mode
    logits = jnp.dot(h2, w3_ref[...], preferred_element_type=jnp.float32) + b3_ref[...]
    o_ref[...] = logits.astype(o_ref.dtype)               # (TB, 128) lane-dense bf16 store


def prepare_params(params):
    """One-time weight prep, hoisted out of the per-call path.

    fc3 columns are zero-padded 10 -> 128 so the kernel's output store is
    lane-dense and unmasked; w1/w2/w3 are cast to bf16 once here instead of
    re-reading/re-writing ~3 MB of weights on every forward call.
    """
    w1, b1, w2, b2, w3, b3 = params
    w1p = w1.astype(jnp.bfloat16)                                   # (784, 512)
    w2p = w2.astype(jnp.bfloat16)                                   # (512, 512)
    w3p = jnp.pad(w3, ((0, 0), (0, OUT_PAD - OUT_DIM))).astype(jnp.bfloat16)
    b3p = jnp.pad(b3, ((0, 0), (0, OUT_PAD - OUT_DIM)))             # fp32
    return (w1p, b1, w2p, b2, w3p, b3p)


def _pick_batch_tile(B, max_tile=512):
    """Adaptive batch tile: large enough to amortize the ~0.35us per-grid-step
    overhead, small enough that tiny batches are not padded 8x, and (when the
    batch allows) halved so grid >= 2 and v7x megacore shards the batch axis."""
    b128 = pl.cdiv(B, 128) * 128
    tile = min(max_tile, b128)
    if b128 // tile < 2 and b128 >= 256:
        tile = pl.cdiv(b128 // 2, 128) * 128
    return tile


@jax.jit
def mlp_forward(x_nchw, prepared):
    """x_nchw: (B, 1, 28, 28) float32; prepared = prepare_params(params).
    Returns (B, 10) float32 logits (eval-mode forward)."""
    w1p, b1, w2p, b2, w3p, b3p = prepared
    B = x_nchw.shape[0]
    x = x_nchw.reshape(B, IN_DIM)                         # x.view(-1, 28*28), fp32

    tile = _pick_batch_tile(B)
    B_pad = pl.cdiv(B, tile) * tile
    if B_pad != B:                                        # padded rows sliced off below
        x = jnp.pad(x, ((0, B_pad - B), (0, 0)))

    grid = (B_pad // tile,)

    # Weights/biases fully resident: constant index_map -> fetched once, not
    # re-DMA'd per grid step.  (~1.5 MB bf16 total, double-buffering is noise.)
    full = lambda shape: pl.BlockSpec(shape, lambda i, s=shape: (0,) * len(s))

    flops = 2 * B_pad * (IN_DIM * H1 + H1 * H2 + H2 * OUT_PAD)
    bytes_accessed = (
        B_pad * IN_DIM * 4                                # fp32 activations in
        + (w1p.size + w2p.size + w3p.size) * 2            # bf16 weights (fetched once)
        + (b1.size + b2.size + b3p.size) * 4              # fp32 biases
        + B_pad * OUT_PAD * 2                             # bf16 logits out
    )

    out = pl.pallas_call(
        _mlp_kernel,
        out_shape=jax.ShapeDtypeStruct((B_pad, OUT_PAD), jnp.bfloat16),
        grid_spec=pl.GridSpec(
            grid=grid,
            in_specs=[
                pl.BlockSpec((tile, IN_DIM), lambda i: (i, 0)),  # x batch tile (fp32)
                full((IN_DIM, H1)),       # w1
                full((1, H1)),            # b1
                full((H1, H2)),           # w2
                full((1, H2)),            # b2
                full((H2, OUT_PAD)),      # w3 (zero-padded cols)
                full((1, OUT_PAD)),       # b3 (zero-padded cols)
            ],
            out_specs=pl.BlockSpec((tile, OUT_PAD), lambda i: (i, 0)),
        ),
        compiler_params=pltpu.CompilerParams(
            dimension_semantics=("parallel",),            # batch axis -> megacore shard
            vmem_limit_bytes=20 * 1024 * 1024,            # actual footprint < ~11 MB
        ),
        cost_estimate=pl.CostEstimate(
            flops=flops, transcendentals=0, bytes_accessed=bytes_accessed),
    )(x, w1p, b1, w2p, b2, w3p, b3p)

    return out[:B, :OUT_DIM].astype(jnp.float32)          # slice + cast fuse under jit


def init_params(key):
    """Deterministic init mimicking nn.Linear's U(-1/sqrt(fan_in), 1/sqrt(fan_in))."""
    ks = jax.random.split(key, 6)

    def linear(kw, kb, fan_in, fan_out):
        bound = 1.0 / jnp.sqrt(fan_in)
        w = jax.random.uniform(kw, (fan_in, fan_out), jnp.float32, -bound, bound)
        b = jax.random.uniform(kb, (1, fan_out), jnp.float32, -bound, bound)
        return w, b

    w1, b1 = linear(ks[0], ks[1], IN_DIM, H1)
    w2, b2 = linear(ks[2], ks[3], H1, H2)
    w3, b3 = linear(ks[4], ks[5], H2, OUT_DIM)
    return (w1, b1, w2, b2, w3, b3)


def reference_forward(x_nchw, params):
    """fp32 reference (matches the PyTorch eval-mode forward)."""
    w1, b1, w2, b2, w3, b3 = params
    x = x_nchw.reshape(x_nchw.shape[0], IN_DIM)
    h1 = jnp.maximum(x @ w1 + b1, 0.0)
    h2 = jnp.maximum(h1 @ w2 + b2, 0.0)
    return h2 @ w3 + b3


if __name__ == "__main__":
    key = jax.random.PRNGKey(0)
    k_param, k_x = jax.random.split(key)

    params = init_params(k_param)
    prepared = prepare_params(params)                     # one-time weight pad/cast

    x = jax.random.normal(k_x, (32, 1, 28, 28), jnp.float32)   # small test batch

    out = mlp_forward(x, prepared)
    out = jax.block_until_ready(out)

    ref = reference_forward(x, params)
    assert out.shape == (32, OUT_DIM)
    # bf16 activations/weights/logits with fp32 accumulation: loose tolerance vs fp32 ref.
    assert jnp.allclose(out, ref, atol=5e-2, rtol=5e-2), "mismatch vs reference"

    print("KERNEL_OK")
</pallas_src>

<mosaic_0001>
module attributes {stable_mosaic.version = 11 : i64} {
  func.func @_mlp_kernel(%arg0: i32, %arg1: memref<128x784xf32, #tpu.memory_space<vmem>>, %arg2: memref<784x512xbf16, #tpu.memory_space<vmem>>, %arg3: memref<1x512xf32, #tpu.memory_space<vmem>>, %arg4: memref<512x512xbf16, #tpu.memory_space<vmem>>, %arg5: memref<1x512xf32, #tpu.memory_space<vmem>>, %arg6: memref<512x128xbf16, #tpu.memory_space<vmem>>, %arg7: memref<1x128xf32, #tpu.memory_space<vmem>>, %arg8: memref<128x128xbf16, #tpu.memory_space<vmem>>) attributes {dimension_semantics = [#tpu.dimension_semantics<parallel>], iteration_bounds = array<i64: 1>, scalar_prefetch = 0 : i64, scratch_operands = 0 : i64, tpu.core_type = #tpu.core_type<tc>, window_params = [{transform_indices = @transform_0, window_bounds = array<i64: 128, 784>}, {pipeline_mode = #tpu.pipeline_mode<synchronous>, transform_indices = @transform_1, window_bounds = array<i64: 784, 512>}, {pipeline_mode = #tpu.pipeline_mode<synchronous>, transform_indices = @transform_2, window_bounds = array<i64: 1, 512>}, {pipeline_mode = #tpu.pipeline_mode<synchronous>, transform_indices = @transform_3, window_bounds = array<i64: 512, 512>}, {pipeline_mode = #tpu.pipeline_mode<synchronous>, transform_indices = @transform_4, window_bounds = array<i64: 1, 512>}, {pipeline_mode = #tpu.pipeline_mode<synchronous>, transform_indices = @transform_5, window_bounds = array<i64: 512, 128>}, {pipeline_mode = #tpu.pipeline_mode<synchronous>, transform_indices = @transform_6, window_bounds = array<i64: 1, 128>}, {transform_indices = @transform_7, window_bounds = array<i64: 128, 128>}]} {
    %c0 = arith.constant 0 : index
    %c0_0 = arith.constant 0 : index
    %0 = vector.load %arg1[%c0, %c0_0] : memref<128x784xf32, #tpu.memory_space<vmem>>, vector<128x784xf32>
    %1 = arith.truncf %0 : vector<128x784xf32> to vector<128x784xbf16>
    %c0_1 = arith.constant 0 : index
    %c0_2 = arith.constant 0 : index
    %2 = vector.load %arg2[%c0_1, %c0_2] : memref<784x512xbf16, #tpu.memory_space<vmem>>, vector<784x512xbf16>
    %cst = arith.constant dense<0.000000e+00> : vector<128x512xf32>
    %3 = tpu.matmul %1, %2, %cst {dimension_numbers = #tpu.dot_dimension_numbers<[1], [0], [0], [1], [0, 0, 1, 1], [], []>} : vector<128x784xbf16>, vector<784x512xbf16>, vector<128x512xf32> -> vector<128x512xf32>
    %c0_3 = arith.constant 0 : index
    %c0_4 = arith.constant 0 : index
    %4 = vector.load %arg3[%c0_3, %c0_4] : memref<1x512xf32, #tpu.memory_space<vmem>>, vector<1x512xf32>
    %5 = vector.broadcast %4 : vector<1x512xf32> to vector<128x512xf32>
    %6 = arith.addf %3, %5 : vector<128x512xf32>
    %cst_5 = arith.constant 0.000000e+00 : f32
    %7 = vector.broadcast %cst_5 : f32 to vector<128x512xf32>
    %8 = arith.maximumf %6, %7 : vector<128x512xf32>
    %9 = arith.truncf %8 : vector<128x512xf32> to vector<128x512xbf16>
    %c0_6 = arith.constant 0 : index
    %c0_7 = arith.constant 0 : index
    %10 = vector.load %arg4[%c0_6, %c0_7] : memref<512x512xbf16, #tpu.memory_space<vmem>>, vector<512x512xbf16>
    %cst_8 = arith.constant dense<0.000000e+00> : vector<128x512xf32>
    %11 = tpu.matmul %9, %10, %cst_8 {dimension_numbers = #tpu.dot_dimension_numbers<[1], [0], [0], [1], [0, 0, 1, 1], [], []>} : vector<128x512xbf16>, vector<512x512xbf16>, vector<128x512xf32> -> vector<128x512xf32>
    %c0_9 = arith.constant 0 : index
    %c0_10 = arith.constant 0 : index
    %12 = vector.load %arg5[%c0_9, %c0_10] : memref<1x512xf32, #tpu.memory_space<vmem>>, vector<1x512xf32>
    %13 = vector.broadcast %12 : vector<1x512xf32> to vector<128x512xf32>
    %14 = arith.addf %11, %13 : vector<128x512xf32>
    %cst_11 = arith.constant 0.000000e+00 : f32
    %15 = vector.broadcast %cst_11 : f32 to vector<128x512xf32>
    %16 = arith.maximumf %14, %15 : vector<128x512xf32>
    %17 = arith.truncf %16 : vector<128x512xf32> to vector<128x512xbf16>
    %c0_12 = arith.constant 0 : index
    %c0_13 = arith.constant 0 : index
    %18 = vector.load %arg6[%c0_12, %c0_13] : memref<512x128xbf16, #tpu.memory_space<vmem>>, vector<512x128xbf16>
    %cst_14 = arith.constant dense<0.000000e+00> : vector<128x128xf32>
    %19 = tpu.matmul %17, %18, %cst_14 {dimension_numbers = #tpu.dot_dimension_numbers<[1], [0], [0], [1], [0, 0, 1, 1], [], []>} : vector<128x512xbf16>, vector<512x128xbf16>, vector<128x128xf32> -> vector<128x128xf32>
    %c0_15 = arith.constant 0 : index
    %c0_16 = arith.constant 0 : index
    %20 = vector.load %arg7[%c0_15, %c0_16] : memref<1x128xf32, #tpu.memory_space<vmem>>, vector<1x128xf32>
    %21 = vector.broadcast %20 : vector<1x128xf32> to vector<128x128xf32>
    %22 = arith.addf %19, %21 : vector<128x128xf32>
    %23 = arith.truncf %22 : vector<128x128xf32> to vector<128x128xbf16>
    %c0_17 = arith.constant 0 : index
    %c0_18 = arith.constant 0 : index
    %24 = vector.load %arg8[%c0_17, %c0_18] : memref<128x128xbf16, #tpu.memory_space<vmem>>, vector<128x128xbf16>
    tpu.vector_store %arg8[%c0_17, %c0_18], %23 {strides = array<i32>} : memref<128x128xbf16, #tpu.memory_space<vmem>>, vector<128x128xbf16>,
    return
  }
  func.func @transform_0(%arg0: i32) -> (i32, i32) {
    %c0_i32 = arith.constant 0 : i32
    %c0_i32_0 = arith.constant 0 : i32
    return %arg0, %c0_i32 : i32, i32
  }
  func.func @transform_1(%arg0: i32) -> (i32, i32) {
    %c0_i32 = arith.constant 0 : i32
    %c0_i32_0 = arith.constant 0 : i32
    %c0_i32_1 = arith.constant 0 : i32
    return %c0_i32, %c0_i32_0 : i32, i32
  }
  func.func @transform_2(%arg0: i32) -> (i32, i32) {
    %c0_i32 = arith.constant 0 : i32
    %c0_i32_0 = arith.constant 0 : i32
    %c0_i32_1 = arith.constant 0 : i32
    return %c0_i32, %c0_i32_0 : i32, i32
  }
  func.func @transform_3(%arg0: i32) -> (i32, i32) {
    %c0_i32 = arith.constant 0 : i32
    %c0_i32_0 = arith.constant 0 : i32
    %c0_i32_1 = arith.constant 0 : i32
    return %c0_i32, %c0_i32_0 : i32, i32
  }
  func.func @transform_4(%arg0: i32) -> (i32, i32) {
    %c0_i32 = arith.constant 0 : i32
    %c0_i32_0 = arith.constant 0 : i32
    %c0_i32_1 = arith.constant 0 : i32
    return %c0_i32, %c0_i32_0 : i32, i32
  }
  func.func @transform_5(%arg0: i32) -> (i32, i32) {
    %c0_i32 = arith.constant 0 : i32
    %c0_i32_0 = arith.constant 0 : i32
    %c0_i32_1 = arith.constant 0 : i32
    return %c0_i32, %c0_i32_0 : i32, i32
  }
  func.func @transform_6(%arg0: i32) -> (i32, i32) {
    %c0_i32 = arith.constant 0 : i32
    %c0_i32_0 = arith.constant 0 : i32
    %c0_i32_1 = arith.constant 0 : i32
    return %c0_i32, %c0_i32_0 : i32, i32
  }
  func.func @transform_7(%arg0: i32) -> (i32, i32) {
    %c0_i32 = arith.constant 0 : i32
    %c0_i32_0 = arith.constant 0 : i32
    return %arg0, %c0_i32 : i32, i32
  }
}

</mosaic_0001>

<bundles_post_ra>
// kernel: mlp_forward.1
= control target key start
LH: loop header
LB: loop body
LE: loop exit
PB: predicated region body
PF: predicated region fallthrough
CT: control target
= control target key end

     0   :  { %12 = vsyncpa [#allocation3], 0  ;;  %s5437_s24 = smov [#allocation2]   ;;  %s7570_s0 = inlined_call_operand.vmem [shape: f32[128,784], index: 0, kind: input, shape index: {}]   ;;  %s7571_s1 = inlined_call_operand.vmem [shape: bf16[784,512], index: 1, kind: input, shape index: {}]   ;;  %s7572_s2 = inlined_call_operand.vmem [shape: f32[1,512], index: 2, kind: input, shape index: {}]   ;;  %s7573_s3 = inlined_call_operand.hbm [shape: bf16[512,512], index: 3, kind: input, shape index: {}]   ;;  %s7574_s4 = inlined_call_operand.vmem [shape: f32[1,512], index: 4, kind: input, shape index: {}]   ;;  %s7575_s5 = inlined_call_operand.vmem [shape: bf16[512,128], index: 5, kind: input, shape index: {}]   ;;  %s7576_s6 = inlined_call_operand.vmem [shape: f32[1,128], index: 6, kind: input, shape index: {}]   ;;  %s7577_s7 = inlined_call_operand.vmem [shape: bf16[128,128], index: 7, kind: output, shape index: {}]  }
   0x1   :  { %s24_s25 = sshll.u32 %s5437_s24, 4  ;;  %s25_s25 = int_to_ptr.vmem [resolvable:$true] %s24_s25 }
   0x2   :  { %s5423_s26 = scalar_lea.vmem %s25_s25, 16384  ;;  %p5428_p1 = scmp.lt.s32.totalorder %s25_s25, %s25_s25 }
   0x3   :  { %p5424_p0 = scmp.ne.s32.totalorder %s25_s25, %s5423_s26  ;;  %p5429_p2 = scmp.lt.s32.totalorder %s5423_s26, %s5423_s26 }
   0x5   :  { %p5430_p3 = por %p5429_p2, %p5428_p1 }
   0x7   :  { %p5431_p4 = pnand %p5430_p3, %p5424_p0 }
   0x9   :  { %5434 = shalt.err (!%p5431_p4)
}
   0xa   :  { %s5438_s27 = smov 256   ;;  %s5439_s28 = smov 16  }
   0xb   :  { %30 = dma.hbm_to_vmem [thread:$0]  %s7573_s3, 16384, %s25_s25, [#allocation3], %s5438_s27, %s5438_s27, %s5439_s28  }
   0xc   :  { %5435 = dma.done.wait [#allocation3], 16384  }
   0xd   :  { %5436 = vsyncadd [#allocation3], 4294950912  ;;  %v4896_v0 = vld [vmem:[%s7571_s1 + $0xe4] ss:$16 sps:$4 sm:$0xff]   ;;  %v4900_v2 = vld [vmem:[%s7571_s1 + $0xe0] ss:$16 sps:$4 sm:$0xff]  }
   0xe   :  { %v4898_v1 = vld [vmem:[%s7571_s1 + $0x2e4] ss:$16 sps:$4 sm:$0xff]   ;;  %1432 = vmatprep.subr.bf16.mxu0 %v4896_v0  ;;  %v4901_v3 = vld [vmem:[%s7571_s1 + $0x2e0] ss:$16 sps:$4 sm:$0xff]   ;;  %v42_v46 = vld [vmem:[%s7570_s0 + $0x8] sm:$0xff]  ;;  %vm1407_vm0 = vcmask 130048  }
   0xf   :  { %1545 = vmatprep.subr.bf16.mxu1 %v4898_v1  ;;  %v4902_v4 = vld [vmem:[%s7571_s1 + $0xc4] ss:$16 sps:$4 sm:$0xff]   ;;  %1433 = vmatpush1.bf16.msra.mxu0 %v4900_v2  ;;  %v4906_v6 = vld [vmem:[%s7571_s1 + $0xc0] ss:$16 sps:$4 sm:$0xff]   ;;  %v44_v48 = vld [vmem:[%s7570_s0 + $0x18] sm:$0xff] }
  0x10   :  { %1546 = vmatpush1.bf16.msra.mxu1 %v4901_v3  ;;  %v4904_v5 = vld [vmem:[%s7571_s1 + $0x2c4] ss:$16 sps:$4 sm:$0xff]   ;;  %1434 = vmatprep.subr.bf16.mxu0 %v4902_v4  ;;  %v4907_v7 = vld [vmem:[%s7571_s1 + $0x2c0] ss:$16 sps:$4 sm:$0xff]  }
  0x11   :  { %1547 = vmatprep.subr.bf16.mxu1 %v4904_v5  ;;  %v4908_v8 = vld [vmem:[%s7571_s1 + $0xa4] ss:$16 sps:$4 sm:$0xff]   ;;  %v4912_v10 = vld [vmem:[%s7571_s1 + $0xa0] ss:$16 sps:$4 sm:$0xff]  }
  0x12   :  { %v4910_v9 = vld [vmem:[%s7571_s1 + $0x2a4] ss:$16 sps:$4 sm:$0xff]   ;;  %v4913_v11 = vld [vmem:[%s7571_s1 + $0x2a0] ss:$16 sps:$4 sm:$0xff]  }
  0x13   :  { %1435 = vmatpush1.bf16.msra.mxu0 %v4906_v6  ;;  %v4914_v12 = vld [vmem:[%s7571_s1 + $0x84] ss:$16 sps:$4 sm:$0xff]   ;;  %v4918_v14 = vld [vmem:[%s7571_s1 + $0x80] ss:$16 sps:$4 sm:$0xff]  }
  0x14   :  { %1548 = vmatpush1.bf16.msra.mxu1 %v4907_v7  ;;  %1436 = vmatprep.subr.bf16.mxu0 %v4908_v8  ;;  %v4916_v13 = vld [vmem:[%s7571_s1 + $0x284] ss:$16 sps:$4 sm:$0xff]   ;;  %v4919_v15 = vld [vmem:[%s7571_s1 + $0x280] ss:$16 sps:$4 sm:$0xff]   ;;  %v48_v7 = vld [vmem:[%s7570_s0 + $0x38] sm:$0xff] }
  0x15   :  { %1549 = vmatprep.subr.bf16.mxu1 %v4910_v9  ;;  %v4920_v16 = vld [vmem:[%s7571_s1 + $0x64] ss:$16 sps:$4 sm:$0xff]   ;;  %v4924_v18 = vld [vmem:[%s7571_s1 + $0x60] ss:$16 sps:$4 sm:$0xff]   ;;  %v50_v9 = vld [vmem:[%s7570_s0 + $0x48] sm:$0xff] }
  0x16   :  { %v4922_v17 = vld [vmem:[%s7571_s1 + $0x264] ss:$16 sps:$4 sm:$0xff]   ;;  %v4925_v19 = vld [vmem:[%s7571_s1 + $0x260] ss:$16 sps:$4 sm:$0xff]  }
  0x17   :  { %1437 = vmatpush1.bf16.msra.mxu0 %v4912_v10  ;;  %v4926_v20 = vld [vmem:[%s7571_s1 + $0x44] ss:$16 sps:$4 sm:$0xff]   ;;  %v4930_v22 = vld [vmem:[%s7571_s1 + $0x40] ss:$16 sps:$4 sm:$0xff]  }
  0x18   :  { %1550 = vmatpush1.bf16.msra.mxu1 %v4913_v11  ;;  %1438 = vmatprep.subr.bf16.mxu0 %v4914_v12  ;;  %v4928_v21 = vld [vmem:[%s7571_s1 + $0x244] ss:$16 sps:$4 sm:$0xff]   ;;  %v4931_v23 = vld [vmem:[%s7571_s1 + $0x240] ss:$16 sps:$4 sm:$0xff]  }
  0x19   :  { %1551 = vmatprep.subr.bf16.mxu1 %v4916_v13  ;;  %v4932_v24 = vld [vmem:[%s7571_s1 + $0x24] ss:$16 sps:$4 sm:$0xff]   ;;  %v4936_v26 = vld [vmem:[%s7571_s1 + $0x20] ss:$16 sps:$4 sm:$0xff]   ;;  %v56_v13 = vld [vmem:[%s7570_s0 + $0x78] sm:$0xff] }
  0x1a   :  { %v4934_v25 = vld [vmem:[%s7571_s1 + $0x224] ss:$16 sps:$4 sm:$0xff]   ;;  %v4937_v27 = vld [vmem:[%s7571_s1 + $0x220] ss:$16 sps:$4 sm:$0xff]  }
  0x1b   :  { %1439 = vmatpush1.bf16.msra.mxu0 %v4918_v14  ;;  %v4938_v28 = vld [vmem:[%s7571_s1 + $0x4] ss:$16 sps:$4 sm:$0xff]   ;;  %v4942_v30 = vld [vmem:[%s7571_s1] ss:$16 sps:$4 sm:$0xff]  }
  0x1c   :  { %1552 = vmatpush1.bf16.msra.mxu1 %v4919_v15  ;;  %1440 = vmatprep.subr.bf16.mxu0 %v4920_v16  ;;  %v4940_v29 = vld [vmem:[%s7571_s1 + $0x204] ss:$16 sps:$4 sm:$0xff]   ;;  %v4943_v31 = vld [vmem:[%s7571_s1 + $0x200] ss:$16 sps:$4 sm:$0xff]  }
  0x1d   :  { %1553 = vmatprep.subr.bf16.mxu1 %v4922_v17  ;;  %v4944_v32 = vld [vmem:[%s7571_s1 + $0x1e4] ss:$16 sps:$4 sm:$0xff]   ;;  %v4948_v34 = vld [vmem:[%s7571_s1 + $0x1e0] ss:$16 sps:$4 sm:$0xff]   ;;  %v58_v17 = vld [vmem:[%s7570_s0 + $0x88] sm:$0xff] }
  0x1e   :  { %v4946_v33 = vld [vmem:[%s7571_s1 + $0x3e4] ss:$16 sps:$4 sm:$0xff]   ;;  %v4949_v35 = vld [vmem:[%s7571_s1 + $0x3e0] ss:$16 sps:$4 sm:$0xff]  }
  0x1f   :  { %1441 = vmatpush1.bf16.msra.mxu0 %v4924_v18  ;;  %v4950_v36 = vld [vmem:[%s7571_s1 + $0x1c4] ss:$16 sps:$4 sm:$0xff]   ;;  %v4954_v38 = vld [vmem:[%s7571_s1 + $0x1c0] ss:$16 sps:$4 sm:$0xff]  }
  0x20   :  { %1554 = vmatpush1.bf16.msra.mxu1 %v4925_v19  ;;  %1442 = vmatprep.subr.bf16.mxu0 %v4926_v20  ;;  %v4952_v37 = vld [vmem:[%s7571_s1 + $0x3c4] ss:$16 sps:$4 sm:$0xff]   ;;  %v4955_v39 = vld [vmem:[%s7571_s1 + $0x3c0] ss:$16 sps:$4 sm:$0xff]  }
  0x21   :  { %1555 = vmatprep.subr.bf16.mxu1 %v4928_v21  ;;  %v4956_v40 = vld [vmem:[%s7571_s1 + $0x1a4] ss:$16 sps:$4 sm:$0xff]   ;;  %v4960_v42 = vld [vmem:[%s7571_s1 + $0x1a0] ss:$16 sps:$4 sm:$0xff]  }
  0x22   :  { %v4958_v41 = vld [vmem:[%s7571_s1 + $0x3a4] ss:$16 sps:$4 sm:$0xff]   ;;  %v4961_v43 = vld [vmem:[%s7571_s1 + $0x3a0] ss:$16 sps:$4 sm:$0xff]  }
  0x23   :  { %1443 = vmatpush1.bf16.msra.mxu0 %v4930_v22  ;;  %v4962_v44 = vld [vmem:[%s7571_s1 + $0x184] ss:$16 sps:$4 sm:$0xff]   ;;  %v4966_v50 = vld [vmem:[%s7571_s1 + $0x180] ss:$16 sps:$4 sm:$0xff]  }
  0x24   :  { %1556 = vmatpush1.bf16.msra.mxu1 %v4931_v23  ;;  %1444 = vmatprep.subr.bf16.mxu0 %v4932_v24  ;;  %v4964_v45 = vld [vmem:[%s7571_s1 + $0x384] ss:$16 sps:$4 sm:$0xff]   ;;  %v4967_v51 = vld [vmem:[%s7571_s1 + $0x380] ss:$16 sps:$4 sm:$0xff]  }
  0x25   :  { %1557 = vmatprep.subr.bf16.mxu1 %v4934_v25  ;;  %v49_v47 = vld [vmem:[%s7570_s0 + $0x40] sm:$0xff]  ;;  %v51_v49 = vld [vmem:[%s7570_s0 + $0x50] sm:$0xff]  ;;  %v62_v25 = vld [vmem:[%s7570_s0 + $0xa8] sm:$0xff] }
  0x26   :  { %v4968_v52 = vld [vmem:[%s7571_s1 + $0x164] ss:$16 sps:$4 sm:$0xff]   ;;  %v5643_v53 = vpack.c.bf16 %v49_v47, %v42_v46  ;;  %v5645_v54 = vpack.c.bf16 %v51_v49, %v44_v48  ;;  %v4972_v56 = vld [vmem:[%s7571_s1 + $0x160] ss:$16 sps:$4 sm:$0xff]   ;;  %v86_v47 = vld [vmem:[%s7570_s0 + $0x168] sm:$0xff] }
  0x27   :  { %1445 = vmatpush1.bf16.msra.mxu0 %v4936_v26  ;;  %v4970_v55 = vld [vmem:[%s7571_s1 + $0x364] ss:$16 sps:$4 sm:$0xff]   ;;  %v4973_v57 = vld [vmem:[%s7571_s1 + $0x360] ss:$16 sps:$4 sm:$0xff]  }
  0x28   :  { %1558 = vmatpush1.bf16.msra.mxu1 %v4937_v27  ;;  %1446 = vmatprep.subr.bf16.mxu0 %v4938_v28  ;;  %v4974_v58 = vld [vmem:[%s7571_s1 + $0x144] ss:$16 sps:$4 sm:$0xff]   ;;  %v4978_v60 = vld [vmem:[%s7571_s1 + $0x140] ss:$16 sps:$4 sm:$0xff]   ;;  %v64_v27 = vld [vmem:[%s7570_s0 + $0xb8] sm:$0xff] }
  0x29   :  { %1559 = vmatprep.subr.bf16.mxu1 %v4940_v29  ;;  %1464 = vmatprep.mubr.bf16.mxu0 %v5643_v53  ;;  %v4976_v59 = vld [vmem:[%s7571_s1 + $0x344] ss:$16 sps:$4 sm:$0xff]   ;;  %v4979_v61 = vld [vmem:[%s7571_s1 + $0x340] ss:$16 sps:$4 sm:$0xff]   ;;  %v70_v29 = vld [vmem:[%s7570_s0 + $0xe8] sm:$0xff] }
  0x2a   :  { %1577 = vmatprep.mubr.bf16.mxu1 %v5645_v54  ;;  %v4980_v62 = vld [vmem:[%s7571_s1 + $0x124] ss:$16 sps:$4 sm:$0xff]   ;;  %v4984_v0 = vld [vmem:[%s7571_s1 + $0x120] ss:$16 sps:$4 sm:$0xff]  }
  0x2b   :  { %1447 = vmatpush1.bf16.msra.mxu0 %v4942_v30  ;;  %v4982_v63 = vld [vmem:[%s7571_s1 + $0x324] ss:$16 sps:$4 sm:$0xff]   ;;  %v4985_v1 = vld [vmem:[%s7571_s1 + $0x320] ss:$16 sps:$4 sm:$0xff]  }
  0x2c   :  { %1560 = vmatpush1.bf16.msra.mxu1 %v4943_v31  ;;  %1448 = vmatprep.subr.bf16.mxu0 %v4944_v32  ;;  %v4986_v2 = vld [vmem:[%s7571_s1 + $0x104] ss:$16 sps:$4 sm:$0xff]   ;;  %v4990_v4 = vld [vmem:[%s7571_s1 + $0x100] ss:$16 sps:$4 sm:$0xff]   ;;  %v72_v31 = vld [vmem:[%s7570_s0 + $0xf8] sm:$0xff] }
  0x2d   :  { %1561 = vmatprep.subr.bf16.mxu1 %v4946_v33  ;;  %v4988_v3 = vld [vmem:[%s7571_s1 + $0x304] ss:$16 sps:$4 sm:$0xff]   ;;  %v4991_v5 = vld [vmem:[%s7571_s1 + $0x300] ss:$16 sps:$4 sm:$0xff]  }
  0x2e   :  { %v41_v6 = vld [vmem:[%s7570_s0] sm:$0xff]  ;;  %v43_v8 = vld [vmem:[%s7570_s0 + $0x10] sm:$0xff] }
  0x2f   :  { %1449 = vmatpush2.bf16.msra.mxu0 %v4948_v34  ;;  %v4994_v10 = vld [vmem:[%s7571_s1 + $0x4e4] ss:$16 sps:$4 sm:$0xff]   ;;  %v4992_v12 = vld [vmem:[%s7571_s1 + $0x4e0] ss:$16 sps:$4 sm:$0xff]   ;;  %v5721_v15 = vpack.c.bf16 %v48_v7, %v41_v6  ;;  %v5723_v16 = vpack.c.bf16 %v50_v9, %v43_v8 }
  0x30   :  { %1562 = vmatpush2.bf16.msra.mxu1 %v4949_v35  ;;  %1450 = vmatprep.subr.bf16.mxu0 %v4950_v36  ;;  %v4997_v11 = vld [vmem:[%s7571_s1 + $0x604] ss:$16 sps:$4 sm:$0xff]   ;;  %v4995_v19 = vld [vmem:[%s7571_s1 + $0x600] ss:$16 sps:$4 sm:$0xff]  }
  0x31   :  { %1563 = vmatprep.subr.bf16.mxu1 %v4952_v37  ;;  %v63_v14 = vld [vmem:[%s7570_s0 + $0xb0] sm:$0xff]  ;;  %v65_v18 = vld [vmem:[%s7570_s0 + $0xc0] sm:$0xff] }
  0x32   :  { %v5000_v20 = vld [vmem:[%s7571_s1 + $0x4c4] ss:$16 sps:$4 sm:$0xff]   ;;  %v5737_v21 = vpack.c.bf16 %v63_v14, %v56_v13  ;;  %v4998_v22 = vld [vmem:[%s7571_s1 + $0x4c0] ss:$16 sps:$4 sm:$0xff]   ;;  %v5742_v23 = vpack.c.bf16 %v65_v18, %v58_v17  ;;  %v5048_v13 = vld [vmem:[%s7571_s1 + $0x2ec] ss:$16 sps:$4 sm:$0xff]  }
  0x33   :  { %1451 = vmatpush2.bf16.msra.mxu0 %v4954_v38  ;;  %v55_v24 = vld [vmem:[%s7570_s0 + $0x70] sm:$0xff]  ;;  %v57_v26 = vld [vmem:[%s7570_s0 + $0x80] sm:$0xff]  ;;  %v106_v14 = vld [vmem:[%s7570_s0 + $0x208] sm:$0xff] }
  0x34   :  { %1564 = vmatpush2.bf16.msra.mxu1 %v4955_v39  ;;  %1452 = vmatprep.subr.bf16.mxu0 %v4956_v40  ;;  %v5003_v28 = vld [vmem:[%s7571_s1 + $0x4a4] ss:$16 sps:$4 sm:$0xff]   ;;  %v5775_v33 = vpack.c.bf16 %v62_v25, %v55_v24  ;;  %v5777_v34 = vpack.c.bf16 %v64_v27, %v57_v26  ;;  %v5001_v35 = vld [vmem:[%s7571_s1 + $0x4a0] ss:$16 sps:$4 sm:$0xff]   ;;  %v112_v18 = vld [vmem:[%s7570_s0 + $0x238] sm:$0xff] }
  0x35   :  { %1565 = vmatprep.subr.bf16.mxu1 %v4958_v41  ;;  %v77_v30 = vld [vmem:[%s7570_s0 + $0x120] sm:$0xff]  ;;  %v79_v32 = vld [vmem:[%s7570_s0 + $0x130] sm:$0xff]  ;;  %v76_v41 = vld [vmem:[%s7570_s0 + $0x118] sm:$0xff] }
  0x36   :  { %v5782_v36 = vpack.c.bf16 %v77_v30, %v70_v29  ;;  %v5006_v37 = vld [vmem:[%s7571_s1 + $0x484] ss:$16 sps:$4 sm:$0xff]   ;;  %v5787_v38 = vpack.c.bf16 %v79_v32, %v72_v31  ;;  %v5004_v39 = vld [vmem:[%s7571_s1 + $0x480] ss:$16 sps:$4 sm:$0xff]   ;;  %v118_v32 = vld [vmem:[%s7570_s0 + $0x268] sm:$0xff] }
  0x37   :  { %1453 = vmatpush2.bf16.msra.mxu0 %v4960_v42  ;;  %v69_v40 = vld [vmem:[%s7570_s0 + $0xe0] sm:$0xff]  ;;  %v71_v42 = vld [vmem:[%s7570_s0 + $0xf0] sm:$0xff] }
  0x38   :  { %1566 = vmatpush2.bf16.msra.mxu1 %v4961_v43  ;;  %1454 = vmatprep.subr.bf16.mxu0 %v4962_v44  ;;  %v78_v43 = vld [vmem:[%s7570_s0 + $0x128] sm:$0xff]  ;;  %v5009_v44 = vld [vmem:[%s7571_s1 + $0x464] ss:$16 sps:$4 sm:$0xff]   ;;  %v5823_v49 = vpack.c.bf16 %v76_v41, %v69_v40  ;;  %v5016_v9 = vld [vmem:[%s7571_s1 + $0x400] ss:$16 sps:$4 sm:$0xff]  }
  0x39   :  { %1567 = vmatprep.subr.bf16.mxu1 %v4964_v45  ;;  %v84_v45 = vld [vmem:[%s7570_s0 + $0x158] sm:$0xff]  ;;  %v91_v46 = vld [vmem:[%s7570_s0 + $0x190] sm:$0xff]  ;;  %v93_v48 = vld [vmem:[%s7570_s0 + $0x1a0] sm:$0xff] }
  0x3a   :  { %v5018_v7 = vld [vmem:[%s7571_s1 + $0x404] ss:$16 sps:$4 sm:$0xff]   ;;  %v5019_v26 = vld [vmem:[%s7571_s1 + $0x5e0] ss:$16 sps:$4 sm:$0xff]   ;;  %v126_v40 = vld [vmem:[%s7570_s0 + $0x2a8] sm:$0xff] }
  0x3b   :  { %1455 = vmatpush2.bf16.msra.mxu0 %v4966_v50  ;;  %v5825_v50 = vpack.c.bf16 %v78_v43, %v71_v42  ;;  %v5021_v17 = vld [vmem:[%s7571_s1 + $0x5e4] ss:$16 sps:$4 sm:$0xff]   ;;  %v5022_v30 = vld [vmem:[%s7571_s1 + $0x5c0] ss:$16 sps:$4 sm:$0xff]   ;;  %v128_v42 = vld [vmem:[%s7570_s0 + $0x2b8] sm:$0xff] }
  0x3c   :  { %1568 = vmatpush2.bf16.msra.mxu1 %v4967_v51  ;;  %1456 = vmatprep.subr.bf16.mxu0 %v4968_v52  ;;  %v5007_v51 = vld [vmem:[%s7571_s1 + $0x460] ss:$16 sps:$4 sm:$0xff]   ;;  %v5830_v52 = vpack.c.bf16 %v91_v46, %v84_v45 }
  0x3d   :  { %1569 = vmatprep.subr.bf16.mxu1 %v4970_v55  ;;  %v5012_v55 = vld [vmem:[%s7571_s1 + $0x444] ss:$16 sps:$4 sm:$0xff]   ;;  %v5025_v46 = vld [vmem:[%s7571_s1 + $0x5a0] ss:$16 sps:$4 sm:$0xff]  }
  0x3e   :  { %v111_v31 = vld [vmem:[%s7570_s0 + $0x230] sm:$0xff]  ;;  %v133_v41 = vld [vmem:[%s7570_s0 + $0x2e0] sm:$0xff] }
  0x3f   :  { %1457 = vmatpush2.bf16.msra.mxu0 %v4972_v56  ;;  %v5835_v56 = vpack.c.bf16 %v93_v48, %v86_v47  ;;  %v135_v43 = vld [vmem:[%s7570_s0 + $0x2f0] sm:$0xff]  ;;  %v5977_v47 = vpack.c.bf16 %v133_v41, %v126_v40  ;;  %v54_v41 = vld [vmem:[%s7570_s0 + $0x68] sm:$0xff] }
  0x40   :  { %1570 = vmatpush2.bf16.msra.mxu1 %v4973_v57  ;;  %1458 = vmatprep.subr.bf16.mxu0 %v4974_v58  ;;  %v5010_v57 = vld [vmem:[%s7571_s1 + $0x440] ss:$16 sps:$4 sm:$0xff]   ;;  %v5030_v48 = vld [vmem:[%s7571_s1 + $0x584] ss:$16 sps:$4 sm:$0xff]  }
  0x41   :  { %1571 = vmatprep.subr.bf16.mxu1 %v4976_v59  ;;  %v83_v58 = vld [vmem:[%s7570_s0 + $0x150] sm:$0xff]  ;;  %v90_v59 = vld [vmem:[%s7570_s0 + $0x188] sm:$0xff] }
  0x42   :  { %v47_v40 = vld [vmem:[%s7570_s0 + $0x30] sm:$0xff] }
  0x43   :  { %1459 = vmatpush2.bf16.msra.mxu0 %v4978_v60  ;;  %v85_v60 = vld [vmem:[%s7570_s0 + $0x160] sm:$0xff] }
  0x44   :  { %1572 = vmatpush2.bf16.msra.mxu1 %v4979_v61  ;;  %1460 = vmatprep.subr.bf16.mxu0 %v4980_v62  ;;  %v92_v61 = vld [vmem:[%s7570_s0 + $0x198] sm:$0xff]  ;;  %v5015_v62 = vld [vmem:[%s7571_s1 + $0x424] ss:$16 sps:$4 sm:$0xff]  }
  0x45   :  { %1573 = vmatprep.subr.bf16.mxu1 %v4982_v63  ;;  %v98_v63 = vld [vmem:[%s7570_s0 + $0x1c8] sm:$0xff] }
  0x47   :  { %1461 = vmatpush2.bf16.msra.mxu0 %v4984_v0  ;;  %v105_v0 = vld [vmem:[%s7570_s0 + $0x200] sm:$0xff] }
  0x48   :  { %1574 = vmatpush2.bf16.msra.mxu1 %v4985_v1  ;;  %1462 = vmatprep.subr.bf16.mxu0 %v4986_v2  ;;  %v100_v1 = vld [vmem:[%s7570_s0 + $0x1d8] sm:$0xff]  ;;  %v107_v2 = vld [vmem:[%s7570_s0 + $0x210] sm:$0xff]  ;;  %v5878_v6 = vpack.c.bf16 %v105_v0, %v98_v63  ;;  %v142_v0 = vld [vmem:[%s7570_s0 + $0x328] sm:$0xff] }
  0x49   :  { %1575 = vmatprep.subr.bf16.mxu1 %v4988_v3  ;;  %v5871_v3 = vpack.c.bf16 %v90_v59, %v83_v58  ;;  %v5883_v8 = vpack.c.bf16 %v107_v2, %v100_v1  ;;  %v132_v58 = vld [vmem:[%s7570_s0 + $0x2d8] sm:$0xff]  ;;  %v127_v59 = vld [vmem:[%s7570_s0 + $0x2b0] sm:$0xff]  ;;  %v149_v1 = vld [vmem:[%s7570_s0 + $0x360] sm:$0xff] }
  0x4a   :  { %v147_v63 = vld [vmem:[%s7570_s0 + $0x350] sm:$0xff] }
  0x4b   :  { %1463 = vmatpush2.bf16.msra.mxu0 %v4990_v4  ;;  %v5873_v4 = vpack.c.bf16 %v92_v61, %v85_v60  ;;  %v134_v60 = vld [vmem:[%s7570_s0 + $0x2e8] sm:$0xff]  ;;  %v5033_v61 = vld [vmem:[%s7571_s1 + $0x564] ss:$16 sps:$4 sm:$0xff]  }
  0x4c   :  { %1576 = vmatpush2.bf16.msra.mxu1 %v4991_v5  ;;  %1658 = vmatprep.subr.bf16.mxu0 %v4994_v10  ;;  %v5013_v5 = vld [vmem:[%s7571_s1 + $0x420] ss:$16 sps:$4 sm:$0xff]  }
  0x4d   :  { %1785 = vmatprep.subr.bf16.mxu1 %v4997_v11  ;;  %v97_v10 = vld [vmem:[%s7570_s0 + $0x1c0] sm:$0xff]  ;;  %v104_v11 = vld [vmem:[%s7570_s0 + $0x1f8] sm:$0xff] }
  0x4e   :  { %1465 = vmatmul.mubr.bf16.vlgmr.msra.gmra.mxu0 %v5721_v15  ;;  %v5922_v24 = vpack.c.bf16 %v104_v11, %v97_v10  ;;  %v5036_v10 = vld [vmem:[%s7571_s1 + $0x544] ss:$16 sps:$4 sm:$0xff]   ;;  %v6030_v11 = vpack.c.bf16 %v149_v1, %v142_v0  ;;  %v5052_v0 = vld [vmem:[%s7571_s1 + $0x2c8] ss:$16 sps:$4 sm:$0xff]  }
  0x4f   :  { %1578 = vmatmul.mubr.bf16.vlgmr.msra.gmra.mxu1 %v5723_v16  ;;  %1659 = vmatpush1.bf16.msra.mxu0 %v4992_v12  ;;  %v99_v12 = vld [vmem:[%s7570_s0 + $0x1d0] sm:$0xff] }
  0x50   :  { %1786 = vmatpush1.bf16.msra.mxu1 %v4995_v19  ;;  %1660 = vmatprep.subr.bf16.mxu0 %v5000_v20  ;;  %v119_v19 = vld [vmem:[%s7570_s0 + $0x270] sm:$0xff]  ;;  %v114_v20 = vld [vmem:[%s7570_s0 + $0x248] sm:$0xff]  ;;  %v5924_v25 = vpack.c.bf16 %v106_v14, %v99_v12 }
  0x51   :  { %1474 = vmatprep.mubr.bf16.mxu0 %v5737_v21  ;;  %1587 = vmatprep.mubr.bf16.mxu1 %v5742_v23  ;;  %v5929_v27 = vpack.c.bf16 %v119_v19, %v112_v18  ;;  %v5034_v12 = vld [vmem:[%s7571_s1 + $0x540] ss:$16 sps:$4 sm:$0xff]   ;;  %v146_v14 = vld [vmem:[%s7570_s0 + $0x348] sm:$0xff]  ;;  %v148_v18 = vld [vmem:[%s7570_s0 + $0x358] sm:$0xff] }
  0x52   :  { %1997 = vmatprep.subr.bf16.mxu1 %v5048_v13  ;;  %v139_v13 = vld [vmem:[%s7570_s0 + $0x310] sm:$0xff] }
  0x53   :  { %1661 = vmatpush1.bf16.msra.mxu0 %v4998_v22  ;;  %v121_v22 = vld [vmem:[%s7570_s0 + $0x280] sm:$0xff]  ;;  %v59_v1 = vld [vmem:[%s7570_s0 + $0x90] sm:$0xff] }
  0x54   :  { %1662 = vmatprep.subr.bf16.mxu0 %v5003_v28  ;;  %v5024_v28 = vld [vmem:[%s7571_s1 + $0x5c4] ss:$16 sps:$4 sm:$0xff]   ;;  %v5934_v29 = vpack.c.bf16 %v121_v22, %v114_v20  ;;  %v46_v20 = vld [vmem:[%s7570_s0 + $0x28] sm:$0xff] }
  0x55   :  { %v5039_v19 = vld [vmem:[%s7571_s1 + $0x524] ss:$16 sps:$4 sm:$0xff]  }
  0x56   :  { %1475 = vmatmul.mubr.bf16.gmra.mxu0 %v5775_v33  ;;  %v53_v22 = vld [vmem:[%s7570_s0 + $0x60] sm:$0xff] }
  0x57   :  { %1588 = vmatmul.mubr.bf16.gmra.mxu1 %v5777_v34  ;;  %1663 = vmatpush1.bf16.msra.mxu0 %v5001_v35  ;;  %v113_v35 = vld [vmem:[%s7570_s0 + $0x240] sm:$0xff] }
  0x58   :  { %1484 = vmatprep.mubr.bf16.mxu0 %v5782_v36  ;;  %1664 = vmatprep.subr.bf16.mxu0 %v5006_v37  ;;  %v120_v37 = vld [vmem:[%s7570_s0 + $0x278] sm:$0xff] }
  0x59   :  { %1597 = vmatprep.mubr.bf16.mxu1 %v5787_v38  ;;  %v5972_v45 = vpack.c.bf16 %v120_v37, %v113_v35  ;;  %v5040_v35 = vld [vmem:[%s7571_s1 + $0x500] ss:$16 sps:$4 sm:$0xff]  }
  0x5a   :  { %v45_v37 = vld [vmem:[%s7570_s0 + $0x20] sm:$0xff] }
  0x5b   :  { %1665 = vmatpush1.bf16.msra.mxu0 %v5004_v39  ;;  %v5027_v39 = vld [vmem:[%s7571_s1 + $0x5a4] ss:$16 sps:$4 sm:$0xff]  }
  0x5c   :  { %1666 = vmatprep.subr.bf16.mxu0 %v5009_v44  ;;  %v5970_v44 = vpack.c.bf16 %v118_v32, %v111_v31  ;;  %v6067_v31 = vpack.c.bf16 %v53_v22, %v46_v20  ;;  %v5042_v32 = vld [vmem:[%s7571_s1 + $0x504] ss:$16 sps:$4 sm:$0xff]   ;;  %v5055_v22 = vld [vmem:[%s7571_s1 + $0xa8] ss:$16 sps:$4 sm:$0xff]  }
  0x5d   :  { %v81_v20 = vld [vmem:[%s7570_s0 + $0x140] sm:$0xff] }
  0x5e   :  { %1485 = vmatmul.mubr.bf16.gmra.mxu0 %v5823_v49 }
  0x5f   :  { %1598 = vmatmul.mubr.bf16.gmra.mxu1 %v5825_v50  ;;  %1667 = vmatpush1.bf16.msra.mxu0 %v5007_v51  ;;  %v5982_v51 = vpack.c.bf16 %v135_v43, %v128_v42  ;;  %v7579_v42 = vmov 0   ;;  %v5045_v43 = vld [vmem:[%s7571_s1 + $0xec] ss:$16 sps:$4 sm:$0xff]  }
  0x60   :  { %1494 = vmatprep.mubr.bf16.mxu0 %v5830_v52  ;;  %1668 = vmatprep.subr.bf16.mxu0 %v5012_v55  ;;  %v5028_v55 = vld [vmem:[%s7571_s1 + $0x580] ss:$16 sps:$4 sm:$0xff]  }
  0x61   :  { %1607 = vmatprep.mubr.bf16.mxu1 %v5835_v56 }
  0x63   :  { %1669 = vmatpush1.bf16.msra.mxu0 %v5010_v57  ;;  %v125_v57 = vld [vmem:[%s7570_s0 + $0x2a0] sm:$0xff] }
  0x64   :  { %1670 = vmatprep.subr.bf16.mxu0 %v5015_v62  ;;  %v140_v62 = vld [vmem:[%s7570_s0 + $0x318] sm:$0xff]  ;;  %v6018_v2 = vpack.c.bf16 %v132_v58, %v125_v57  ;;  %v6102_v57 = vpack.c.bf16 %v54_v41, %v47_v40  ;;  %v73_v41 = vld [vmem:[%s7570_s0 + $0x100] sm:$0xff] }
  0x65   :  { %v60_v58 = vld [vmem:[%s7570_s0 + $0x98] sm:$0xff] }
  0x66   :  { %1495 = vmatmul.mubr.bf16.gmra.mxu0 %v5871_v3 }
  0x67   :  { %1608 = vmatmul.mubr.bf16.gmra.mxu1 %v5873_v4  ;;  %1671 = vmatpush1.bf16.msra.mxu0 %v5013_v5  ;;  %v6020_v5 = vpack.c.bf16 %v134_v60, %v127_v59  ;;  %v67_v59 = vld [vmem:[%s7570_s0 + $0xd0] sm:$0xff]  ;;  %v5051_v60 = vld [vmem:[%s7571_s1 + $0xcc] ss:$16 sps:$4 sm:$0xff]  }
  0x68   :  { %1504 = vmatprep.mubr.bf16.mxu0 %v5878_v6  ;;  %1672 = vmatprep.subr.bf16.mxu0 %v5018_v7  ;;  %v5031_v7 = vld [vmem:[%s7571_s1 + $0x560] ss:$16 sps:$4 sm:$0xff]  }
  0x69   :  { %1617 = vmatprep.mubr.bf16.mxu1 %v5883_v8 }
  0x6b   :  { %1673 = vmatpush1.bf16.msra.mxu0 %v5016_v9  ;;  %v6025_v9 = vpack.c.bf16 %v147_v63, %v140_v62  ;;  %v5049_v62 = vld [vmem:[%s7571_s1 + $0xc8] ss:$16 sps:$4 sm:$0xff]   ;;  %v6119_v63 = vpack.c.bf16 %v67_v59, %v60_v58  ;;  %v5069_v58 = vld [vmem:[%s7571_s1 + $0x6c] ss:$16 sps:$4 sm:$0xff]  }
  0x6c   :  { %1674 = vmatprep.subr.bf16.mxu0 %v5021_v17  ;;  %v141_v17 = vld [vmem:[%s7570_s0 + $0x320] sm:$0xff]  ;;  %v5072_v59 = vld [vmem:[%s7571_s1 + $0x26c] ss:$16 sps:$4 sm:$0xff]  }
  0x6e   :  { %1505 = vmatmul.mubr.bf16.gmra.mxu0 %v5922_v24 }
  0x6f   :  { %1618 = vmatmul.mubr.bf16.gmra.mxu1 %v5924_v25  ;;  %1675 = vmatpush2.bf16.msra.mxu0 %v5019_v26  ;;  %v6060_v26 = vpack.c.bf16 %v146_v14, %v139_v13  ;;  %v5057_v13 = vld [vmem:[%s7571_s1 + $0xac] ss:$16 sps:$4 sm:$0xff]  }
  0x70   :  { %1514 = vmatprep.mubr.bf16.mxu0 %v5929_v27  ;;  %1676 = vmatprep.subr.bf16.mxu0 %v5024_v28  ;;  %v6062_v28 = vpack.c.bf16 %v148_v18, %v141_v17  ;;  %v5060_v14 = vld [vmem:[%s7571_s1 + $0x2ac] ss:$16 sps:$4 sm:$0xff]  }
  0x71   :  { %1627 = vmatprep.mubr.bf16.mxu1 %v5934_v29  ;;  %v74_v17 = vld [vmem:[%s7570_s0 + $0x108] sm:$0xff] }
  0x72   :  { %v6175_v40 = vpack.c.bf16 %v81_v20, %v74_v17  ;;  %v87_v20 = vld [vmem:[%s7570_s0 + $0x170] sm:$0xff] }
  0x73   :  { %1677 = vmatpush2.bf16.msra.mxu0 %v5022_v30  ;;  %v5037_v30 = vld [vmem:[%s7571_s1 + $0x520] ss:$16 sps:$4 sm:$0xff]  }
  0x74   :  { %1678 = vmatprep.subr.bf16.mxu0 %v5027_v39  ;;  %v52_v39 = vld [vmem:[%s7570_s0 + $0x58] sm:$0xff] }
  0x76   :  { %1515 = vmatmul.mubr.bf16.gmra.mxu0 %v5970_v44 }
  0x77   :  { %1628 = vmatmul.mubr.bf16.gmra.mxu1 %v5972_v45  ;;  %1679 = vmatpush2.bf16.msra.mxu0 %v5025_v46  ;;  %v5043_v46 = vld [vmem:[%s7571_s1 + $0xe8] ss:$16 sps:$4 sm:$0xff]  }
  0x78   :  { %1524 = vmatprep.mubr.bf16.mxu0 %v5977_v47  ;;  %1680 = vmatprep.subr.bf16.mxu0 %v5030_v48  ;;  %v5046_v48 = vld [vmem:[%s7571_s1 + $0x2e8] ss:$16 sps:$4 sm:$0xff]  }
  0x79   :  { %1637 = vmatprep.mubr.bf16.mxu1 %v5982_v51 }
  0x7b   :  { %1681 = vmatpush2.bf16.msra.mxu0 %v5028_v55  ;;  %v6100_v55 = vpack.c.bf16 %v52_v39, %v45_v37  ;;  %v5061_v37 = vld [vmem:[%s7571_s1 + $0x88] ss:$16 sps:$4 sm:$0xff]  }
  0x7c   :  { %1682 = vmatprep.subr.bf16.mxu0 %v5033_v61  ;;  %v5054_v61 = vld [vmem:[%s7571_s1 + $0x2cc] ss:$16 sps:$4 sm:$0xff]   ;;  %v5064_v39 = vld [vmem:[%s7571_s1 + $0x288] ss:$16 sps:$4 sm:$0xff]  }
  0x7e   :  { %1525 = vmatmul.mubr.bf16.gmra.mxu0 %v6018_v2 }
  0x7f   :  { %1638 = vmatmul.mubr.bf16.gmra.mxu1 %v6020_v5  ;;  %1683 = vmatpush2.bf16.msra.mxu0 %v5031_v7  ;;  %v66_v7 = vld [vmem:[%s7570_s0 + $0xc8] sm:$0xff] }
  0x80   :  { %1534 = vmatprep.mubr.bf16.mxu0 %v6025_v9  ;;  %1684 = vmatprep.subr.bf16.mxu0 %v5036_v10  ;;  %v61_v10 = vld [vmem:[%s7570_s0 + $0xa0] sm:$0xff]  ;;  %v6150_v18 = vpack.c.bf16 %v66_v7, %v59_v1  ;;  %v88_v1 = vld [vmem:[%s7570_s0 + $0x178] sm:$0xff]  ;;  %v95_v7 = vld [vmem:[%s7570_s0 + $0x1b0] sm:$0xff] }
  0x81   :  { %1647 = vmatprep.mubr.bf16.mxu1 %v6030_v11  ;;  %v6228_v17 = vpack.c.bf16 %v95_v7, %v88_v1  ;;  %v5088_v1 = vld [vmem:[%s7571_s1 + $0x208] ss:$16 sps:$4 sm:$0xff]  }
  0x83   :  { %1685 = vmatpush2.bf16.msra.mxu0 %v5034_v12  ;;  %v68_v12 = vld [vmem:[%s7570_s0 + $0xd8] sm:$0xff] }
  0x84   :  { %1686 = vmatprep.subr.bf16.mxu0 %v5039_v19  ;;  %v6152_v19 = vpack.c.bf16 %v68_v12, %v61_v10  ;;  %v5075_v10 = vld [vmem:[%s7571_s1 + $0x4c] ss:$16 sps:$4 sm:$0xff]  }
  0x85   :  { %v5078_v12 = vld [vmem:[%s7571_s1 + $0x24c] ss:$16 sps:$4 sm:$0xff]  }
  0x86   :  { %1535 = vmatmul.mubr.bf16.gmra.mxu0 %v6060_v26 }
  0x87   :  { %1648 = vmatmul.mubr.bf16.gmra.mxu1 %v6062_v28  ;;  %1687 = vmatpush2.bf16.msra.mxu0 %v5037_v30  ;;  %v5058_v30 = vld [vmem:[%s7571_s1 + $0x2a8] ss:$16 sps:$4 sm:$0xff]  }
  0x88   :  { %1690 = vmatprep.mubr.bf16.mxu0 %v6067_v31  ;;  %1688 = vmatprep.subr.bf16.mxu0 %v5042_v32  ;;  %v5063_v32 = vld [vmem:[%s7571_s1 + $0x8c] ss:$16 sps:$4 sm:$0xff]  }
  0x89   :  { %1803 = vmatprep.mubr.bf16.mxu1 %v7579_v42 }
  0x8b   :  { %1689 = vmatpush2.bf16.msra.mxu0 %v5040_v35  ;;  %v5066_v35 = vld [vmem:[%s7571_s1 + $0x28c] ss:$16 sps:$4 sm:$0xff]  }
  0x8c   :  { %1884 = vmatprep.subr.bf16.mxu0 %v5045_v43  ;;  %v80_v43 = vld [vmem:[%s7570_s0 + $0x138] sm:$0xff] }
  0x8e   :  { %1691 = vmatmul.mubr.bf16.vlgmr.msra.gmra.mxu0 %v6100_v55 }
  0x8f   :  { %4508 = vmatmul.mubr.msk.bf16.vlgmr.msra.gmra.mxu1 %vm1407_vm0, %v6102_v57  ;;  %1885 = vmatpush1.bf16.msra.mxu0 %v5043_v46  ;;  %v75_v46 = vld [vmem:[%s7570_s0 + $0x110] sm:$0xff] }
  0x90   :  { %1998 = vmatpush1.bf16.msra.mxu1 %v5046_v48  ;;  %1886 = vmatprep.subr.bf16.mxu0 %v5051_v60  ;;  %v82_v48 = vld [vmem:[%s7570_s0 + $0x148] sm:$0xff] }
  0x91   :  { %1999 = vmatprep.subr.bf16.mxu1 %v5054_v61  ;;  %1700 = vmatprep.mubr.bf16.mxu0 %v6119_v63  ;;  %v5067_v60 = vld [vmem:[%s7571_s1 + $0x68] ss:$16 sps:$4 sm:$0xff]  }
  0x92   :  { %1813 = vmatprep.mubr.bf16.mxu1 %v7579_v42  ;;  %v5070_v61 = vld [vmem:[%s7571_s1 + $0x268] ss:$16 sps:$4 sm:$0xff]  }
  0x93   :  { %1887 = vmatpush1.bf16.msra.mxu0 %v5049_v62  ;;  %v6206_v62 = vpack.c.bf16 %v80_v43, %v73_v41  ;;  %v5082_v41 = vld [vmem:[%s7571_s1 + $0x228] ss:$16 sps:$4 sm:$0xff]  }
  0x94   :  { %2000 = vmatpush1.bf16.msra.mxu1 %v5052_v0  ;;  %1888 = vmatprep.subr.bf16.mxu0 %v5057_v13  ;;  %v6208_v0 = vpack.c.bf16 %v82_v48, %v75_v46  ;;  %v5073_v13 = vld [vmem:[%s7571_s1 + $0x48] ss:$16 sps:$4 sm:$0xff]  }
  0x95   :  { %2001 = vmatprep.subr.bf16.mxu1 %v5060_v14  ;;  %v5076_v14 = vld [vmem:[%s7571_s1 + $0x248] ss:$16 sps:$4 sm:$0xff]  }
  0x96   :  { %1701 = vmatmul.mubr.bf16.gmra.mxu0 %v6150_v18  ;;  %v102_v48 = vld [vmem:[%s7570_s0 + $0x1e8] sm:$0xff] }
  0x97   :  { %4509 = vmatmul.mubr.msk.bf16.gmra.mxu1 %vm1407_vm0, %v6152_v19  ;;  %1889 = vmatpush1.bf16.msra.mxu0 %v5055_v22  ;;  %v94_v22 = vld [vmem:[%s7570_s0 + $0x1a8] sm:$0xff] }
  0x98   :  { %2002 = vmatpush1.bf16.msra.mxu1 %v5058_v30  ;;  %1890 = vmatprep.subr.bf16.mxu0 %v5063_v32  ;;  %v89_v30 = vld [vmem:[%s7570_s0 + $0x180] sm:$0xff]  ;;  %v96_v32 = vld [vmem:[%s7570_s0 + $0x1b8] sm:$0xff]  ;;  %v6259_v43 = vpack.c.bf16 %v94_v22, %v87_v20 }
  0x99   :  { %2003 = vmatprep.subr.bf16.mxu1 %v5066_v35  ;;  %1710 = vmatprep.mubr.bf16.mxu0 %v6175_v40  ;;  %v5081_v35 = vld [vmem:[%s7571_s1 + $0x2c] ss:$16 sps:$4 sm:$0xff]   ;;  %v6261_v46 = vpack.c.bf16 %v96_v32, %v89_v30  ;;  %v5091_v30 = vld [vmem:[%s7571_s1 + $0x1e8] ss:$16 sps:$4 sm:$0xff]  }
  0x9a   :  { %1823 = vmatprep.mubr.bf16.mxu1 %v7579_v42  ;;  %v5093_v20 = vld [vmem:[%s7571_s1 + $0x1ec] ss:$16 sps:$4 sm:$0xff]   ;;  %v5094_v32 = vld [vmem:[%s7571_s1 + $0x3e8] ss:$16 sps:$4 sm:$0xff]  }
  0x9b   :  { %1891 = vmatpush1.bf16.msra.mxu0 %v5061_v37  ;;  %v5084_v37 = vld [vmem:[%s7571_s1 + $0x22c] ss:$16 sps:$4 sm:$0xff]  }
  0x9c   :  { %2004 = vmatpush1.bf16.msra.mxu1 %v5064_v39  ;;  %1892 = vmatprep.subr.bf16.mxu0 %v5069_v58  ;;  %v5079_v39 = vld [vmem:[%s7571_s1 + $0x28] ss:$16 sps:$4 sm:$0xff]   ;;  %v109_v58 = vld [vmem:[%s7570_s0 + $0x220] sm:$0xff]  ;;  %v5096_v22 = vld [vmem:[%s7571_s1 + $0x3ec] ss:$16 sps:$4 sm:$0xff]  }
  0x9d   :  { %2005 = vmatprep.subr.bf16.mxu1 %v5072_v59  ;;  %v5087_v59 = vld [vmem:[%s7571_s1 + $0xc] ss:$16 sps:$4 sm:$0xff]   ;;  %v6281_v7 = vpack.c.bf16 %v109_v58, %v102_v48 }
  0x9e   :  { %1711 = vmatmul.mubr.bf16.gmra.mxu0 %v6206_v62  ;;  %v5099_v48 = vld [vmem:[%s7571_s1 + $0x1cc] ss:$16 sps:$4 sm:$0xff]  }
  0x9f   :  { %4510 = vmatmul.mubr.msk.bf16.gmra.mxu1 %vm1407_vm0, %v6208_v0  ;;  %1893 = vmatpush1.bf16.msra.mxu0 %v5067_v60  ;;  %v5090_v60 = vld [vmem:[%s7571_s1 + $0x20c] ss:$16 sps:$4 sm:$0xff]  }
  0xa0   :  { %2006 = vmatpush1.bf16.msra.mxu1 %v5070_v61  ;;  %1894 = vmatprep.subr.bf16.mxu0 %v5075_v10  ;;  %v5085_v61 = vld [vmem:[%s7571_s1 + $0x8] ss:$16 sps:$4 sm:$0xff]   ;;  %v101_v10 = vld [vmem:[%s7570_s0 + $0x1e0] sm:$0xff]  ;;  %v5102_v58 = vld [vmem:[%s7571_s1 + $0x3cc] ss:$16 sps:$4 sm:$0xff]  }
  0xa1   :  { %2007 = vmatprep.subr.bf16.mxu1 %v5078_v12  ;;  %1720 = vmatprep.mubr.bf16.mxu0 %v6228_v17  ;;  %v108_v12 = vld [vmem:[%s7570_s0 + $0x218] sm:$0xff] }
  0xa2   :  { %1833 = vmatprep.mubr.bf16.mxu1 %v7579_v42 }
  0xa3   :  { %1895 = vmatpush1.bf16.msra.mxu0 %v5073_v13  ;;  %v103_v13 = vld [vmem:[%s7570_s0 + $0x1f0] sm:$0xff] }
  0xa4   :  { %2008 = vmatpush1.bf16.msra.mxu1 %v5076_v14  ;;  %1896 = vmatprep.subr.bf16.mxu0 %v5081_v35  ;;  %v110_v14 = vld [vmem:[%s7570_s0 + $0x228] sm:$0xff]  ;;  %v6312_v35 = vpack.c.bf16 %v108_v12, %v101_v10  ;;  %v117_v12 = vld [vmem:[%s7570_s0 + $0x260] sm:$0xff] }
  0xa5   :  { %2009 = vmatprep.subr.bf16.mxu1 %v5084_v37  ;;  %v6314_v37 = vpack.c.bf16 %v110_v14, %v103_v13  ;;  %v122_v10 = vld [vmem:[%s7570_s0 + $0x288] sm:$0xff]  ;;  %v124_v13 = vld [vmem:[%s7570_s0 + $0x298] sm:$0xff] }
  0xa6   :  { %1721 = vmatmul.mubr.bf16.gmra.mxu0 %v6259_v43  ;;  %v5105_v14 = vld [vmem:[%s7571_s1 + $0x1ac] ss:$16 sps:$4 sm:$0xff]  }
  0xa7   :  { %4511 = vmatmul.mubr.msk.bf16.gmra.mxu1 %vm1407_vm0, %v6261_v46  ;;  %1897 = vmatpush1.bf16.msra.mxu0 %v5079_v39  ;;  %v116_v39 = vld [vmem:[%s7570_s0 + $0x258] sm:$0xff] }
  0xa8   :  { %2010 = vmatpush1.bf16.msra.mxu1 %v5082_v41  ;;  %1898 = vmatprep.subr.bf16.mxu0 %v5087_v59  ;;  %v123_v41 = vld [vmem:[%s7570_s0 + $0x290] sm:$0xff]  ;;  %v5097_v59 = vld [vmem:[%s7571_s1 + $0x1c8] ss:$16 sps:$4 sm:$0xff]  }
  0xa9   :  { %2011 = vmatprep.subr.bf16.mxu1 %v5090_v60  ;;  %1730 = vmatprep.mubr.bf16.mxu0 %v6281_v7  ;;  %v5100_v60 = vld [vmem:[%s7571_s1 + $0x3c8] ss:$16 sps:$4 sm:$0xff]  }
  0xaa   :  { %1843 = vmatprep.mubr.bf16.mxu1 %v7579_v42 }
  0xab   :  { %1899 = vmatpush1.bf16.msra.mxu0 %v5085_v61  ;;  %v6334_v61 = vpack.c.bf16 %v123_v41, %v116_v39  ;;  %v130_v39 = vld [vmem:[%s7570_s0 + $0x2c8] sm:$0xff]  ;;  %v137_v41 = vld [vmem:[%s7570_s0 + $0x300] sm:$0xff] }
  0xac   :  { %2012 = vmatpush1.bf16.msra.mxu1 %v5088_v1  ;;  %1900 = vmatprep.subr.bf16.mxu0 %v5093_v20  ;;  %v115_v1 = vld [vmem:[%s7570_s0 + $0x250] sm:$0xff]  ;;  %v5108_v20 = vld [vmem:[%s7571_s1 + $0x3ac] ss:$16 sps:$4 sm:$0xff]  }
  0xad   :  { %2013 = vmatprep.subr.bf16.mxu1 %v5096_v22  ;;  %v5103_v22 = vld [vmem:[%s7571_s1 + $0x1a8] ss:$16 sps:$4 sm:$0xff]  }
  0xae   :  { %1731 = vmatmul.mubr.bf16.gmra.mxu0 %v6312_v35 }
  0xaf   :  { %4512 = vmatmul.mubr.msk.bf16.gmra.mxu1 %vm1407_vm0, %v6314_v37  ;;  %1901 = vmatpush2.bf16.msra.mxu0 %v5091_v30  ;;  %v6362_v30 = vpack.c.bf16 %v122_v10, %v115_v1  ;;  %v5114_v1 = vld [vmem:[%s7571_s1 + $0x38c] ss:$16 sps:$4 sm:$0xff]   ;;  %v5109_v10 = vld [vmem:[%s7571_s1 + $0x188] ss:$16 sps:$4 sm:$0xff]  }
  0xb0   :  { %2014 = vmatpush2.bf16.msra.mxu1 %v5094_v32  ;;  %1902 = vmatprep.subr.bf16.mxu0 %v5099_v48  ;;  %v6364_v32 = vpack.c.bf16 %v124_v13, %v117_v12  ;;  %v5106_v48 = vld [vmem:[%s7571_s1 + $0x3a8] ss:$16 sps:$4 sm:$0xff]   ;;  %v129_v12 = vld [vmem:[%s7570_s0 + $0x2c0] sm:$0xff] }
  0xb1   :  { %2015 = vmatprep.subr.bf16.mxu1 %v5102_v58  ;;  %1740 = vmatprep.mubr.bf16.mxu0 %v6334_v61  ;;  %7593 = vst [vmem:[#allocation5_spill] sm:$0xff] %v6362_v30  ;;  %v5111_v58 = vld [vmem:[%s7571_s1 + $0x18c] ss:$16 sps:$4 sm:$0xff]  }
  0xb2   :  { %1853 = vmatprep.mubr.bf16.mxu1 %v7579_v42  ;;  %7594 = vst [vmem:[#allocation6_spill] sm:$0xff] %v6364_v32  ;;  %v136_v13 = vld [vmem:[%s7570_s0 + $0x2f8] sm:$0xff] }
  0xb3   :  { %1903 = vmatpush2.bf16.msra.mxu0 %v5097_v59  ;;  %v5112_v59 = vld [vmem:[%s7571_s1 + $0x388] ss:$16 sps:$4 sm:$0xff]  }
  0xb4   :  { %2016 = vmatpush2.bf16.msra.mxu1 %v5100_v60  ;;  %1904 = vmatprep.subr.bf16.mxu0 %v5105_v14  ;;  %v6387_v60 = vpack.c.bf16 %v137_v41, %v130_v39  ;;  %v131_v14 = vld [vmem:[%s7570_s0 + $0x2d0] sm:$0xff]  ;;  %v5117_v39 = vld [vmem:[%s7571_s1 + $0x16c] ss:$16 sps:$4 sm:$0xff]  }
  0xb5   :  { %2017 = vmatprep.subr.bf16.mxu1 %v5108_v20  ;;  %v138_v20 = vld [vmem:[%s7570_s0 + $0x308] sm:$0xff] }
  0xb6   :  { %7595 = vst [vmem:[#allocation7_spill] sm:$0xff] %v6387_v60  ;;  %1741 = vmatmul.mubr.bf16.gmra.mxu0 %v6362_v30  ;;  %v5120_v41 = vld [vmem:[%s7571_s1 + $0x36c] ss:$16 sps:$4 sm:$0xff]   ;;  %v5133_v30 = vld [vmem:[%s7571_s1 + $0x108] ss:$16 sps:$4 sm:$0xff]  }
  0xb7   :  { %4513 = vmatmul.mubr.msk.bf16.gmra.mxu1 %vm1407_vm0, %v6364_v32  ;;  %1905 = vmatpush2.bf16.msra.mxu0 %v5103_v22  ;;  %v5115_v22 = vld [vmem:[%s7571_s1 + $0x168] ss:$16 sps:$4 sm:$0xff]   ;;  %v151_v32 = vld [vmem:[%s7570_s0 + $0x370] sm:$0xff] }
  0xb8   :  { %2018 = vmatpush2.bf16.msra.mxu1 %v5106_v48  ;;  %1906 = vmatprep.subr.bf16.mxu0 %v5111_v58  ;;  %v144_v48 = vld [vmem:[%s7570_s0 + $0x338] sm:$0xff]  ;;  %v6418_v58 = vpack.c.bf16 %v136_v13, %v129_v12 }
  0xb9   :  { %2019 = vmatprep.subr.bf16.mxu1 %v5114_v1  ;;  %1750 = vmatprep.mubr.bf16.mxu0 %v6387_v60  ;;  %v6420_v1 = vpack.c.bf16 %v138_v20, %v131_v14  ;;  %v5123_v60 = vld [vmem:[%s7571_s1 + $0x14c] ss:$16 sps:$4 sm:$0xff]   ;;  %v5121_v13 = vld [vmem:[%s7571_s1 + $0x148] ss:$16 sps:$4 sm:$0xff]   ;;  %v143_v14 = vld [vmem:[%s7570_s0 + $0x330] sm:$0xff] }
  0xba   :  { %1863 = vmatprep.mubr.bf16.mxu1 %v7579_v42  ;;  %7596 = vst [vmem:[#allocation8_spill] sm:$0xff] %v6418_v58  ;;  %v5118_v42 = vld [vmem:[%s7571_s1 + $0x368] ss:$16 sps:$4 sm:$0xff]   ;;  %v5126_v12 = vld [vmem:[%s7571_s1 + $0x34c] ss:$16 sps:$4 sm:$0xff]  }
  0xbb   :  { %7597 = vst [vmem:[#allocation9_spill] sm:$0xff] %v6420_v1  ;;  %1907 = vmatpush2.bf16.msra.mxu0 %v5109_v10  ;;  %v5124_v10 = vld [vmem:[%s7571_s1 + $0x348] ss:$16 sps:$4 sm:$0xff]  }
  0xbc   :  { %2020 = vmatpush2.bf16.msra.mxu1 %v5112_v59  ;;  %1908 = vmatprep.subr.bf16.mxu0 %v5117_v39  ;;  %v6440_v59 = vpack.c.bf16 %v151_v32, %v144_v48  ;;  %v150_v20 = vld [vmem:[%s7570_s0 + $0x368] sm:$0xff]  ;;  %v145_v39 = vld [vmem:[%s7570_s0 + $0x340] sm:$0xff]  ;;  %v152_v32 = vld [vmem:[%s7570_s0 + $0x378] sm:$0xff] }
  0xbd   :  { %2021 = vmatprep.subr.bf16.mxu1 %v5120_v41  ;;  %v5129_v41 = vld [vmem:[%s7571_s1 + $0x12c] ss:$16 sps:$4 sm:$0xff]  }
  0xbe   :  { %7598 = vst [vmem:[#allocation10_spill] sm:$0xff] %v6440_v59  ;;  %1751 = vmatmul.mubr.bf16.gmra.mxu0 %v6418_v58  ;;  %v5132_v48 = vld [vmem:[%s7571_s1 + $0x32c] ss:$16 sps:$4 sm:$0xff]   ;;  %v7599_v58 = vmov 0  }
  0xbf   :  { %4514 = vmatmul.mubr.msk.bf16.gmra.mxu1 %vm1407_vm0, %v6420_v1  ;;  %1909 = vmatpush2.bf16.msra.mxu0 %v5115_v22  ;;  %v5127_v1 = vld [vmem:[%s7571_s1 + $0x128] ss:$16 sps:$4 sm:$0xff]   ;;  %v6471_v22 = vpack.c.bf16 %v150_v20, %v143_v14 }
  0xc0   :  { %2022 = vmatpush2.bf16.msra.mxu1 %v5118_v42  ;;  %1910 = vmatprep.subr.bf16.mxu0 %v5123_v60  ;;  %v5130_v42 = vld [vmem:[%s7571_s1 + $0x328] ss:$16 sps:$4 sm:$0xff]   ;;  %v6473_v60 = vpack.c.bf16 %v152_v32, %v145_v39 }
  0xc1   :  { %2023 = vmatprep.subr.bf16.mxu1 %v5126_v12  ;;  %1760 = vmatprep.mubr.bf16.mxu0 %v6440_v59  ;;  %v5135_v12 = vld [vmem:[%s7571_s1 + $0x10c] ss:$16 sps:$4 sm:$0xff]   ;;  %v5136_v14 = vld [vmem:[%s7571_s1 + $0x308] ss:$16 sps:$4 sm:$0xff]  }
  0xc2   :  { %1873 = vmatprep.mubr.bf16.mxu1 %v7599_v58  ;;  %v5138_v59 = vld [vmem:[%s7571_s1 + $0x30c] ss:$16 sps:$4 sm:$0xff]   ;;  %v5139_v20 = vld [vmem:[%s7571_s1 + $0x4e8] ss:$16 sps:$4 sm:$0xff]  }
  0xc3   :  { %1911 = vmatpush2.bf16.msra.mxu0 %v5121_v13  ;;  %v5141_v13 = vld [vmem:[%s7571_s1 + $0x4ec] ss:$16 sps:$4 sm:$0xff]   ;;  %v5142_v39 = vld [vmem:[%s7571_s1 + $0x608] ss:$16 sps:$4 sm:$0xff]  }
  0xc4   :  { %2024 = vmatpush2.bf16.msra.mxu1 %v5124_v10  ;;  %1912 = vmatprep.subr.bf16.mxu0 %v5129_v41  ;;  %v5144_v10 = vld [vmem:[%s7571_s1 + $0x60c] ss:$16 sps:$4 sm:$0xff]   ;;  %v5192_v41 = vld [vmem:[#allocation2 + $0xe4] ss:$16 sps:$4 sm:$0xff]  }
  0xc5   :  { %2025 = vmatprep.subr.bf16.mxu1 %v5132_v48  ;;  %v5190_v48 = vld [vmem:[#allocation2 + $0xe0] ss:$16 sps:$4 sm:$0xff]  }
  0xc6   :  { %1761 = vmatmul.mubr.bf16.gmra.mxu0 %v6471_v22 }
  0xc7   :  { %4515 = vmatmul.mubr.msk.bf16.gmra.mxu1 %vm1407_vm0, %v6473_v60  ;;  %1913 = vmatpush2.bf16.msra.mxu0 %v5127_v1  ;;  %v5147_v1 = vld [vmem:[%s7571_s1 + $0x4cc] ss:$16 sps:$4 sm:$0xff]  }
  0xc8   :  { %2026 = vmatpush2.bf16.msra.mxu1 %v5130_v42  ;;  %1914 = vmatprep.subr.bf16.mxu0 %v5135_v12  ;;  %v5195_v42 = vld [vmem:[#allocation2 + $0xc4] ss:$16 sps:$4 sm:$0xff]  }
  0xc9   :  { %2027 = vmatprep.subr.bf16.mxu1 %v5138_v59  ;;  %1916 = vmatprep.mubr.bf16.mxu0 %v5643_v53  ;;  %v5145_v53 = vld [vmem:[%s7571_s1 + $0x4c8] ss:$16 sps:$4 sm:$0xff]  }
  0xca   :  { %2029 = vmatprep.mubr.bf16.mxu1 %v5645_v54  ;;  %v5150_v54 = vld [vmem:[%s7571_s1 + $0x4ac] ss:$16 sps:$4 sm:$0xff]   ;;  %v5166_v59 = vld [vmem:[%s7571_s1 + $0x5e8] ss:$16 sps:$4 sm:$0xff]  }
  0xcb   :  { %1915 = vmatpush2.bf16.msra.mxu0 %v5133_v30  ;;  %v5148_v30 = vld [vmem:[%s7571_s1 + $0x4a8] ss:$16 sps:$4 sm:$0xff]  }
  0xcc   :  { %2028 = vmatpush2.bf16.msra.mxu1 %v5136_v14  ;;  %2110 = vmatprep.subr.bf16.mxu0 %v5141_v13 }
  0xcd   :  { %2237 = vmatprep.subr.bf16.mxu1 %v5144_v10 }
  0xce   :  { %1917 = vmatmul.mubr.bf16.vlgmr.msra.gmra.mxu0 %v5721_v15  ;;  %v5153_v15 = vld [vmem:[%s7571_s1 + $0x48c] ss:$16 sps:$4 sm:$0xff]  }
  0xcf   :  { %2030 = vmatmul.mubr.bf16.vlgmr.msra.gmra.mxu1 %v5723_v16  ;;  %2111 = vmatpush1.bf16.msra.mxu0 %v5139_v20  ;;  %v5151_v16 = vld [vmem:[%s7571_s1 + $0x488] ss:$16 sps:$4 sm:$0xff]  }
  0xd0   :  { %2238 = vmatpush1.bf16.msra.mxu1 %v5142_v39  ;;  %2112 = vmatprep.subr.bf16.mxu0 %v5147_v1  ;;  %v5193_v39 = vld [vmem:[#allocation2 + $0xc0] ss:$16 sps:$4 sm:$0xff]  }
  0xd1   :  { %1926 = vmatprep.mubr.bf16.mxu0 %v5737_v21  ;;  %2039 = vmatprep.mubr.bf16.mxu1 %v5742_v23  ;;  %v5156_v21 = vld [vmem:[%s7571_s1 + $0x46c] ss:$16 sps:$4 sm:$0xff]   ;;  %v5154_v23 = vld [vmem:[%s7571_s1 + $0x468] ss:$16 sps:$4 sm:$0xff]  }
  0xd3   :  { %2113 = vmatpush1.bf16.msra.mxu0 %v5145_v53 }
  0xd4   :  { %2114 = vmatprep.subr.bf16.mxu0 %v5150_v54  ;;  %v5198_v54 = vld [vmem:[#allocation2 + $0xa4] ss:$16 sps:$4 sm:$0xff]  }
  0xd6   :  { %1927 = vmatmul.mubr.bf16.gmra.mxu0 %v5775_v33  ;;  %v5159_v33 = vld [vmem:[%s7571_s1 + $0x44c] ss:$16 sps:$4 sm:$0xff]  }
  0xd7   :  { %2040 = vmatmul.mubr.bf16.gmra.mxu1 %v5777_v34  ;;  %2115 = vmatpush1.bf16.msra.mxu0 %v5148_v30  ;;  %v5157_v34 = vld [vmem:[%s7571_s1 + $0x448] ss:$16 sps:$4 sm:$0xff]  }
  0xd8   :  { %1936 = vmatprep.mubr.bf16.mxu0 %v5782_v36  ;;  %2116 = vmatprep.subr.bf16.mxu0 %v5153_v15  ;;  %v5162_v36 = vld [vmem:[%s7571_s1 + $0x42c] ss:$16 sps:$4 sm:$0xff]  }
  0xd9   :  { %2049 = vmatprep.mubr.bf16.mxu1 %v5787_v38  ;;  %v5160_v38 = vld [vmem:[%s7571_s1 + $0x428] ss:$16 sps:$4 sm:$0xff]  }
  0xdb   :  { %2117 = vmatpush1.bf16.msra.mxu0 %v5151_v16  ;;  %v5196_v16 = vld [vmem:[#allocation2 + $0xa0] ss:$16 sps:$4 sm:$0xff]  }
  0xdc   :  { %2118 = vmatprep.subr.bf16.mxu0 %v5156_v21  ;;  %v5201_v21 = vld [vmem:[#allocation2 + $0x84] ss:$16 sps:$4 sm:$0xff]  }
  0xde   :  { %1937 = vmatmul.mubr.bf16.gmra.mxu0 %v5823_v49  ;;  %v5165_v49 = vld [vmem:[%s7571_s1 + $0x40c] ss:$16 sps:$4 sm:$0xff]  }
  0xdf   :  { %2050 = vmatmul.mubr.bf16.gmra.mxu1 %v5825_v50  ;;  %2119 = vmatpush1.bf16.msra.mxu0 %v5154_v23  ;;  %v5163_v50 = vld [vmem:[%s7571_s1 + $0x408] ss:$16 sps:$4 sm:$0xff]  }
  0xe0   :  { %1946 = vmatprep.mubr.bf16.mxu0 %v5830_v52  ;;  %2120 = vmatprep.subr.bf16.mxu0 %v5159_v33  ;;  %v407_v52 = vlaneseq }
  0xe1   :  { %2059 = vmatprep.mubr.bf16.mxu1 %v5835_v56  ;;  %v5168_v56 = vld [vmem:[%s7571_s1 + $0x5ec] ss:$16 sps:$4 sm:$0xff]  }
  0xe2   :  { %v6568_v32 = vshrl.u32 %v407_v52, 7 }
  0xe3   :  { %2121 = vmatpush1.bf16.msra.mxu0 %v5157_v34 }
  0xe4   :  { %2122 = vmatprep.subr.bf16.mxu0 %v5162_v36  ;;  %7600 = vst [vmem:[#allocation11_spill] sm:$0xff] %v6568_v32 }
  0xe6   :  { %1947 = vmatmul.mubr.bf16.gmra.mxu0 %v5871_v3  ;;  %v5171_v3 = vld [vmem:[%s7571_s1 + $0x5cc] ss:$16 sps:$4 sm:$0xff]  }
  0xe7   :  { %2060 = vmatmul.mubr.bf16.gmra.mxu1 %v5873_v4  ;;  %2123 = vmatpush1.bf16.msra.mxu0 %v5160_v38  ;;  %v5169_v4 = vld [vmem:[%s7571_s1 + $0x5c8] ss:$16 sps:$4 sm:$0xff]  }
  0xe8   :  { %1956 = vmatprep.mubr.bf16.mxu0 %v5878_v6  ;;  %2124 = vmatprep.subr.bf16.mxu0 %v5165_v49  ;;  %v5174_v6 = vld [vmem:[%s7571_s1 + $0x5ac] ss:$16 sps:$4 sm:$0xff]   ;;  %v5199_v49 = vld [vmem:[#allocation2 + $0x80] ss:$16 sps:$4 sm:$0xff]  }
  0xe9   :  { %2069 = vmatprep.mubr.bf16.mxu1 %v5883_v8  ;;  %v5172_v8 = vld [vmem:[%s7571_s1 + $0x5a8] ss:$16 sps:$4 sm:$0xff]  }
  0xeb   :  { %2125 = vmatpush1.bf16.msra.mxu0 %v5163_v50 }
  0xec   :  { %2126 = vmatprep.subr.bf16.mxu0 %v5168_v56  ;;  %v5204_v56 = vld [vmem:[#allocation2 + $0x64] ss:$16 sps:$4 sm:$0xff]  }
  0xee   :  { %1957 = vmatmul.mubr.bf16.gmra.mxu0 %v5922_v24  ;;  %v5177_v24 = vld [vmem:[%s7571_s1 + $0x58c] ss:$16 sps:$4 sm:$0xff]  }
  0xef   :  { %2070 = vmatmul.mubr.bf16.gmra.mxu1 %v5924_v25  ;;  %2127 = vmatpush2.bf16.msra.mxu0 %v5166_v59  ;;  %v5175_v25 = vld [vmem:[%s7571_s1 + $0x588] ss:$16 sps:$4 sm:$0xff]  }
  0xf0   :  { %1966 = vmatprep.mubr.bf16.mxu0 %v5929_v27  ;;  %2128 = vmatprep.subr.bf16.mxu0 %v5171_v3  ;;  %v5180_v27 = vld [vmem:[%s7571_s1 + $0x56c] ss:$16 sps:$4 sm:$0xff]  }
  0xf1   :  { %2079 = vmatprep.mubr.bf16.mxu1 %v5934_v29  ;;  %v5178_v29 = vld [vmem:[%s7571_s1 + $0x568] ss:$16 sps:$4 sm:$0xff]  }
  0xf3   :  { %2129 = vmatpush2.bf16.msra.mxu0 %v5169_v4  ;;  %v5202_v4 = vld [vmem:[#allocation2 + $0x60] ss:$16 sps:$4 sm:$0xff]  }
  0xf4   :  { %2130 = vmatprep.subr.bf16.mxu0 %v5174_v6  ;;  %v5288_v6 = vld [vmem:[#allocation2 + $0x2e4] ss:$16 sps:$4 sm:$0xff]  }
  0xf5   :  { %3335 = vmatprep.subr.bf16.mxu1 %v5288_v6  ;;  %v5219_v6 = vld [vmem:[#allocation2 + $0x1c4] ss:$16 sps:$4 sm:$0xff]  }
  0xf6   :  { %1967 = vmatmul.mubr.bf16.gmra.mxu0 %v5970_v44  ;;  %v5183_v44 = vld [vmem:[%s7571_s1 + $0x54c] ss:$16 sps:$4 sm:$0xff]  }
  0xf7   :  { %2080 = vmatmul.mubr.bf16.gmra.mxu1 %v5972_v45  ;;  %2131 = vmatpush2.bf16.msra.mxu0 %v5172_v8  ;;  %v5181_v45 = vld [vmem:[%s7571_s1 + $0x548] ss:$16 sps:$4 sm:$0xff]   ;;  %v5207_v8 = vld [vmem:[#allocation2 + $0x44] ss:$16 sps:$4 sm:$0xff]  }
  0xf8   :  { %1976 = vmatprep.mubr.bf16.mxu0 %v5977_v47  ;;  %2132 = vmatprep.subr.bf16.mxu0 %v5177_v24  ;;  %v5186_v47 = vld [vmem:[%s7571_s1 + $0x52c] ss:$16 sps:$4 sm:$0xff]   ;;  %v5286_v24 = vld [vmem:[#allocation2 + $0x2e0] ss:$16 sps:$4 sm:$0xff]  }
  0xf9   :  { %2089 = vmatprep.mubr.bf16.mxu1 %v5982_v51  ;;  %v5184_v51 = vld [vmem:[%s7571_s1 + $0x528] ss:$16 sps:$4 sm:$0xff]  }
  0xfb   :  { %2133 = vmatpush2.bf16.msra.mxu0 %v5175_v25 }
  0xfc   :  { %2134 = vmatprep.subr.bf16.mxu0 %v5180_v27 }
  0xfe   :  { %1977 = vmatmul.mubr.bf16.gmra.mxu0 %v6018_v2  ;;  %v5189_v2 = vld [vmem:[%s7571_s1 + $0x50c] ss:$16 sps:$4 sm:$0xff]  }
  0xff   :  { %2090 = vmatmul.mubr.bf16.gmra.mxu1 %v6020_v5  ;;  %2135 = vmatpush2.bf16.msra.mxu0 %v5178_v29  ;;  %v5187_v5 = vld [vmem:[%s7571_s1 + $0x508] ss:$16 sps:$4 sm:$0xff]  }
 0x100   :  { %1986 = vmatprep.mubr.bf16.mxu0 %v6025_v9  ;;  %2136 = vmatprep.subr.bf16.mxu0 %v5183_v44  ;;  %v7586_v9 = vsub.s32 0, %v6568_v32 }
 0x101   :  { %2099 = vmatprep.mubr.bf16.mxu1 %v6030_v11  ;;  %v405_v11 = vld [vmem:[%s7572_s2] sm:$0xf] }
 0x103   :  { %2137 = vmatpush2.bf16.msra.mxu0 %v5181_v45 }
 0x104   :  { %2138 = vmatprep.subr.bf16.mxu0 %v5186_v47  ;;  %v5205_v47 = vld [vmem:[#allocation2 + $0x40] ss:$16 sps:$4 sm:$0xff]  }
 0x106   :  { %1987 = vmatmul.mubr.bf16.gmra.mxu0 %v6060_v26  ;;  %v7587_v26 = vsub.s32 1, %v6568_v32 }
 0x107   :  { %2100 = vmatmul.mubr.bf16.gmra.mxu1 %v6062_v28  ;;  %2139 = vmatpush2.bf16.msra.mxu0 %v5184_v51  ;;  %v6635_v28 = vrot.slane %v405_v11, %v7586_v9  ;;  %v5291_v51 = vld [vmem:[#allocation2 + $0x2c4] ss:$16 sps:$4 sm:$0xff]  }
 0x108   :  { %2142 = vmatprep.mubr.bf16.mxu0 %v6067_v31  ;;  %2140 = vmatprep.subr.bf16.mxu0 %v5189_v2  ;;  %v6639_v31 = vrot.slane %v405_v11, %v7587_v26 }
 0x109   :  { %2255 = vmatprep.mubr.bf16.mxu1 %v7599_v58 }
 0x10b   :  { %2141 = vmatpush2.bf16.msra.mxu0 %v5187_v5 }
 0x10c   :  { %3222 = vmatprep.subr.bf16.mxu0 %v5192_v41 }
 0x10e   :  { %v1466_v12 = vpop.f32.mrf.mxu0  ;;  %2143 = vmatmul.mubr.bf16.vlgmr.msra.gmra.mxu0 %v6100_v55 }
 0x10f   :  { %v1579_v14 = vpop.f32.mrf.mxu1  ;;  %4516 = vmatmul.mubr.msk.bf16.vlgmr.msra.gmra.mxu1 %vm1407_vm0, %v6102_v57  ;;  %v1467_v13 = vadd.f32 %v1466_v12, %v6635_v28  ;;  %2152 = vmatprep.mubr.bf16.mxu0 %v6119_v63  ;;  %v5208_v12 = vld [vmem:[#allocation2 + $0x20] ss:$16 sps:$4 sm:$0xff]  }
 0x110   :  { %2265 = vmatprep.mubr.bf16.mxu1 %v7599_v58  ;;  %v1468_v10 = vpop.f32.mrf.mxu0  ;;  %3223 = vmatpush1.bf16.msra.mxu0 %v5190_v48 }
 0x111   :  { %v1581_v20 = vpop.f32.mrf.mxu1  ;;  %v6647_v1 = vadd.f32 %v1579_v14, %v1467_v13  ;;  %v1469_v53 = vadd.f32 %v1468_v10, %v6639_v31  ;;  %3224 = vmatprep.subr.bf16.mxu0 %v5195_v42  ;;  %3336 = vmatpush1.bf16.msra.mxu1 %v5286_v24  ;;  %v5294_v14 = vld [vmem:[#allocation2 + $0x2a4] ss:$16 sps:$4 sm:$0xff]   ;;  %v5292_v10 = vld [vmem:[#allocation2 + $0x2a0] ss:$16 sps:$4 sm:$0xff]  }
 0x112   :  { %v6650_v55 = vpop.f32.mrf.mxu0  ;;  %3337 = vmatprep.subr.bf16.mxu1 %v5291_v51  ;;  %v5213_v13 = vld [vmem:[#allocation2 + $0x4] ss:$16 sps:$4 sm:$0xff]  }
 0x113   :  { %v6652_v30 = vpop.f32.mrf.mxu1  ;;  %v6654_v57 = vadd.f32 %v1581_v20, %v1469_v53 }
 0x114   :  { %v6656_v15 = vpop.f32.mrf.mxu0  ;;  %3225 = vmatpush1.bf16.msra.mxu0 %v5193_v39 }
 0x115   :  { %v6658_v63 = vpop.f32.mrf.mxu1  ;;  %3226 = vmatprep.subr.bf16.mxu0 %v5198_v54 }
 0x116   :  { %v1476_v23 = vpop.f32.mrf.mxu0  ;;  %2153 = vmatmul.mubr.bf16.gmra.mxu0 %v6150_v18 }
 0x117   :  { %v1589_v33 = vpop.f32.mrf.mxu1  ;;  %4517 = vmatmul.mubr.msk.bf16.gmra.mxu1 %vm1407_vm0, %v6152_v19  ;;  %v1477_v34 = vadd.f32 %v1476_v23, %v6635_v28  ;;  %2162 = vmatprep.mubr.bf16.mxu0 %v6175_v40  ;;  %v5297_v23 = vld [vmem:[#allocation2 + $0x284] ss:$16 sps:$4 sm:$0xff]  }
 0x118   :  { %2275 = vmatprep.mubr.bf16.mxu1 %v7599_v58  ;;  %v1478_v36 = vpop.f32.mrf.mxu0  ;;  %3227 = vmatpush1.bf16.msra.mxu0 %v5196_v16 }
 0x119   :  { %v1591_v38 = vpop.f32.mrf.mxu1  ;;  %v6666_v50 = vadd.f32 %v1589_v33, %v1477_v34  ;;  %v1479_v52 = vadd.f32 %v1478_v36, %v6639_v31  ;;  %3228 = vmatprep.subr.bf16.mxu0 %v5201_v21  ;;  %v5211_v21 = vld [vmem:[#allocation2] ss:$16 sps:$4 sm:$0xff]  }
 0x11a   :  { %v6669_v18 = vpop.f32.mrf.mxu0 }
 0x11b   :  { %v6671_v59 = vpop.f32.mrf.mxu1  ;;  %v6673_v19 = vadd.f32 %v1591_v38, %v1479_v52  ;;  %v1481_v32 = vadd.f32 %v6669_v18, %v6635_v28 }
 0x11c   :  { %v6675_v3 = vpop.f32.mrf.mxu0  ;;  %3229 = vmatpush1.bf16.msra.mxu0 %v5199_v49 }
 0x11d   :  { %v6677_v40 = vpop.f32.mrf.mxu1  ;;  %3230 = vmatprep.subr.bf16.mxu0 %v5204_v56  ;;  %v5214_v56 = vld [vmem:[#allocation2 + $0x1e0] ss:$16 sps:$4 sm:$0xff]  }
 0x11e   :  { %v1486_v25 = vpop.f32.mrf.mxu0  ;;  %2163 = vmatmul.mubr.bf16.gmra.mxu0 %v6206_v62  ;;  %v5210_v62 = vld [vmem:[#allocation2 + $0x24] ss:$16 sps:$4 sm:$0xff]  }
 0x11f   :  { %v1599_v27 = vpop.f32.mrf.mxu1  ;;  %4518 = vmatmul.mubr.msk.bf16.gmra.mxu1 %vm1407_vm0, %v6208_v0  ;;  %v1487_v29 = vadd.f32 %v1486_v25, %v6635_v28  ;;  %2172 = vmatprep.mubr.bf16.mxu0 %v6228_v17  ;;  %v5289_v0 = vld [vmem:[#allocation2 + $0x2c0] ss:$16 sps:$4 sm:$0xff]  }
 0x120   :  { %2285 = vmatprep.mubr.bf16.mxu1 %v7599_v58  ;;  %v1488_v44 = vpop.f32.mrf.mxu0  ;;  %3231 = vmatpush1.bf16.msra.mxu0 %v5202_v4  ;;  %v5300_v4 = vld [vmem:[#allocation2 + $0x264] ss:$16 sps:$4 sm:$0xff]  }
 0x121   :  { %v1601_v45 = vpop.f32.mrf.mxu1  ;;  %v6685_v2 = vadd.f32 %v1599_v27, %v1487_v29  ;;  %v1489_v5 = vadd.f32 %v1488_v44, %v6639_v31  ;;  %3232 = vmatprep.subr.bf16.mxu0 %v5207_v8  ;;  %3338 = vmatpush1.bf16.msra.mxu1 %v5289_v0  ;;  %v5298_v8 = vld [vmem:[#allocation2 + $0x260] ss:$16 sps:$4 sm:$0xff]  }
 0x122   :  { %v6688_v11 = vpop.f32.mrf.mxu0  ;;  %3339 = vmatprep.subr.bf16.mxu1 %v5294_v14 }
 0x123   :  { %v6690_v41 = vpop.f32.mrf.mxu1  ;;  %v6692_v17 = vadd.f32 %v1601_v45, %v1489_v5  ;;  %v5217_v45 = vld [vmem:[#allocation2 + $0x1c0] ss:$16 sps:$4 sm:$0xff]  }
 0x124   :  { %v6694_v48 = vpop.f32.mrf.mxu0  ;;  %3233 = vmatpush1.bf16.msra.mxu0 %v5205_v47  ;;  %v5303_v47 = vld [vmem:[#allocation2 + $0x244] ss:$16 sps:$4 sm:$0xff]  }
 0x125   :  { %v6696_v42 = vpop.f32.mrf.mxu1  ;;  %3234 = vmatprep.subr.bf16.mxu0 %v5210_v62  ;;  %3340 = vmatpush1.bf16.msra.mxu1 %v5292_v10  ;;  %v5306_v10 = vld [vmem:[#allocation2 + $0x224] ss:$16 sps:$4 sm:$0xff]  }
 0x126   :  { %v1496_v20 = vpop.f32.mrf.mxu0  ;;  %2173 = vmatmul.mubr.bf16.gmra.mxu0 %v6259_v43  ;;  %v5216_v43 = vld [vmem:[#allocation2 + $0x1e4] ss:$16 sps:$4 sm:$0xff]   ;;  %3341 = vmatprep.subr.bf16.mxu1 %v5297_v23 }
 0x127   :  { %v1609_v39 = vpop.f32.mrf.mxu1  ;;  %4519 = vmatmul.mubr.msk.bf16.gmra.mxu1 %vm1407_vm0, %v6261_v46  ;;  %v1497_v53 = vadd.f32 %v1496_v20, %v6635_v28  ;;  %2182 = vmatprep.mubr.bf16.mxu0 %v6281_v7  ;;  %v5295_v46 = vld [vmem:[#allocation2 + $0x280] ss:$16 sps:$4 sm:$0xff]   ;;  %v5225_v20 = vld [vmem:[#allocation2 + $0x184] ss:$16 sps:$4 sm:$0xff]  }
 0x128   :  { %2295 = vmatprep.mubr.bf16.mxu1 %v7599_v58  ;;  %v1498_v54 = vpop.f32.mrf.mxu0  ;;  %3235 = vmatpush1.bf16.msra.mxu0 %v5208_v12 }
 0x129   :  { %v1611_v16 = vpop.f32.mrf.mxu1  ;;  %v6704_v33 = vadd.f32 %v1609_v39, %v1497_v53  ;;  %v1499_v34 = vadd.f32 %v1498_v54, %v6639_v31  ;;  %3236 = vmatprep.subr.bf16.mxu0 %v5213_v13  ;;  %3342 = vmatpush1.bf16.msra.mxu1 %v5295_v46  ;;  %v5220_v13 = vld [vmem:[#allocation2 + $0x1a0] ss:$16 sps:$4 sm:$0xff]  }
 0x12a   :  { %v6707_v36 = vpop.f32.mrf.mxu0  ;;  %3343 = vmatprep.subr.bf16.mxu1 %v5300_v4  ;;  %v5304_v39 = vld [vmem:[#allocation2 + $0x220] ss:$16 sps:$4 sm:$0xff]   ;;  %v5309_v4 = vld [vmem:[#allocation2 + $0x204] ss:$16 sps:$4 sm:$0xff]  }
 0x12b   :  { %v6709_v38 = vpop.f32.mrf.mxu1  ;;  %v6711_v7 = vadd.f32 %v1611_v16, %v1499_v34  ;;  %v7601_v16 = vld [vmem:[#allocation5_spill] sm:$0xff]  ;;  %v7603_v34 = vld [vmem:[#allocation7_spill] sm:$0xff] }
 0x12c   :  { %v6713_v49 = vpop.f32.mrf.mxu0  ;;  %3237 = vmatpush1.bf16.msra.mxu0 %v5211_v21  ;;  %v7602_v21 = vld [vmem:[#allocation6_spill] sm:$0xff] }
 0x12d   :  { %v6715_v52 = vpop.f32.mrf.mxu1  ;;  %3238 = vmatprep.subr.bf16.mxu0 %v5216_v43  ;;  %3344 = vmatpush1.bf16.msra.mxu1 %v5298_v8 }
 0x12e   :  { %v1506_v24 = vpop.f32.mrf.mxu0  ;;  %2183 = vmatmul.mubr.bf16.gmra.mxu0 %v6312_v35  ;;  %v5222_v35 = vld [vmem:[#allocation2 + $0x1a4] ss:$16 sps:$4 sm:$0xff]   ;;  %3345 = vmatprep.subr.bf16.mxu1 %v5303_v47 }
 0x12f   :  { %v1619_v25 = vpop.f32.mrf.mxu1  ;;  %4520 = vmatmul.mubr.msk.bf16.gmra.mxu1 %vm1407_vm0, %v6314_v37  ;;  %v1507_v27 = vadd.f32 %v1506_v24, %v6635_v28  ;;  %2192 = vmatprep.mubr.bf16.mxu0 %v6334_v61  ;;  %v5301_v37 = vld [vmem:[#allocation2 + $0x240] ss:$16 sps:$4 sm:$0xff]   ;;  %v5228_v24 = vld [vmem:[#allocation2 + $0x164] ss:$16 sps:$4 sm:$0xff]  }
 0x130   :  { %2305 = vmatprep.mubr.bf16.mxu1 %v7599_v58  ;;  %v1508_v29 = vpop.f32.mrf.mxu0  ;;  %3239 = vmatpush2.bf16.msra.mxu0 %v5214_v56  ;;  %v5223_v56 = vld [vmem:[#allocation2 + $0x180] ss:$16 sps:$4 sm:$0xff]  }
 0x131   :  { %v1621_v44 = vpop.f32.mrf.mxu1  ;;  %v6723_v51 = vadd.f32 %v1619_v25, %v1507_v27  ;;  %v1509_v5 = vadd.f32 %v1508_v29, %v6639_v31  ;;  %3240 = vmatprep.subr.bf16.mxu0 %v5219_v6  ;;  %3346 = vmatpush1.bf16.msra.mxu1 %v5301_v37  ;;  %v5307_v25 = vld [vmem:[#allocation2 + $0x200] ss:$16 sps:$4 sm:$0xff]   ;;  %v5231_v37 = vld [vmem:[#allocation2 + $0x144] ss:$16 sps:$4 sm:$0xff]  }
 0x132   :  { %v6726_v62 = vpop.f32.mrf.mxu0  ;;  %3347 = vmatprep.subr.bf16.mxu1 %v5306_v10 }
 0x133   :  { %v6728_v0 = vpop.f32.mrf.mxu1  ;;  %v6730_v61 = vadd.f32 %v1621_v44, %v1509_v5  ;;  %v5226_v5 = vld [vmem:[#allocation2 + $0x160] ss:$16 sps:$4 sm:$0xff]  }
 0x134   :  { %v6732_v12 = vpop.f32.mrf.mxu0  ;;  %3241 = vmatpush2.bf16.msra.mxu0 %v5217_v45 }
 0x135   :  { %v6734_v14 = vpop.f32.mrf.mxu1  ;;  %3242 = vmatprep.subr.bf16.mxu0 %v5222_v35  ;;  %3348 = vmatpush1.bf16.msra.mxu1 %v5304_v39  ;;  %v5312_v35 = vld [vmem:[#allocation2 + $0x3e4] ss:$16 sps:$4 sm:$0xff]   ;;  %v7604_v39 = vld [vmem:[#allocation8_spill] sm:$0xff] }
 0x136   :  { %v1516_v53 = vpop.f32.mrf.mxu0  ;;  %2193 = vmatmul.mubr.bf16.gmra.mxu0 %v7601_v16  ;;  %3349 = vmatprep.subr.bf16.mxu1 %v5309_v4  ;;  %v7606_v16 = vld [vmem:[#allocation10_spill] sm:$0xff]  ;;  %v5234_v4 = vld [vmem:[#allocation2 + $0x124] ss:$16 sps:$4 sm:$0xff]  }
 0x137   :  { %v1629_v54 = vpop.f32.mrf.mxu1  ;;  %4521 = vmatmul.mubr.msk.bf16.gmra.mxu1 %vm1407_vm0, %v7602_v21  ;;  %v1517_v23 = vadd.f32 %v1516_v53, %v6635_v28  ;;  %2202 = vmatprep.mubr.bf16.mxu0 %v7603_v34  ;;  %v7605_v53 = vld [vmem:[#allocation9_spill] sm:$0xff] }
 0x138   :  { %2315 = vmatprep.mubr.bf16.mxu1 %v7599_v58  ;;  %v1518_v43 = vpop.f32.mrf.mxu0  ;;  %3243 = vmatpush2.bf16.msra.mxu0 %v5220_v13  ;;  %v5310_v13 = vld [vmem:[#allocation2 + $0x3e0] ss:$16 sps:$4 sm:$0xff]  }
 0x139   :  { %v1631_v46 = vpop.f32.mrf.mxu1  ;;  %v6742_v6 = vadd.f32 %v1629_v54, %v1517_v23  ;;  %v1519_v8 = vadd.f32 %v1518_v43, %v6639_v31  ;;  %3244 = vmatprep.subr.bf16.mxu0 %v5225_v20  ;;  %3350 = vmatpush1.bf16.msra.mxu1 %v5307_v25  ;;  %v5229_v34 = vld [vmem:[#allocation2 + $0x140] ss:$16 sps:$4 sm:$0xff]   ;;  %v5315_v43 = vld [vmem:[#allocation2 + $0x3c4] ss:$16 sps:$4 sm:$0xff]  }
 0x13a   :  { %v6745_v27 = vpop.f32.mrf.mxu0  ;;  %3351 = vmatprep.subr.bf16.mxu1 %v5312_v35  ;;  %v5232_v35 = vld [vmem:[#allocation2 + $0x120] ss:$16 sps:$4 sm:$0xff]  }
 0x13b   :  { %v6747_v29 = vpop.f32.mrf.mxu1  ;;  %v6749_v44 = vadd.f32 %v1631_v46, %v1519_v8  ;;  %v5313_v8 = vld [vmem:[#allocation2 + $0x3c0] ss:$16 sps:$4 sm:$0xff]  }
 0x13c   :  { %v6751_v45 = vpop.f32.mrf.mxu0  ;;  %3245 = vmatpush2.bf16.msra.mxu0 %v5223_v56 }
 0x13d   :  { %v6753_v47 = vpop.f32.mrf.mxu1  ;;  %3246 = vmatprep.subr.bf16.mxu0 %v5228_v24  ;;  %3352 = vmatpush2.bf16.msra.mxu1 %v5310_v13 }
 0x13e   :  { %v1526_v10 = vpop.f32.mrf.mxu0  ;;  %2203 = vmatmul.mubr.bf16.gmra.mxu0 %v7604_v39  ;;  %3353 = vmatprep.subr.bf16.mxu1 %v5315_v43  ;;  %v5237_v39 = vld [vmem:[#allocation2 + $0x104] ss:$16 sps:$4 sm:$0xff]  }
 0x13f   :  { %v1639_v20 = vpop.f32.mrf.mxu1  ;;  %4522 = vmatmul.mubr.msk.bf16.gmra.mxu1 %vm1407_vm0, %v7605_v53  ;;  %v1527_v54 = vadd.f32 %v1526_v10, %v6635_v28  ;;  %2212 = vmatprep.mubr.bf16.mxu0 %v7606_v16 }
 0x140   :  { %2325 = vmatprep.mubr.bf16.mxu1 %v7599_v58  ;;  %v1528_v21 = vpop.f32.mrf.mxu0  ;;  %3247 = vmatpush2.bf16.msra.mxu0 %v5226_v5 }
 0x141   :  { %v1641_v23 = vpop.f32.mrf.mxu1  ;;  %v6761_v46 = vadd.f32 %v1639_v20, %v1527_v54  ;;  %v1529_v56 = vadd.f32 %v1528_v21, %v6639_v31  ;;  %3248 = vmatprep.subr.bf16.mxu0 %v5231_v37  ;;  %v5318_v20 = vld [vmem:[#allocation2 + $0x3a4] ss:$16 sps:$4 sm:$0xff]   ;;  %3354 = vmatpush2.bf16.msra.mxu1 %v5313_v8  ;;  %v5316_v37 = vld [vmem:[#allocation2 + $0x3a0] ss:$16 sps:$4 sm:$0xff]  }
 0x142   :  { %v6764_v24 = vpop.f32.mrf.mxu0  ;;  %3355 = vmatprep.subr.bf16.mxu1 %v5318_v20  ;;  %v5319_v8 = vld [vmem:[#allocation2 + $0x380] ss:$16 sps:$4 sm:$0xff]  }
 0x143   :  { %v6766_v25 = vpop.f32.mrf.mxu1  ;;  %v6768_v58 = vadd.f32 %v1641_v23, %v1529_v56  ;;  %v5235_v23 = vld [vmem:[#allocation2 + $0x100] ss:$16 sps:$4 sm:$0xff]  }
 0x144   :  { %v6770_v10 = vpop.f32.mrf.mxu0  ;;  %3249 = vmatpush2.bf16.msra.mxu0 %v5229_v34  ;;  %v5321_v34 = vld [vmem:[#allocation2 + $0x384] ss:$16 sps:$4 sm:$0xff]  }
 0x145   :  { %v6772_v5 = vpop.f32.mrf.mxu1  ;;  %3250 = vmatprep.subr.bf16.mxu0 %v5234_v4  ;;  %v5240_v4 = vld [vmem:[#allocation2 + $0xec] ss:$16 sps:$4 sm:$0xff]   ;;  %3356 = vmatpush2.bf16.msra.mxu1 %v5316_v37 }
 0x146   :  { %v1536_v13 = vpop.f32.mrf.mxu0  ;;  %2213 = vmatmul.mubr.bf16.gmra.mxu0 %v6471_v22  ;;  %3357 = vmatprep.subr.bf16.mxu1 %v5321_v34 }
 0x147   :  { %v1649_v53 = vpop.f32.mrf.mxu1  ;;  %4523 = vmatmul.mubr.msk.bf16.gmra.mxu1 %vm1407_vm0, %v6473_v60  ;;  %v1537_v54 = vadd.f32 %v1536_v13, %v6635_v28  ;;  %v5324_v13 = vld [vmem:[#allocation2 + $0x364] ss:$16 sps:$4 sm:$0xff]  }
 0x148   :  { %v1538_v16 = vpop.f32.mrf.mxu0  ;;  %3251 = vmatpush2.bf16.msra.mxu0 %v5232_v35 }
 0x149   :  { %v1651_v21 = vpop.f32.mrf.mxu1  ;;  %v6778_v43 = vadd.f32 %v1649_v53, %v1537_v54  ;;  %v1539_v56 = vadd.f32 %v1538_v16, %v6639_v31  ;;  %3252 = vmatprep.subr.bf16.mxu0 %v5237_v39  ;;  %v1471_v53 = vadd.f32 %v6650_v55, %v6635_v28  ;;  %3358 = vmatpush2.bf16.msra.mxu1 %v5319_v8  ;;  %v5322_v39 = vld [vmem:[#allocation2 + $0x360] ss:$16 sps:$4 sm:$0xff]  }
 0x14a   :  { %v6781_v22 = vpop.f32.mrf.mxu0  ;;  %3359 = vmatprep.subr.bf16.mxu1 %v5324_v13  ;;  %v1473_v16 = vadd.f32 %v6656_v15, %v6639_v31  ;;  %v5330_v15 = vld [vmem:[#allocation2 + $0x324] ss:$16 sps:$4 sm:$0xff]  }
 0x14b   :  { %7607 = vst [vmem:[#allocation5_spill] sm:$0xff] %v6778_v43  ;;  %7608 = vst [vmem:[#allocation6_spill] sm:$0xff] %v6781_v22  ;;  %v6783_v9 = vpop.f32.mrf.mxu1  ;;  %v6785_v60 = vadd.f32 %v1651_v21, %v1539_v56  ;;  %v5327_v56 = vld [vmem:[#allocation2 + $0x344] ss:$16 sps:$4 sm:$0xff]   ;;  %v1584_v26 = vadd.f32 %v6652_v30, %v1471_v53  ;;  %v1594_v22 = vadd.f32 %v6671_v59, %v1481_v32 }
 0x14c   :  { %7609 = vst [vmem:[#allocation7_spill] sm:$0xff] %v6783_v9  ;;  %v6787_v20 = vpop.f32.mrf.mxu0  ;;  %3253 = vmatpush2.bf16.msra.mxu0 %v5235_v23  ;;  %v1586_v43 = vadd.f32 %v6658_v63, %v1473_v16  ;;  %v1491_v32 = vadd.f32 %v6688_v11, %v6635_v28  ;;  %v1493_v11 = vadd.f32 %v6694_v48, %v6639_v31 }
 0x14d   :  { %7610 = vst [vmem:[#allocation8_spill] sm:$0xff] %v6785_v60  ;;  %7611 = vst [vmem:[#allocation9_spill] sm:$0xff] %v6787_v20  ;;  %v6789_v35 = vpop.f32.mrf.mxu1  ;;  %3448 = vmatprep.subr.bf16.mxu0 %v5240_v4  ;;  %3360 = vmatpush2.bf16.msra.mxu1 %v5322_v39 }
 0x14e   :  { %7612 = vst [vmem:[#allocation10_spill] sm:$0xff] %v6789_v35  ;;  %v1692_v37 = vpop.f32.mrf.mxu0  ;;  %v5325_v35 = vld [vmem:[#allocation2 + $0x340] ss:$16 sps:$4 sm:$0xff]   ;;  %3361 = vmatprep.subr.bf16.mxu1 %v5327_v56  ;;  %v1606_v48 = vadd.f32 %v6696_v42, %v1493_v11 }
 0x14f   :  { %v1805_v54 = vpop.f32.mrf.mxu1  ;;  %v1693_v55 = vadd.f32 %v1692_v37, %v6647_v1  ;;  %v1483_v37 = vadd.f32 %v6675_v3, %v6639_v31 }
 0x150   :  { %v1694_v21 = vpop.f32.mrf.mxu0 }
 0x151   :  { %v1807_v34 = vpop.f32.mrf.mxu1  ;;  %v1695_v23 = vadd.f32 %v1694_v21, %v6654_v57  ;;  %3362 = vmatpush2.bf16.msra.mxu1 %v5325_v35  ;;  %v5328_v57 = vld [vmem:[#allocation2 + $0x320] ss:$16 sps:$4 sm:$0xff]   ;;  %v1806_v39 = vadd.f32 %v1805_v54, %v1693_v55 }
 0x152   :  { %v1696_v4 = vpop.f32.mrf.mxu0  ;;  %3363 = vmatprep.subr.bf16.mxu1 %v5330_v15  ;;  %v5243_v15 = vld [vmem:[#allocation2 + $0xcc] ss:$16 sps:$4 sm:$0xff]  }
 0x153   :  { %v1809_v8 = vpop.f32.mrf.mxu1  ;;  %v1697_v13 = vadd.f32 %v1696_v4, %v1584_v26  ;;  %v1808_v20 = vadd.f32 %v1807_v34, %v1695_v23  ;;  %v5333_v4 = vld [vmem:[#allocation2 + $0x304] ss:$16 sps:$4 sm:$0xff]   ;;  %v2336_v35 = vmax.f32 %v1806_v39, 0.0 }
 0x154   :  { %v1698_v60 = vpop.f32.mrf.mxu0 }
 0x155   :  { %v1811_v9 = vpop.f32.mrf.mxu1  ;;  %v1810_v30 = vadd.f32 %v1809_v8, %v1697_v13  ;;  %v1699_v53 = vadd.f32 %v1698_v60, %v1586_v43  ;;  %v2337_v18 = vmax.f32 %v1808_v20, 0.0  ;;  %3364 = vmatpush2.bf16.msra.mxu1 %v5328_v57  ;;  %v5331_v60 = vld [vmem:[#allocation2 + $0x300] ss:$16 sps:$4 sm:$0xff]   ;;  %v5238_v13 = vld [vmem:[#allocation2 + $0xe8] ss:$16 sps:$4 sm:$0xff]  }
 0x156   :  { %v1702_v21 = vpop.f32.mrf.mxu0  ;;  %3365 = vmatprep.subr.bf16.mxu1 %v5333_v4  ;;  %v1604_v4 = vadd.f32 %v6690_v41, %v1491_v32  ;;  %v5249_v32 = vld [vmem:[#allocation2 + $0x8c] ss:$16 sps:$4 sm:$0xff]  }
 0x157   :  { %v1815_v1 = vpop.f32.mrf.mxu1  ;;  %v1812_v63 = vadd.f32 %v1811_v9, %v1699_v53  ;;  %v2340_v26 = vmax.f32 %v1810_v30, 0.0  ;;  %v1703_v54 = vadd.f32 %v1702_v21, %v6666_v50  ;;  %v1596_v9 = vadd.f32 %v6677_v40, %v1483_v37  ;;  %v5336_v30 = vld [vmem:[#allocation2 + $0x2ec] ss:$16 sps:$4 sm:$0xff]   ;;  %v5241_v37 = vld [vmem:[#allocation2 + $0xc8] ss:$16 sps:$4 sm:$0xff]  }
 0x158   :  { %v1704_v16 = vpop.f32.mrf.mxu0 }
 0x159   :  { %v1817_v56 = vpop.f32.mrf.mxu1  ;;  %v2341_v34 = vmax.f32 %v1812_v63, 0.0  ;;  %v1705_v43 = vadd.f32 %v1704_v16, %v6673_v19  ;;  %v6811_v59 = vpack.c.bf16 %v2340_v26, %v2336_v35  ;;  %3366 = vmatpush2.bf16.msra.mxu1 %v5331_v60  ;;  %v1816_v40 = vadd.f32 %v1815_v1, %v1703_v54 }
 0x15a   :  { %v1706_v23 = vpop.f32.mrf.mxu0  ;;  %3561 = vmatprep.subr.bf16.mxu1 %v5336_v30 }
 0x15b   :  { %v1819_v55 = vpop.f32.mrf.mxu1  ;;  %v1707_v3 = vadd.f32 %v1706_v23, %v1594_v22  ;;  %v6807_v8 = vpack.c.bf16 %v2341_v34, %v2337_v18  ;;  %v1818_v53 = vadd.f32 %v1817_v56, %v1705_v43  ;;  %v5246_v56 = vld [vmem:[#allocation2 + $0xac] ss:$16 sps:$4 sm:$0xff]   ;;  %v2344_v43 = vmax.f32 %v1816_v40, 0.0 }
 0x15c   :  { %v1708_v19 = vpop.f32.mrf.mxu0 }
 0x15d   :  { %v1821_v20 = vpop.f32.mrf.mxu1  ;;  %v1820_v50 = vadd.f32 %v1819_v55, %v1707_v3  ;;  %v1709_v57 = vadd.f32 %v1708_v19, %v1596_v9  ;;  %3254 = vmatprep.mubr.bf16.mxu0 %v6807_v8  ;;  %v2345_v18 = vmax.f32 %v1818_v53, 0.0  ;;  %v5244_v9 = vld [vmem:[#allocation2 + $0xa8] ss:$16 sps:$4 sm:$0xff]   ;;  %v1503_v53 = vadd.f32 %v6713_v49, %v6639_v31 }
 0x15e   :  { %v1712_v22 = vpop.f32.mrf.mxu0  ;;  %3255 = vmatmul.mubr.bf16.vlgmr.msra.gmra.mxu0 %v6811_v59 }
 0x15f   :  { %v1825_v39 = vpop.f32.mrf.mxu1  ;;  %v1822_v21 = vadd.f32 %v1821_v20, %v1709_v57  ;;  %3449 = vmatpush1.bf16.msra.mxu0 %v5238_v13  ;;  %v2348_v63 = vmax.f32 %v1820_v50, 0.0  ;;  %v1713_v60 = vadd.f32 %v1712_v22, %v6685_v2  ;;  %v5247_v57 = vld [vmem:[#allocation2 + $0x88] ss:$16 sps:$4 sm:$0xff]   ;;  %v1616_v49 = vadd.f32 %v6715_v52, %v1503_v53 }
 0x160   :  { %v1714_v26 = vpop.f32.mrf.mxu0  ;;  %3450 = vmatprep.subr.bf16.mxu0 %v5243_v15 }
 0x161   :  { %v1827_v16 = vpop.f32.mrf.mxu1  ;;  %v2349_v1 = vmax.f32 %v1822_v21, 0.0  ;;  %v1715_v34 = vadd.f32 %v1714_v26, %v6692_v17  ;;  %v6823_v3 = vpack.c.bf16 %v2348_v63, %v2344_v43  ;;  %v1501_v17 = vadd.f32 %v6707_v36, %v6635_v28  ;;  %v5252_v36 = vld [vmem:[#allocation2 + $0x6c] ss:$16 sps:$4 sm:$0xff]  }
 0x162   :  { %v1716_v35 = vpop.f32.mrf.mxu0  ;;  %v1826_v42 = vadd.f32 %v1825_v39, %v1713_v60 }
 0x163   :  { %v1829_v54 = vpop.f32.mrf.mxu1  ;;  %v1717_v23 = vadd.f32 %v1716_v35, %v1604_v4  ;;  %3451 = vmatpush1.bf16.msra.mxu0 %v5241_v37  ;;  %v6821_v55 = vpack.c.bf16 %v2349_v1, %v2345_v18  ;;  %v1828_v19 = vadd.f32 %v1827_v16, %v1715_v34  ;;  %v1614_v21 = vadd.f32 %v6709_v38, %v1501_v17  ;;  %v5250_v34 = vld [vmem:[#allocation2 + $0x68] ss:$16 sps:$4 sm:$0xff]   ;;  %v5255_v35 = vld [vmem:[#allocation2 + $0x4c] ss:$16 sps:$4 sm:$0xff]  }
 0x164   :  { %v1718_v13 = vpop.f32.mrf.mxu0  ;;  %3452 = vmatprep.subr.bf16.mxu0 %v5246_v56  ;;  %v2352_v26 = vmax.f32 %v1826_v42, 0.0 }
 0x165   :  { %v1831_v41 = vpop.f32.mrf.mxu1  ;;  %v1830_v2 = vadd.f32 %v1829_v54, %v1717_v23  ;;  %v1719_v20 = vadd.f32 %v1718_v13, %v1606_v48  ;;  %3264 = vmatprep.mubr.bf16.mxu0 %v6821_v55  ;;  %v2353_v37 = vmax.f32 %v1828_v19, 0.0  ;;  %v1513_v13 = vadd.f32 %v6732_v12, %v6639_v31 }
 0x166   :  { %v1722_v15 = vpop.f32.mrf.mxu0  ;;  %3265 = vmatmul.mubr.bf16.gmra.mxu0 %v6823_v3 }
 0x167   :  { %v1835_v30 = vpop.f32.mrf.mxu1  ;;  %v1832_v50 = vadd.f32 %v1831_v41, %v1719_v20  ;;  %3453 = vmatpush1.bf16.msra.mxu0 %v5244_v9  ;;  %v2356_v40 = vmax.f32 %v1830_v2, 0.0  ;;  %v1723_v16 = vadd.f32 %v1722_v15, %v6704_v33  ;;  %v1626_v12 = vadd.f32 %v6734_v14, %v1513_v13 }
 0x168   :  { %v1724_v22 = vpop.f32.mrf.mxu0  ;;  %3454 = vmatprep.subr.bf16.mxu0 %v5249_v32  ;;  %v5253_v32 = vld [vmem:[#allocation2 + $0x48] ss:$16 sps:$4 sm:$0xff]  }
 0x169   :  { %v1837_v11 = vpop.f32.mrf.mxu1  ;;  %v2357_v63 = vmax.f32 %v1832_v50, 0.0  ;;  %v1725_v39 = vadd.f32 %v1724_v22, %v6711_v7  ;;  %v6837_v43 = vpack.c.bf16 %v2356_v40, %v2352_v26  ;;  %v1511_v7 = vadd.f32 %v6726_v62, %v6635_v28  ;;  %v5258_v62 = vld [vmem:[#allocation2 + $0x2c] ss:$16 sps:$4 sm:$0xff]  }
 0x16a   :  { %v1726_v56 = vpop.f32.mrf.mxu0  ;;  %v1836_v52 = vadd.f32 %v1835_v30, %v1723_v16 }
 0x16b   :  { %v1839_v4 = vpop.f32.mrf.mxu1  ;;  %v1727_v18 = vadd.f32 %v1726_v56, %v1614_v21  ;;  %3455 = vmatpush1.bf16.msra.mxu0 %v5247_v57  ;;  %v6835_v1 = vpack.c.bf16 %v2357_v63, %v2353_v37  ;;  %v1838_v54 = vadd.f32 %v1837_v11, %v1725_v39  ;;  %v1624_v20 = vadd.f32 %v6728_v0, %v1511_v7  ;;  %v5261_v63 = vld [vmem:[#allocation2 + $0xc] ss:$16 sps:$4 sm:$0xff]  }
 0x16c   :  { %v1728_v60 = vpop.f32.mrf.mxu0  ;;  %3456 = vmatprep.subr.bf16.mxu0 %v5252_v36  ;;  %v2360_v53 = vmax.f32 %v1836_v52, 0.0  ;;  %v5256_v36 = vld [vmem:[#allocation2 + $0x28] ss:$16 sps:$4 sm:$0xff]  }
 0x16d   :  { %v1841_v38 = vpop.f32.mrf.mxu1  ;;  %v1840_v33 = vadd.f32 %v1839_v4, %v1727_v18  ;;  %v1729_v48 = vadd.f32 %v1728_v60, %v1616_v49  ;;  %3274 = vmatprep.mubr.bf16.mxu0 %v6835_v1  ;;  %v2361_v42 = vmax.f32 %v1838_v54, 0.0  ;;  %v1523_v4 = vadd.f32 %v6751_v45, %v6639_v31  ;;  %v5259_v18 = vld [vmem:[#allocation2 + $0x8] ss:$16 sps:$4 sm:$0xff]  }
 0x16e   :  { %v1732_v23 = vpop.f32.mrf.mxu0  ;;  %3275 = vmatmul.mubr.bf16.gmra.mxu0 %v6837_v43 }
 0x16f   :  { %v1845_v9 = vpop.f32.mrf.mxu1  ;;  %v1842_v41 = vadd.f32 %v1841_v38, %v1729_v48  ;;  %3457 = vmatpush1.bf16.msra.mxu0 %v5250_v34  ;;  %v2364_v17 = vmax.f32 %v1840_v33, 0.0  ;;  %v1733_v50 = vadd.f32 %v1732_v23, %v6723_v51  ;;  %v1636_v45 = vadd.f32 %v6753_v47, %v1523_v4 }
 0x170   :  { %v1734_v19 = vpop.f32.mrf.mxu0  ;;  %3458 = vmatprep.subr.bf16.mxu0 %v5255_v35 }
 0x171   :  { %v1847_v2 = vpop.f32.mrf.mxu1  ;;  %v2365_v15 = vmax.f32 %v1842_v41, 0.0  ;;  %v1735_v30 = vadd.f32 %v1734_v19, %v6730_v61  ;;  %v6851_v21 = vpack.c.bf16 %v2364_v17, %v2360_v53  ;;  %v1521_v61 = vadd.f32 %v6745_v27, %v6635_v28  ;;  %v5264_v27 = vld [vmem:[#allocation2 + $0x1ec] ss:$16 sps:$4 sm:$0xff]  }
 0x172   :  { %v1736_v57 = vpop.f32.mrf.mxu0  ;;  %v1846_v14 = vadd.f32 %v1845_v9, %v1733_v50  ;;  %v5265_v50 = vld [vmem:[#allocation2 + $0x1c8] ss:$16 sps:$4 sm:$0xff]  }
 0x173   :  { %v1849_v40 = vpop.f32.mrf.mxu1  ;;  %v1737_v22 = vadd.f32 %v1736_v57, %v1624_v20  ;;  %3459 = vmatpush1.bf16.msra.mxu0 %v5253_v32  ;;  %v6849_v11 = vpack.c.bf16 %v2365_v15, %v2361_v42  ;;  %v1848_v39 = vadd.f32 %v1847_v2, %v1735_v30  ;;  %v1634_v35 = vadd.f32 %v6747_v29, %v1521_v61  ;;  %v5262_v32 = vld [vmem:[#allocation2 + $0x1e8] ss:$16 sps:$4 sm:$0xff]   ;;  %v5267_v2 = vld [vmem:[#allocation2 + $0x1cc] ss:$16 sps:$4 sm:$0xff]  }
 0x174   :  { %v1738_v37 = vpop.f32.mrf.mxu0  ;;  %3460 = vmatprep.subr.bf16.mxu0 %v5258_v62  ;;  %v2368_v48 = vmax.f32 %v1846_v14, 0.0  ;;  %v1533_v30 = vadd.f32 %v6770_v10, %v6639_v31 }
 0x175   :  { %v1851_v0 = vpop.f32.mrf.mxu1  ;;  %v1850_v51 = vadd.f32 %v1849_v40, %v1737_v22  ;;  %v1739_v26 = vadd.f32 %v1738_v37, %v1626_v12  ;;  %3284 = vmatprep.mubr.bf16.mxu0 %v6849_v11  ;;  %v2369_v7 = vmax.f32 %v1848_v39, 0.0 }
 0x176   :  { %v1742_v16 = vpop.f32.mrf.mxu0  ;;  %3285 = vmatmul.mubr.bf16.gmra.mxu0 %v6851_v21  ;;  %v1646_v10 = vadd.f32 %v6772_v5, %v1533_v30 }
 0x177   :  { %v1855_v56 = vpop.f32.mrf.mxu1  ;;  %v1852_v49 = vadd.f32 %v1851_v0, %v1739_v26  ;;  %3461 = vmatpush1.bf16.msra.mxu0 %v5256_v36  ;;  %v2372_v34 = vmax.f32 %v1850_v51, 0.0  ;;  %v1743_v52 = vadd.f32 %v1742_v16, %v6742_v6  ;;  %v5268_v16 = vld [vmem:[#allocation2 + $0x1a8] ss:$16 sps:$4 sm:$0xff]  }
 0x178   :  { %v1744_v60 = vpop.f32.mrf.mxu0  ;;  %3462 = vmatprep.subr.bf16.mxu0 %v5261_v63 }
 0x179   :  { %v1857_v38 = vpop.f32.mrf.mxu1  ;;  %v2373_v54 = vmax.f32 %v1852_v49, 0.0  ;;  %v1745_v33 = vadd.f32 %v1744_v60, %v6749_v44  ;;  %v6865_v17 = vpack.c.bf16 %v2372_v34, %v2368_v48  ;;  %v1531_v44 = vadd.f32 %v6764_v24, %v6635_v28  ;;  %v5270_v24 = vld [vmem:[#allocation2 + $0x1ac] ss:$16 sps:$4 sm:$0xff]   ;;  %v7615_v48 = vld [vmem:[#allocation11_spill] sm:$0xff] }
 0x17a   :  { %v1746_v23 = vpop.f32.mrf.mxu0  ;;  %v1856_v47 = vadd.f32 %v1855_v56, %v1743_v52  ;;  %v5273_v49 = vld [vmem:[#allocation2 + $0x18c] ss:$16 sps:$4 sm:$0xff]   ;;  %v7590_v52 = vsub.s32 2, %v7615_v48 }
 0x17b   :  { %v1859_v9 = vpop.f32.mrf.mxu1  ;;  %v1747_v13 = vadd.f32 %v1746_v23, %v1634_v35  ;;  %3463 = vmatpush1.bf16.msra.mxu0 %v5259_v18  ;;  %v6863_v41 = vpack.c.bf16 %v2373_v54, %v2369_v7  ;;  %v1858_v62 = vadd.f32 %v1857_v38, %v1745_v33  ;;  %v1644_v22 = vadd.f32 %v6766_v25, %v1531_v44  ;;  %v7614_v35 = vld [vmem:[#allocation9_spill] sm:$0xff]  ;;  %v5271_v33 = vld [vmem:[#allocation2 + $0x188] ss:$16 sps:$4 sm:$0xff]  }
 0x17c   :  { %v1748_v19 = vpop.f32.mrf.mxu0  ;;  %3464 = vmatprep.subr.bf16.mxu0 %v5264_v27  ;;  %v2376_v63 = vmax.f32 %v1856_v47, 0.0  ;;  %v1543_v7 = vadd.f32 %v7614_v35, %v6639_v31  ;;  %v7617_v44 = vld [vmem:[#allocation8_spill] sm:$0xff]  ;;  %v7618_v31 = vld [vmem:[#allocation5_spill] sm:$0xff] }
 0x17d   :  { %v1861_v29 = vpop.f32.mrf.mxu1  ;;  %v1860_v6 = vadd.f32 %v1859_v9, %v1747_v13  ;;  %v1749_v20 = vadd.f32 %v1748_v19, %v1636_v45  ;;  %3294 = vmatprep.mubr.bf16.mxu0 %v6863_v41  ;;  %v2377_v36 = vmax.f32 %v1858_v62, 0.0  ;;  %v5276_v45 = vld [vmem:[#allocation2 + $0x16c] ss:$16 sps:$4 sm:$0xff]   ;;  %v7591_v13 = vsub.s32 3, %v7615_v48 }
 0x17e   :  { %v1752_v42 = vpop.f32.mrf.mxu0  ;;  %3295 = vmatmul.mubr.bf16.gmra.mxu0 %v6865_v17 }
 0x17f   :  { %v1865_v15 = vpop.f32.mrf.mxu1  ;;  %v1862_v53 = vadd.f32 %v1861_v29, %v1749_v20  ;;  %3465 = vmatpush2.bf16.msra.mxu0 %v5262_v32  ;;  %v2380_v57 = vmax.f32 %v1860_v6, 0.0  ;;  %v1753_v61 = vadd.f32 %v1752_v42, %v6761_v46  ;;  %v7616_v32 = vld [vmem:[#allocation7_spill] sm:$0xff] }
 0x180   :  { %v1754_v40 = vpop.f32.mrf.mxu0  ;;  %3466 = vmatprep.subr.bf16.mxu0 %v5267_v2 }
 0x181   :  { %v1867_v12 = vpop.f32.mrf.mxu1  ;;  %v2381_v37 = vmax.f32 %v1862_v53, 0.0  ;;  %v1755_v0 = vadd.f32 %v1754_v40, %v6768_v58  ;;  %v6879_v56 = vpack.c.bf16 %v2380_v57, %v2376_v63  ;;  %v7613_v58 = vld [vmem:[#allocation6_spill] sm:$0xff]  ;;  %v1866_v5 = vadd.f32 %v1865_v15, %v1753_v61  ;;  %v5414_v57 = vld [vmem:[%s7572_s2] sm:$0xf] }
 0x182   :  { %v1756_v39 = vpop.f32.mrf.mxu0  ;;  %v1541_v18 = vadd.f32 %v7613_v58, %v6635_v28  ;;  %v7619_v15 = vld [vmem:[#allocation10_spill] sm:$0xff]  ;;  %v6900_v40 = vrot.slane %v5414_v57, %v7590_v52 }
 0x183   :  { %v1869_v51 = vpop.f32.mrf.mxu1  ;;  %v1757_v26 = vadd.f32 %v1756_v39, %v1644_v22  ;;  %3467 = vmatpush2.bf16.msra.mxu0 %v5265_v50  ;;  %v6877_v14 = vpack.c.bf16 %v2381_v37, %v2377_v36  ;;  %v1868_v34 = vadd.f32 %v1867_v12, %v1755_v0  ;;  %v2384_v6 = vmax.f32 %v1866_v5, 0.0  ;;  %v5274_v12 = vld [vmem:[#allocation2 + $0x168] ss:$16 sps:$4 sm:$0xff]   ;;  %v5279_v37 = vld [vmem:[#allocation2 + $0x14c] ss:$16 sps:$4 sm:$0xff]  }
 0x184   :  { %v1758_v4 = vpop.f32.mrf.mxu0  ;;  %3468 = vmatprep.subr.bf16.mxu0 %v5270_v24  ;;  %v1654_v19 = vadd.f32 %v7616_v32, %v1541_v18  ;;  %v1656_v30 = vadd.f32 %v7619_v15, %v1543_v7  ;;  %v6907_v39 = vrot.slane %v5414_v57, %v7591_v13  ;;  %v5285_v32 = vld [vmem:[#allocation2 + $0x10c] ss:$16 sps:$4 sm:$0xff]  }
 0x185   :  { %v1871_v25 = vpop.f32.mrf.mxu1  ;;  %v1870_v46 = vadd.f32 %v1869_v51, %v1757_v26  ;;  %v1759_v60 = vadd.f32 %v1758_v4, %v1646_v10  ;;  %3304 = vmatprep.mubr.bf16.mxu0 %v6877_v14  ;;  %v2385_v29 = vmax.f32 %v1868_v34, 0.0  ;;  %v5282_v34 = vld [vmem:[#allocation2 + $0x12c] ss:$16 sps:$4 sm:$0xff]  }
 0x186   :  { %v1762_v38 = vpop.f32.mrf.mxu0  ;;  %3305 = vmatmul.mubr.bf16.gmra.mxu0 %v6879_v56 }
 0x187   :  { %v1875_v27 = vpop.f32.mrf.mxu1  ;;  %v1872_v54 = vadd.f32 %v1871_v25, %v1759_v60  ;;  %3469 = vmatpush2.bf16.msra.mxu0 %v5268_v16  ;;  %v2388_v23 = vmax.f32 %v1870_v46, 0.0  ;;  %v1763_v20 = vadd.f32 %v1762_v38, %v7618_v31  ;;  %v5277_v25 = vld [vmem:[#allocation2 + $0x148] ss:$16 sps:$4 sm:$0xff]  }
 0x188   :  { %v1764_v28 = vpop.f32.mrf.mxu0  ;;  %3470 = vmatprep.subr.bf16.mxu0 %v5273_v49 }
 0x189   :  { %v1877_v9 = vpop.f32.mrf.mxu1  ;;  %v2389_v2 = vmax.f32 %v1872_v54, 0.0  ;;  %v1765_v62 = vadd.f32 %v1764_v28, %v7617_v44  ;;  %v6902_v24 = vpack.c.bf16 %v2388_v23, %v2384_v6  ;;  %v1876_v51 = vadd.f32 %v1875_v27, %v1763_v20  ;;  %v5280_v23 = vld [vmem:[#allocation2 + $0x128] ss:$16 sps:$4 sm:$0xff]  }
 0x18a   :  { %v1766_v47 = vpop.f32.mrf.mxu0  ;;  %v5283_v44 = vld [vmem:[#allocation2 + $0x108] ss:$16 sps:$4 sm:$0xff]  }
 0x18b   :  { %v1879_v42 = vpop.f32.mrf.mxu1  ;;  %v1767_v53 = vadd.f32 %v1766_v47, %v1654_v19  ;;  %3471 = vmatpush2.bf16.msra.mxu0 %v5271_v33  ;;  %v6893_v50 = vpack.c.bf16 %v2389_v2, %v2385_v29  ;;  %v1878_v0 = vadd.f32 %v1877_v9, %v1765_v62  ;;  %v2392_v27 = vmax.f32 %v1876_v51, 0.0 }
 0x18c   :  { %v1768_v22 = vpop.f32.mrf.mxu0  ;;  %3472 = vmatprep.subr.bf16.mxu0 %v5276_v45 }
 0x18d   :  { %v1881_v36 = vpop.f32.mrf.mxu1  ;;  %v1880_v63 = vadd.f32 %v1879_v42, %v1767_v53  ;;  %v1769_v61 = vadd.f32 %v1768_v22, %v1656_v30  ;;  %3314 = vmatprep.mubr.bf16.mxu0 %v6893_v50  ;;  %v2393_v46 = vmax.f32 %v1878_v0, 0.0 }
 0x18e   :  { %v1918_v10 = vpop.f32.mrf.mxu0  ;;  %3315 = vmatmul.mubr.bf16.gmra.mxu0 %v6902_v24 }
 0x18f   :  { %v2031_v26 = vpop.f32.mrf.mxu1  ;;  %v1882_v16 = vadd.f32 %v1881_v36, %v1769_v61  ;;  %v1919_v4 = vadd.f32 %v1918_v10, %v6900_v40  ;;  %3473 = vmatpush2.bf16.msra.mxu0 %v5274_v12  ;;  %v2396_v49 = vmax.f32 %v1880_v63, 0.0 }
 0x190   :  { %v1920_v58 = vpop.f32.mrf.mxu0  ;;  %3474 = vmatprep.subr.bf16.mxu0 %v5279_v37 }
 0x191   :  { %v2033_v18 = vpop.f32.mrf.mxu1  ;;  %v2397_v60 = vmax.f32 %v1882_v16, 0.0  ;;  %v6911_v5 = vadd.f32 %v2031_v26, %v1919_v4  ;;  %v1921_v38 = vadd.f32 %v1920_v58, %v6907_v39  ;;  %v6922_v28 = vpack.c.bf16 %v2396_v49, %v2392_v27 }
 0x192   :  { %v6914_v35 = vpop.f32.mrf.mxu0 }
 0x193   :  { %v6916_v7 = vpop.f32.mrf.mxu1  ;;  %v6918_v54 = vadd.f32 %v2033_v18, %v1921_v38  ;;  %3475 = vmatpush2.bf16.msra.mxu0 %v5277_v25  ;;  %v6920_v33 = vpack.c.bf16 %v2397_v60, %v2393_v46 }
 0x194   :  { %v6924_v9 = vpop.f32.mrf.mxu0  ;;  %3476 = vmatprep.subr.bf16.mxu0 %v5282_v34 }
 0x195   :  { %v6926_v45 = vpop.f32.mrf.mxu1  ;;  %3324 = vmatprep.mubr.bf16.mxu0 %v6920_v33 }
 0x196   :  { %v1928_v19 = vpop.f32.mrf.mxu0  ;;  %3325 = vmatmul.mubr.bf16.gmra.mxu0 %v6922_v28 }
 0x197   :  { %v2041_v29 = vpop.f32.mrf.mxu1  ;;  %v1929_v2 = vadd.f32 %v1928_v19, %v6900_v40  ;;  %3477 = vmatpush2.bf16.msra.mxu0 %v5280_v23  ;;  %3480 = vmatprep.mubr.bf16.mxu0 %v6807_v8 }
 0x198   :  { %v1930_v62 = vpop.f32.mrf.mxu0  ;;  %3478 = vmatprep.subr.bf16.mxu0 %v5285_v32 }
 0x199   :  { %v2043_v6 = vpop.f32.mrf.mxu1  ;;  %v6932_v31 = vadd.f32 %v2041_v29, %v1929_v2  ;;  %v1931_v20 = vadd.f32 %v1930_v62, %v6907_v39 }
 0x19a   :  { %v6935_v47 = vpop.f32.mrf.mxu0 }
 0x19b   :  { %v6937_v42 = vpop.f32.mrf.mxu1  ;;  %v6939_v15 = vadd.f32 %v2043_v6, %v1931_v20  ;;  %3479 = vmatpush2.bf16.msra.mxu0 %v5283_v44 }
 0x19c   :  { %v6941_v30 = vpop.f32.mrf.mxu0 }
 0x19d   :  { %v6943_v53 = vpop.f32.mrf.mxu1 }
 0x19e   :  { %v1938_v8 = vpop.f32.mrf.mxu0  ;;  %3481 = vmatmul.mubr.bf16.vlgmr.msra.gmra.mxu0 %v6811_v59 }
 0x19f   :  { %v2051_v57 = vpop.f32.mrf.mxu1  ;;  %v1939_v12 = vadd.f32 %v1938_v8, %v6900_v40  ;;  %3490 = vmatprep.mubr.bf16.mxu0 %v6821_v55 }
 0x1a0   :  { %v1940_v22 = vpop.f32.mrf.mxu0 }
 0x1a1   :  { %v2053_v36 = vpop.f32.mrf.mxu1  ;;  %v6948_v37 = vadd.f32 %v2051_v57, %v1939_v12  ;;  %v1941_v0 = vadd.f32 %v1940_v22, %v6907_v39 }
 0x1a2   :  { %v6951_v63 = vpop.f32.mrf.mxu0 }
 0x1a3   :  { %v6953_v61 = vpop.f32.mrf.mxu1  ;;  %v6955_v51 = vadd.f32 %v2053_v36, %v1941_v0 }
 0x1a4   :  { %v6957_v10 = vpop.f32.mrf.mxu0 }
 0x1a5   :  { %v6959_v26 = vpop.f32.mrf.mxu1 }
 0x1a6   :  { %v1948_v59 = vpop.f32.mrf.mxu0  ;;  %3491 = vmatmul.mubr.bf16.gmra.mxu0 %v6823_v3 }
 0x1a7   :  { %v2061_v16 = vpop.f32.mrf.mxu1  ;;  %v1949_v55 = vadd.f32 %v1948_v59, %v6900_v40  ;;  %3500 = vmatprep.mubr.bf16.mxu0 %v6835_v1 }
 0x1a8   :  { %v1950_v4 = vpop.f32.mrf.mxu0 }
 0x1a9   :  { %v2063_v25 = vpop.f32.mrf.mxu1  ;;  %v6964_v49 = vadd.f32 %v2061_v16, %v1949_v55  ;;  %v1951_v58 = vadd.f32 %v1950_v4, %v6907_v39 }
 0x1aa   :  { %v6967_v18 = vpop.f32.mrf.mxu0 }
 0x1ab   :  { %v6969_v34 = vpop.f32.mrf.mxu1  ;;  %v6971_v46 = vadd.f32 %v2063_v25, %v1951_v58 }
 0x1ac   :  { %v6973_v60 = vpop.f32.mrf.mxu0 }
 0x1ad   :  { %v6975_v38 = vpop.f32.mrf.mxu1 }
 0x1ae   :  { %v1958_v3 = vpop.f32.mrf.mxu0  ;;  %3501 = vmatmul.mubr.bf16.gmra.mxu0 %v6837_v43 }
 0x1af   :  { %v2071_v27 = vpop.f32.mrf.mxu1  ;;  %v1959_v1 = vadd.f32 %v1958_v3, %v6900_v40  ;;  %3510 = vmatprep.mubr.bf16.mxu0 %v6849_v11 }
 0x1b0   :  { %v1960_v23 = vpop.f32.mrf.mxu0 }
 0x1b1   :  { %v2073_v32 = vpop.f32.mrf.mxu1  ;;  %v6980_v19 = vadd.f32 %v2071_v27, %v1959_v1  ;;  %v1961_v29 = vadd.f32 %v1960_v23, %v6907_v39 }
 0x1b2   :  { %v6983_v2 = vpop.f32.mrf.mxu0 }
 0x1b3   :  { %v6985_v44 = vpop.f32.mrf.mxu1  ;;  %v6987_v62 = vadd.f32 %v2073_v32, %v1961_v29 }
 0x1b4   :  { %v6989_v6 = vpop.f32.mrf.mxu0 }
 0x1b5   :  { %v6991_v20 = vpop.f32.mrf.mxu1 }
 0x1b6   :  { %v1968_v43 = vpop.f32.mrf.mxu0  ;;  %3511 = vmatmul.mubr.bf16.gmra.mxu0 %v6851_v21 }
 0x1b7   :  { %v2081_v8 = vpop.f32.mrf.mxu1  ;;  %v1969_v11 = vadd.f32 %v1968_v43, %v6900_v40  ;;  %3520 = vmatprep.mubr.bf16.mxu0 %v6863_v41 }
 0x1b8   :  { %v1970_v57 = vpop.f32.mrf.mxu0 }
 0x1b9   :  { %v2083_v12 = vpop.f32.mrf.mxu1  ;;  %v6996_v22 = vadd.f32 %v2081_v8, %v1969_v11  ;;  %v1971_v36 = vadd.f32 %v1970_v57, %v6907_v39 }
 0x1ba   :  { %v6999_v0 = vpop.f32.mrf.mxu0 }
 0x1bb   :  { %v7001_v59 = vpop.f32.mrf.mxu1  ;;  %v7003_v16 = vadd.f32 %v2083_v12, %v1971_v36 }
 0x1bc   :  { %v7005_v55 = vpop.f32.mrf.mxu0 }
 0x1bd   :  { %v7007_v4 = vpop.f32.mrf.mxu1 }
 0x1be   :  { %v1978_v21 = vpop.f32.mrf.mxu0  ;;  %3521 = vmatmul.mubr.bf16.gmra.mxu0 %v6865_v17 }
 0x1bf   :  { %v2091_v25 = vpop.f32.mrf.mxu1  ;;  %v1979_v41 = vadd.f32 %v1978_v21, %v6900_v40  ;;  %3530 = vmatprep.mubr.bf16.mxu0 %v6877_v14 }
 0x1c0   :  { %v1980_v58 = vpop.f32.mrf.mxu0 }
 0x1c1   :  { %v2093_v3 = vpop.f32.mrf.mxu1  ;;  %v7012_v27 = vadd.f32 %v2091_v25, %v1979_v41  ;;  %v1981_v1 = vadd.f32 %v1980_v58, %v6907_v39 }
 0x1c2   :  { %v7015_v23 = vpop.f32.mrf.mxu0 }
 0x1c3   :  { %v7017_v32 = vpop.f32.mrf.mxu1  ;;  %v7019_v29 = vadd.f32 %v2093_v3, %v1981_v1 }
 0x1c4   :  { %v7021_v43 = vpop.f32.mrf.mxu0 }
 0x1c5   :  { %v7023_v8 = vpop.f32.mrf.mxu1 }
 0x1c6   :  { %v1988_v17 = vpop.f32.mrf.mxu0  ;;  %3531 = vmatmul.mubr.bf16.gmra.mxu0 %v6879_v56  ;;  %v1923_v56 = vadd.f32 %v6914_v35, %v6900_v40 }
 0x1c7   :  { %v2101_v11 = vpop.f32.mrf.mxu1  ;;  %v1989_v14 = vadd.f32 %v1988_v17, %v6900_v40  ;;  %3540 = vmatprep.mubr.bf16.mxu0 %v6893_v50 }
 0x1c8   :  { %v1990_v57 = vpop.f32.mrf.mxu0 }
 0x1c9   :  { %v2103_v12 = vpop.f32.mrf.mxu1  ;;  %v7028_v36 = vadd.f32 %v2101_v11, %v1989_v14  ;;  %v1991_v21 = vadd.f32 %v1990_v57, %v6907_v39  ;;  %v1925_v11 = vadd.f32 %v6924_v9, %v6907_v39  ;;  %v1933_v9 = vadd.f32 %v6935_v47, %v6900_v40 }
 0x1ca   :  { %v7031_v25 = vpop.f32.mrf.mxu0 }
 0x1cb   :  { %7620 = vst [vmem:[#allocation6_spill] sm:$0xff] %v7028_v36  ;;  %7621 = vst [vmem:[#allocation9_spill] sm:$0xff] %v7031_v25  ;;  %v7033_v41 = vpop.f32.mrf.mxu1  ;;  %v7035_v58 = vadd.f32 %v2103_v12, %v1991_v21  ;;  %v2036_v12 = vadd.f32 %v6916_v7, %v1923_v56  ;;  %v2038_v35 = vadd.f32 %v6926_v45, %v1925_v11 }
 0x1cc   :  { %7622 = vst [vmem:[#allocation7_spill] sm:$0xff] %v7033_v41  ;;  %v7037_v3 = vpop.f32.mrf.mxu0 }
 0x1cd   :  { %7623 = vst [vmem:[#allocation8_spill] sm:$0xff] %v7035_v58  ;;  %7624 = vst [vmem:[#allocation5_spill] sm:$0xff] %v7037_v3  ;;  %v7039_v1 = vpop.f32.mrf.mxu1 }
 0x1ce   :  { %7625 = vst [vmem:[#allocation10_spill] sm:$0xff] %v7039_v1  ;;  %v2144_v50 = vpop.f32.mrf.mxu0  ;;  %3541 = vmatmul.mubr.bf16.gmra.mxu0 %v6902_v24 }
 0x1cf   :  { %v2257_v17 = vpop.f32.mrf.mxu1  ;;  %3550 = vmatprep.mubr.bf16.mxu0 %v6920_v33  ;;  %v2145_v52 = vadd.f32 %v2144_v50, %v6911_v5  ;;  %v1935_v5 = vadd.f32 %v6941_v30, %v6907_v39  ;;  %v2046_v50 = vadd.f32 %v6937_v42, %v1933_v9  ;;  %v5334_v30 = vld [vmem:[#allocation2 + $0x2e8] ss:$16 sps:$4 sm:$0xff]   ;;  %v5339_v42 = vld [vmem:[#allocation2 + $0x2cc] ss:$16 sps:$4 sm:$0xff]  }
 0x1d0   :  { %v2146_v14 = vpop.f32.mrf.mxu0 }
 0x1d1   :  { %v2259_v57 = vpop.f32.mrf.mxu1  ;;  %v2147_v21 = vadd.f32 %v2146_v14, %v6918_v54  ;;  %v2258_v3 = vadd.f32 %v2257_v17, %v2145_v52 }
 0x1d2   :  { %v2148_v13 = vpop.f32.mrf.mxu0 }
 0x1d3   :  { %v2261_v48 = vpop.f32.mrf.mxu1  ;;  %v2149_v1 = vadd.f32 %v2148_v13, %v2036_v12  ;;  %v2260_v58 = vadd.f32 %v2259_v57, %v2147_v21 }
 0x1d4   :  { %v2150_v36 = vpop.f32.mrf.mxu0 }
 0x1d5   :  { %v2263_v24 = vpop.f32.mrf.mxu1  ;;  %v2262_v33 = vadd.f32 %v2261_v48, %v2149_v1  ;;  %v2151_v41 = vadd.f32 %v2150_v36, %v2038_v35  ;;  %v2339_v11 = vmax.f32 %v2260_v58, 0.0  ;;  %v2338_v48 = vmax.f32 %v2258_v3, 0.0 }
 0x1d6   :  { %v2154_v25 = vpop.f32.mrf.mxu0  ;;  %3551 = vmatmul.mubr.bf16.gmra.mxu0 %v6922_v28  ;;  %v2048_v28 = vadd.f32 %v6943_v53, %v1935_v5  ;;  %v1943_v58 = vadd.f32 %v6951_v63, %v6900_v40  ;;  %v5342_v63 = vld [vmem:[#allocation2 + $0x2ac] ss:$16 sps:$4 sm:$0xff]  }
 0x1d7   :  { %v2267_v7 = vpop.f32.mrf.mxu1  ;;  %v2264_v54 = vadd.f32 %v2263_v24, %v2151_v41  ;;  %v2342_v56 = vmax.f32 %v2262_v33, 0.0  ;;  %v2155_v52 = vadd.f32 %v2154_v25, %v6932_v31  ;;  %v1945_v24 = vadd.f32 %v6957_v10, %v6907_v39  ;;  %v5337_v33 = vld [vmem:[#allocation2 + $0x2c8] ss:$16 sps:$4 sm:$0xff]  }
 0x1d8   :  { %v2156_v45 = vpop.f32.mrf.mxu0 }
 0x1d9   :  { %v2269_v13 = vpop.f32.mrf.mxu1  ;;  %v2343_v14 = vmax.f32 %v2264_v54, 0.0  ;;  %v2157_v47 = vadd.f32 %v2156_v45, %v6939_v15  ;;  %v7062_v41 = vpack.c.bf16 %v2342_v56, %v2338_v48  ;;  %v2268_v31 = vadd.f32 %v2267_v7, %v2155_v52 }
 0x1da   :  { %v2158_v36 = vpop.f32.mrf.mxu0  ;;  %v2056_v45 = vadd.f32 %v6953_v61, %v1943_v58  ;;  %v2058_v10 = vadd.f32 %v6959_v26, %v1945_v24 }
 0x1db   :  { %v2271_v1 = vpop.f32.mrf.mxu1  ;;  %v2159_v17 = vadd.f32 %v2158_v36, %v2046_v50  ;;  %v7060_v57 = vpack.c.bf16 %v2343_v14, %v2339_v11  ;;  %v2270_v15 = vadd.f32 %v2269_v13, %v2157_v47  ;;  %v2346_v11 = vmax.f32 %v2268_v31, 0.0 }
 0x1dc   :  { %v2160_v12 = vpop.f32.mrf.mxu0 }
 0x1dd   :  { %v2273_v21 = vpop.f32.mrf.mxu1  ;;  %v2272_v3 = vadd.f32 %v2271_v1, %v2159_v17  ;;  %v2161_v35 = vadd.f32 %v2160_v12, %v2048_v28  ;;  %3367 = vmatprep.mubr.bf16.mxu1 %v7060_v57  ;;  %v2347_v13 = vmax.f32 %v2270_v15, 0.0  ;;  %v5340_v1 = vld [vmem:[#allocation2 + $0x2a8] ss:$16 sps:$4 sm:$0xff]   ;;  %v1955_v15 = vadd.f32 %v6973_v60, %v6907_v39 }
 0x1de   :  { %v2164_v25 = vpop.f32.mrf.mxu0  ;;  %3368 = vmatmul.mubr.bf16.vlgmr.msra.gmra.mxu1 %v7062_v41 }
 0x1df   :  { %v2277_v53 = vpop.f32.mrf.mxu1  ;;  %v2274_v9 = vadd.f32 %v2273_v21, %v2161_v35  ;;  %3562 = vmatpush1.bf16.msra.mxu1 %v5334_v30  ;;  %v2350_v5 = vmax.f32 %v2272_v3, 0.0  ;;  %v2165_v14 = vadd.f32 %v2164_v25, %v6948_v37  ;;  %v5345_v30 = vld [vmem:[#allocation2 + $0x28c] ss:$16 sps:$4 sm:$0xff]   ;;  %v5343_v35 = vld [vmem:[#allocation2 + $0x288] ss:$16 sps:$4 sm:$0xff]   ;;  %v2068_v60 = vadd.f32 %v6975_v38, %v1955_v15 }
 0x1e0   :  { %v2166_v54 = vpop.f32.mrf.mxu0  ;;  %3563 = vmatprep.subr.bf16.mxu1 %v5339_v42 }
 0x1e1   :  { %v2279_v56 = vpop.f32.mrf.mxu1  ;;  %v2351_v50 = vmax.f32 %v2274_v9, 0.0  ;;  %v2167_v7 = vadd.f32 %v2166_v54, %v6955_v51  ;;  %v7076_v28 = vpack.c.bf16 %v2350_v5, %v2346_v11  ;;  %v1953_v51 = vadd.f32 %v6967_v18, %v6900_v40  ;;  %v5348_v18 = vld [vmem:[#allocation2 + $0x26c] ss:$16 sps:$4 sm:$0xff]  }
 0x1e2   :  { %v2168_v47 = vpop.f32.mrf.mxu0  ;;  %v2278_v26 = vadd.f32 %v2277_v53, %v2165_v14 }
 0x1e3   :  { %v2281_v48 = vpop.f32.mrf.mxu1  ;;  %v2169_v52 = vadd.f32 %v2168_v47, %v2056_v45  ;;  %3564 = vmatpush1.bf16.msra.mxu1 %v5337_v33  ;;  %v7074_v36 = vpack.c.bf16 %v2351_v50, %v2347_v13  ;;  %v2280_v12 = vadd.f32 %v2279_v56, %v2167_v7  ;;  %v2066_v9 = vadd.f32 %v6969_v34, %v1953_v51  ;;  %v5346_v7 = vld [vmem:[#allocation2 + $0x268] ss:$16 sps:$4 sm:$0xff]   ;;  %v5351_v47 = vld [vmem:[#allocation2 + $0x24c] ss:$16 sps:$4 sm:$0xff]  }
 0x1e4   :  { %v2170_v17 = vpop.f32.mrf.mxu0  ;;  %3565 = vmatprep.subr.bf16.mxu1 %v5342_v63  ;;  %v2354_v54 = vmax.f32 %v2278_v26, 0.0 }
 0x1e5   :  { %v2283_v61 = vpop.f32.mrf.mxu1  ;;  %v2282_v37 = vadd.f32 %v2281_v48, %v2169_v52  ;;  %v2171_v21 = vadd.f32 %v2170_v17, %v2058_v10  ;;  %3377 = vmatprep.mubr.bf16.mxu1 %v7074_v36  ;;  %v2355_v33 = vmax.f32 %v2280_v12, 0.0  ;;  %v1965_v17 = vadd.f32 %v6989_v6, %v6907_v39 }
 0x1e6   :  { %v2174_v42 = vpop.f32.mrf.mxu0  ;;  %3378 = vmatmul.mubr.bf16.gmra.mxu1 %v7076_v28 }
 0x1e7   :  { %v2287_v58 = vpop.f32.mrf.mxu1  ;;  %v2284_v3 = vadd.f32 %v2283_v61, %v2171_v21  ;;  %3566 = vmatpush1.bf16.msra.mxu1 %v5340_v1  ;;  %v2358_v31 = vmax.f32 %v2282_v37, 0.0  ;;  %v2175_v56 = vadd.f32 %v2174_v42, %v6964_v49  ;;  %v2078_v6 = vadd.f32 %v6991_v20, %v1965_v17 }
 0x1e8   :  { %v2176_v25 = vpop.f32.mrf.mxu0  ;;  %3567 = vmatprep.subr.bf16.mxu1 %v5345_v30  ;;  %v5349_v30 = vld [vmem:[#allocation2 + $0x248] ss:$16 sps:$4 sm:$0xff]  }
 0x1e9   :  { %v2289_v24 = vpop.f32.mrf.mxu1  ;;  %v2359_v5 = vmax.f32 %v2284_v3, 0.0  ;;  %v2177_v53 = vadd.f32 %v2176_v25, %v6971_v46  ;;  %v7090_v11 = vpack.c.bf16 %v2358_v31, %v2354_v54  ;;  %v1963_v46 = vadd.f32 %v6983_v2, %v6900_v40  ;;  %v5354_v2 = vld [vmem:[#allocation2 + $0x22c] ss:$16 sps:$4 sm:$0xff]  }
 0x1ea   :  { %v2178_v63 = vpop.f32.mrf.mxu0  ;;  %v2288_v38 = vadd.f32 %v2287_v58, %v2175_v56 }
 0x1eb   :  { %v2291_v45 = vpop.f32.mrf.mxu1  ;;  %v2179_v13 = vadd.f32 %v2178_v63, %v2066_v9  ;;  %3568 = vmatpush1.bf16.msra.mxu1 %v5343_v35  ;;  %v7088_v50 = vpack.c.bf16 %v2359_v5, %v2355_v33  ;;  %v2290_v48 = vadd.f32 %v2289_v24, %v2177_v53  ;;  %v2076_v21 = vadd.f32 %v6985_v44, %v1963_v46  ;;  %v5357_v5 = vld [vmem:[#allocation2 + $0x20c] ss:$16 sps:$4 sm:$0xff]  }
 0x1ec   :  { %v2180_v14 = vpop.f32.mrf.mxu0  ;;  %3569 = vmatprep.subr.bf16.mxu1 %v5348_v18  ;;  %v2362_v15 = vmax.f32 %v2288_v38, 0.0  ;;  %v5352_v18 = vld [vmem:[#allocation2 + $0x228] ss:$16 sps:$4 sm:$0xff]  }
 0x1ed   :  { %v2293_v34 = vpop.f32.mrf.mxu1  ;;  %v2292_v49 = vadd.f32 %v2291_v45, %v2179_v13  ;;  %v2181_v10 = vadd.f32 %v2180_v14, %v2068_v60  ;;  %3387 = vmatprep.mubr.bf16.mxu1 %v7088_v50  ;;  %v2363_v26 = vmax.f32 %v2290_v48, 0.0  ;;  %v1975_v45 = vadd.f32 %v7005_v55, %v6907_v39  ;;  %v5355_v13 = vld [vmem:[#allocation2 + $0x208] ss:$16 sps:$4 sm:$0xff]  }
 0x1ee   :  { %v2184_v52 = vpop.f32.mrf.mxu0  ;;  %3388 = vmatmul.mubr.bf16.gmra.mxu1 %v7090_v11 }
 0x1ef   :  { %v2297_v1 = vpop.f32.mrf.mxu1  ;;  %v2294_v61 = vadd.f32 %v2293_v34, %v2181_v10  ;;  %3570 = vmatpush1.bf16.msra.mxu1 %v5346_v7  ;;  %v2366_v51 = vmax.f32 %v2292_v49, 0.0  ;;  %v2185_v3 = vadd.f32 %v2184_v52, %v6980_v19  ;;  %v2088_v55 = vadd.f32 %v7007_v4, %v1975_v45 }
 0x1f0   :  { %v2186_v12 = vpop.f32.mrf.mxu0  ;;  %3571 = vmatprep.subr.bf16.mxu1 %v5351_v47 }
 0x1f1   :  { %v2299_v37 = vpop.f32.mrf.mxu1  ;;  %v2367_v42 = vmax.f32 %v2294_v61, 0.0  ;;  %v2187_v58 = vadd.f32 %v2186_v12, %v6987_v62  ;;  %v7104_v9 = vpack.c.bf16 %v2366_v51, %v2362_v15  ;;  %v1973_v62 = vadd.f32 %v6999_v0, %v6900_v40  ;;  %v5360_v0 = vld [vmem:[#allocation2 + $0x3ec] ss:$16 sps:$4 sm:$0xff]  }
 0x1f2   :  { %v2188_v35 = vpop.f32.mrf.mxu0  ;;  %v2298_v20 = vadd.f32 %v2297_v1, %v2185_v3  ;;  %v5361_v3 = vld [vmem:[#allocation2 + $0x3c8] ss:$16 sps:$4 sm:$0xff]  }
 0x1f3   :  { %v2301_v31 = vpop.f32.mrf.mxu1  ;;  %v2189_v25 = vadd.f32 %v2188_v35, %v2076_v21  ;;  %3572 = vmatpush1.bf16.msra.mxu1 %v5349_v30  ;;  %v7102_v24 = vpack.c.bf16 %v2367_v42, %v2363_v26  ;;  %v2300_v53 = vadd.f32 %v2299_v37, %v2187_v58  ;;  %v2086_v47 = vadd.f32 %v7001_v59, %v1973_v62  ;;  %v5358_v30 = vld [vmem:[#allocation2 + $0x3e8] ss:$16 sps:$4 sm:$0xff]   ;;  %v5363_v37 = vld [vmem:[#allocation2 + $0x3cc] ss:$16 sps:$4 sm:$0xff]  }
 0x1f4   :  { %v2190_v33 = vpop.f32.mrf.mxu0  ;;  %3573 = vmatprep.subr.bf16.mxu1 %v5354_v2  ;;  %v2370_v10 = vmax.f32 %v2298_v20, 0.0  ;;  %v1985_v58 = vadd.f32 %v7021_v43, %v6907_v39 }
 0x1f5   :  { %v2303_v44 = vpop.f32.mrf.mxu1  ;;  %v2302_v19 = vadd.f32 %v2301_v31, %v2189_v25  ;;  %v2191_v54 = vadd.f32 %v2190_v33, %v2078_v6  ;;  %3397 = vmatprep.mubr.bf16.mxu1 %v7102_v24  ;;  %v2371_v46 = vmax.f32 %v2300_v53, 0.0 }
 0x1f6   :  { %v2194_v56 = vpop.f32.mrf.mxu0  ;;  %3398 = vmatmul.mubr.bf16.gmra.mxu1 %v7104_v9  ;;  %v2098_v43 = vadd.f32 %v7023_v8, %v1985_v58 }
 0x1f7   :  { %v2307_v63 = vpop.f32.mrf.mxu1  ;;  %v2304_v60 = vadd.f32 %v2303_v44, %v2191_v54  ;;  %3574 = vmatpush1.bf16.msra.mxu1 %v5352_v18  ;;  %v2374_v7 = vmax.f32 %v2302_v19, 0.0  ;;  %v2195_v38 = vadd.f32 %v2194_v56, %v6996_v22  ;;  %v5364_v56 = vld [vmem:[#allocation2 + $0x3a8] ss:$16 sps:$4 sm:$0xff]  }
 0x1f8   :  { %v2196_v14 = vpop.f32.mrf.mxu0  ;;  %3575 = vmatprep.subr.bf16.mxu1 %v5357_v5 }
 0x1f9   :  { %v2309_v34 = vpop.f32.mrf.mxu1  ;;  %v2375_v48 = vmax.f32 %v2304_v60, 0.0  ;;  %v2197_v49 = vadd.f32 %v2196_v14, %v7003_v16  ;;  %v7118_v51 = vpack.c.bf16 %v2374_v7, %v2370_v10  ;;  %v1983_v16 = vadd.f32 %v7015_v23, %v6900_v40  ;;  %v5366_v23 = vld [vmem:[#allocation2 + $0x3ac] ss:$16 sps:$4 sm:$0xff]  }
 0x1fa   :  { %v2198_v52 = vpop.f32.mrf.mxu0  ;;  %v2308_v4 = vadd.f32 %v2307_v63, %v2195_v38  ;;  %v5369_v60 = vld [vmem:[#allocation2 + $0x38c] ss:$16 sps:$4 sm:$0xff]  }
 0x1fb   :  { %v2311_v1 = vpop.f32.mrf.mxu1  ;;  %v7116_v17 = vpack.c.bf16 %v2375_v48, %v2371_v46  ;;  %v2199_v61 = vadd.f32 %v2198_v52, %v2086_v47  ;;  %3576 = vmatpush1.bf16.msra.mxu1 %v5355_v13  ;;  %v2310_v2 = vadd.f32 %v2309_v34, %v2197_v49  ;;  %v2096_v25 = vadd.f32 %v7017_v32, %v1983_v16  ;;  %v7627_v47 = vld [vmem:[#allocation5_spill] sm:$0xff]  ;;  %v5367_v49 = vld [vmem:[#allocation2 + $0x388] ss:$16 sps:$4 sm:$0xff]  }
 0x1fc   :  { %v2200_v12 = vpop.f32.mrf.mxu0  ;;  %3577 = vmatprep.subr.bf16.mxu1 %v5360_v0  ;;  %v2378_v5 = vmax.f32 %v2308_v4, 0.0  ;;  %v1995_v46 = vadd.f32 %v7627_v47, %v6907_v39  ;;  %v7630_v16 = vld [vmem:[#allocation6_spill] sm:$0xff]  ;;  %v5382_v39 = vld [vmem:[%s7575_s5 + $0x78] sm:$0xff]  }
 0x1fd   :  { %v2313_v59 = vpop.f32.mrf.mxu1  ;;  %v2312_v22 = vadd.f32 %v2311_v1, %v2199_v61  ;;  %v2201_v21 = vadd.f32 %v2200_v12, %v2088_v55  ;;  %3407 = vmatprep.mubr.bf16.mxu1 %v7116_v17  ;;  %v2379_v18 = vmax.f32 %v2310_v2, 0.0  ;;  %v7628_v1 = vld [vmem:[#allocation7_spill] sm:$0xff]  ;;  %v7629_v12 = vld [vmem:[#allocation8_spill] sm:$0xff]  ;;  %v7631_v4 = vld [vmem:[#allocation10_spill] sm:$0xff]  ;;  %4764 = vmatprep.subr.bf16.mxu0 %v5382_v39 }
 0x1fe   :  { %v2204_v26 = vpop.f32.mrf.mxu0  ;;  %3408 = vmatmul.mubr.bf16.gmra.mxu1 %v7118_v51  ;;  %v5390_v47 = vld [vmem:[%s7575_s5 + $0x58] sm:$0xff]  }
 0x1ff   :  { %v2317_v42 = vpop.f32.mrf.mxu1  ;;  %v2314_v15 = vadd.f32 %v2313_v59, %v2201_v21  ;;  %3578 = vmatpush2.bf16.msra.mxu1 %v5358_v30  ;;  %v2382_v35 = vmax.f32 %v2312_v22, 0.0  ;;  %v2205_v62 = vadd.f32 %v2204_v26, %v7012_v27  ;;  %v2108_v26 = vadd.f32 %v7631_v4, %v1995_v46  ;;  %v5391_v46 = vld [vmem:[%s7575_s5 + $0x18] sm:$0xff]  }
 0x200   :  { %v2206_v31 = vpop.f32.mrf.mxu0  ;;  %3579 = vmatprep.subr.bf16.mxu1 %v5363_v37  ;;  %v5407_v39 = vld [vmem:[%s7575_s5 + $0x98] sm:$0xff]  }
 0x201   :  { %v2319_v6 = vpop.f32.mrf.mxu1  ;;  %v2383_v33 = vmax.f32 %v2314_v15, 0.0  ;;  %v2207_v44 = vadd.f32 %v2206_v31, %v7019_v29  ;;  %v7132_v63 = vpack.c.bf16 %v2382_v35, %v2378_v5  ;;  %v7626_v29 = vld [vmem:[#allocation9_spill] sm:$0xff]  ;;  %v2318_v8 = vadd.f32 %v2317_v42, %v2205_v62  ;;  %v5370_v15 = vld [vmem:[#allocation2 + $0x368] ss:$16 sps:$4 sm:$0xff]   ;;  %v5384_v5 = vld [vmem:[%s7575_s5 + $0x70] sm:$0xff]  }
 0x202   :  { %v2208_v53 = vpop.f32.mrf.mxu0  ;;  %v1993_v13 = vadd.f32 %v7626_v29, %v6900_v40  ;;  %v5372_v40 = vld [vmem:[#allocation2 + $0x36c] ss:$16 sps:$4 sm:$0xff]  }
 0x203   :  { %v2321_v19 = vpop.f32.mrf.mxu1  ;;  %v7130_v54 = vpack.c.bf16 %v2383_v33, %v2379_v18  ;;  %v2209_v20 = vadd.f32 %v2208_v53, %v2096_v25  ;;  %3580 = vmatpush2.bf16.msra.mxu1 %v5361_v3  ;;  %v2320_v7 = vadd.f32 %v2319_v6, %v2207_v44  ;;  %v2386_v37 = vmax.f32 %v2318_v8, 0.0  ;;  %v5383_v3 = vld [vmem:[%s7575_s5 + $0x38] sm:$0xff]   ;;  %v5388_v8 = vld [vmem:[%s7575_s5 + $0x60] sm:$0xff]  }
 0x204   :  { %v2210_v45 = vpop.f32.mrf.mxu0  ;;  %3581 = vmatprep.subr.bf16.mxu1 %v5366_v23  ;;  %v2106_v55 = vadd.f32 %v7628_v1, %v1993_v13  ;;  %v5375_v6 = vld [vmem:[#allocation2 + $0x34c] ss:$16 sps:$4 sm:$0xff]   ;;  %4765 = vmatpush3.bf16.msra.mxu0 %v5383_v3  ;;  %v5373_v53 = vld [vmem:[#allocation2 + $0x348] ss:$16 sps:$4 sm:$0xff]  }
 0x205   :  { %v2323_v32 = vpop.f32.mrf.mxu1  ;;  %v2322_v27 = vadd.f32 %v2321_v19, %v2209_v20  ;;  %v2211_v14 = vadd.f32 %v2210_v45, %v2098_v43  ;;  %3417 = vmatprep.mubr.bf16.mxu1 %v7130_v54  ;;  %v2387_v61 = vmax.f32 %v2320_v7, 0.0  ;;  %v5385_v19 = vld [vmem:[%s7575_s5 + $0x30] sm:$0xff]   ;;  %v5378_v20 = vld [vmem:[#allocation2 + $0x32c] ss:$16 sps:$4 sm:$0xff]   ;;  %4766 = vmatprep.subr.bf16.mxu0 %v5384_v5  ;;  %v5376_v13 = vld [vmem:[#allocation2 + $0x328] ss:$16 sps:$4 sm:$0xff]  }
 0x206   :  { %v2214_v34 = vpop.f32.mrf.mxu0  ;;  %3418 = vmatmul.mubr.bf16.gmra.mxu1 %v7132_v63  ;;  %v5387_v7 = vld [vmem:[%s7575_s5 + $0x28] sm:$0xff]  }
 0x207   :  { %v2327_v0 = vpop.f32.mrf.mxu1  ;;  %v2324_v48 = vadd.f32 %v2323_v32, %v2211_v14  ;;  %3582 = vmatpush2.bf16.msra.mxu1 %v5364_v56  ;;  %v2390_v10 = vmax.f32 %v2322_v27, 0.0  ;;  %v2215_v2 = vadd.f32 %v2214_v34, %v7630_v16  ;;  %v5381_v14 = vld [vmem:[#allocation2 + $0x30c] ss:$16 sps:$4 sm:$0xff]   ;;  %v5379_v34 = vld [vmem:[#allocation2 + $0x308] ss:$16 sps:$4 sm:$0xff]  }
 0x208   :  { %v2216_v38 = vpop.f32.mrf.mxu0  ;;  %3583 = vmatprep.subr.bf16.mxu1 %v5369_v60  ;;  %4767 = vmatpush3.bf16.msra.mxu0 %v5385_v19  ;;  %v5386_v60 = vld [vmem:[%s7575_s5 + $0x68] sm:$0xff]  }
 0x209   :  { %v2329_v52 = vpop.f32.mrf.mxu1  ;;  %v2391_v30 = vmax.f32 %v2324_v48, 0.0  ;;  %v2217_v59 = vadd.f32 %v2216_v38, %v7629_v12  ;;  %v7152_v35 = vpack.c.bf16 %v2390_v10, %v2386_v37  ;;  %v2328_v33 = vadd.f32 %v2327_v0, %v2215_v2  ;;  %4768 = vmatprep.subr.bf16.mxu0 %v5386_v60  ;;  %v5389_v0 = vld [vmem:[%s7575_s5 + $0x20] sm:$0xff]   ;;  %v5392_v48 = vld [vmem:[%s7575_s5 + $0x50] sm:$0xff]   ;;  %v5394_v38 = vld [vmem:[%s7575_s5 + $0x48] sm:$0xff]  }
 0x20a   :  { %v2218_v22 = vpop.f32.mrf.mxu0  ;;  %v5401_v12 = vld [vmem:[%s7575_s5 + $0xb0] sm:$0xff]   ;;  %v5403_v37 = vld [vmem:[%s7575_s5 + $0xa8] sm:$0xff]   ;;  %v5405_v2 = vld [vmem:[%s7575_s5 + $0xa0] sm:$0xff]  }
 0x20b   :  { %v2331_v21 = vpop.f32.mrf.mxu1  ;;  %v7147_v42 = vpack.c.bf16 %v2391_v30, %v2387_v61  ;;  %v2219_v58 = vadd.f32 %v2218_v22, %v2106_v55  ;;  %3584 = vmatpush2.bf16.msra.mxu1 %v5367_v49  ;;  %v2330_v23 = vadd.f32 %v2329_v52, %v2217_v59  ;;  %v2394_v32 = vmax.f32 %v2328_v33, 0.0  ;;  %v5393_v49 = vld [vmem:[%s7575_s5 + $0x10] sm:$0xff]   ;;  %v5399_v61 = vld [vmem:[%s7575_s5 + $0xb8] sm:$0xff]  }
 0x20c   :  { %v2220_v31 = vpop.f32.mrf.mxu0  ;;  %3585 = vmatprep.subr.bf16.mxu1 %v5372_v40  ;;  %4769 = vmatpush3.bf16.msra.mxu0 %v5387_v7  ;;  %v5397_v40 = vld [vmem:[%s7575_s5] sm:$0xff]   ;;  %v7632_v7 = vld [vmem:[#allocation11_spill] sm:$0xff] }
 0x20d   :  { %v2332_v25 = vadd.f32 %v2331_v21, %v2219_v58  ;;  %v2221_v18 = vadd.f32 %v2220_v31, %v2108_v26  ;;  %3427 = vmatprep.mubr.bf16.mxu1 %v7147_v42  ;;  %v2333_v44 = vpop.f32.mrf.mxu1  ;;  %v2395_v56 = vmax.f32 %v2330_v23, 0.0  ;;  %4770 = vmatprep.subr.bf16.mxu0 %v5388_v8  ;;  %v5406_v21 = vld [vmem:[%s7575_s5 + $0xd8] sm:$0xff]   ;;  %v5409_v58 = vld [vmem:[%s7575_s5 + $0x90] sm:$0xff]   ;;  %v5411_v31 = vld [vmem:[%s7575_s5 + $0x88] sm:$0xff]   ;;  %v7634_v8 = vsub.s32 0, %v7632_v7 }
 0x20e   :  { %3428 = vmatmul.mubr.bf16.gmra.mxu1 %v7152_v35  ;;  %v5412_v23 = vld [vmem:[%s7575_s5 + $0xc0] sm:$0xff]  }
 0x20f   :  { %v2334_v62 = vadd.f32 %v2333_v44, %v2221_v18  ;;  %3586 = vmatpush2.bf16.msra.mxu1 %v5370_v15  ;;  %v2398_v43 = vmax.f32 %v2332_v25, 0.0  ;;  %v5413_v25 = vld [vmem:[%s7575_s5 + $0x80] sm:$0xff]  }
 0x210   :  { %3587 = vmatprep.subr.bf16.mxu1 %v5375_v6  ;;  %4771 = vmatpush3.bf16.msra.mxu0 %v5389_v0 }
 0x211   :  { %v2399_v45 = vmax.f32 %v2334_v62, 0.0  ;;  %v7170_v27 = vpack.c.bf16 %v2398_v43, %v2394_v32  ;;  %4772 = vmatprep.subr.bf16.mxu0 %v5390_v47 }
 0x213   :  { %v7165_v29 = vpack.c.bf16 %v2399_v45, %v2395_v56  ;;  %3588 = vmatpush2.bf16.msra.mxu1 %v5373_v53 }
 0x214   :  { %3589 = vmatprep.subr.bf16.mxu1 %v5378_v20  ;;  %4773 = vmatpush3.bf16.msra.mxu0 %v5391_v46 }
 0x215   :  { %3437 = vmatprep.mubr.bf16.mxu1 %v7165_v29  ;;  %4774 = vmatprep.subr.bf16.mxu0 %v5392_v48 }
 0x216   :  { %3438 = vmatmul.mubr.bf16.gmra.mxu1 %v7170_v27 }
 0x217   :  { %3590 = vmatpush2.bf16.msra.mxu1 %v5376_v13  ;;  %3593 = vmatprep.mubr.bf16.mxu1 %v7060_v57 }
 0x218   :  { %3591 = vmatprep.subr.bf16.mxu1 %v5381_v14  ;;  %4775 = vmatpush3.bf16.msra.mxu0 %v5393_v49 }
 0x219   :  { %4776 = vmatprep.subr.bf16.mxu0 %v5394_v38 }
 0x21b   :  { %3592 = vmatpush2.bf16.msra.mxu1 %v5379_v34 }
 0x21e   :  { %v7187_v57 = vpop.f32.mrf.mxu0  ;;  %3594 = vmatmul.mubr.bf16.vlgmr.msra.gmra.mxu1 %v7062_v41  ;;  %v5395_v41 = vld [vmem:[%s7575_s5 + $0x8] sm:$0xff]  }
 0x21f   :  { %3603 = vmatprep.mubr.bf16.mxu1 %v7074_v36  ;;  %4777 = vmatpush3.bf16.msra.mxu0 %v5395_v41  ;;  %v5396_v36 = vld [vmem:[%s7575_s5 + $0x40] sm:$0xff]  }
 0x220   :  { %v7197_v10 = vpop.f32.mrf.mxu0  ;;  %4778 = vmatprep.subr.bf16.mxu0 %v5396_v36 }
 0x222   :  { %v7205_v52 = vpop.f32.mrf.mxu0 }
 0x223   :  { %4779 = vmatpush3.bf16.msra.mxu0 %v5397_v40 }
 0x224   :  { %v7215_v1 = vpop.f32.mrf.mxu0 }
 0x226   :  { %3604 = vmatmul.mubr.bf16.gmra.mxu1 %v7076_v28  ;;  %v7217_v55 = vpop.f32.mrf.mxu0 }
 0x227   :  { %3613 = vmatprep.mubr.bf16.mxu1 %v7088_v50  ;;  %v5398_v50 = vld [vmem:[%s7575_s5 + $0xf8] sm:$0xff]  }
 0x228   :  { %v7221_v28 = vpop.f32.mrf.mxu0  ;;  %4828 = vmatprep.subr.bf16.mxu1 %v5398_v50 }
 0x229   :  { %4829 = vmatpush3.bf16.msra.mxu1 %v5399_v61 }
 0x22a   :  { %v7229_v30 = vpop.f32.mrf.mxu0 }
 0x22e   :  { %3614 = vmatmul.mubr.bf16.gmra.mxu1 %v7090_v11  ;;  %v7233_v11 = vpop.f32.mrf.mxu0 }
 0x22f   :  { %3623 = vmatprep.mubr.bf16.mxu1 %v7102_v24  ;;  %v5400_v24 = vld [vmem:[%s7575_s5 + $0xf0] sm:$0xff]  }
 0x230   :  { %4830 = vmatprep.subr.bf16.mxu1 %v5400_v24  ;;  %v7241_v59 = vpop.f32.mrf.mxu0 }
 0x231   :  { %4831 = vmatpush3.bf16.msra.mxu1 %v5401_v12 }
 0x236   :  { %3624 = vmatmul.mubr.bf16.gmra.mxu1 %v7104_v9  ;;  %v7245_v9 = vpop.f32.mrf.mxu0 }
 0x237   :  { %3633 = vmatprep.mubr.bf16.mxu1 %v7116_v17  ;;  %v5402_v17 = vld [vmem:[%s7575_s5 + $0xe8] sm:$0xff]  }
 0x238   :  { %4832 = vmatprep.subr.bf16.mxu1 %v5402_v17  ;;  %v7253_v16 = vpop.f32.mrf.mxu0 }
 0x239   :  { %4833 = vmatpush3.bf16.msra.mxu1 %v5403_v37 }
 0x23e   :  { %3634 = vmatmul.mubr.bf16.gmra.mxu1 %v7118_v51  ;;  %v7257_v51 = vpop.f32.mrf.mxu0 }
 0x23f   :  { %3643 = vmatprep.mubr.bf16.mxu1 %v7130_v54  ;;  %v5404_v54 = vld [vmem:[%s7575_s5 + $0xe0] sm:$0xff]  }
 0x240   :  { %4834 = vmatprep.subr.bf16.mxu1 %v5404_v54  ;;  %v7265_v22 = vpop.f32.mrf.mxu0 }
 0x241   :  { %4835 = vmatpush3.bf16.msra.mxu1 %v5405_v2 }
 0x242   :  { %4836 = vmatprep.subr.bf16.mxu1 %v5406_v21 }
 0x245   :  { %4837 = vmatpush3.bf16.msra.mxu1 %v5407_v39 }
 0x246   :  { %3644 = vmatmul.mubr.bf16.gmra.mxu1 %v7132_v63  ;;  %v7269_v63 = vpop.f32.mrf.mxu0 }
 0x247   :  { %3653 = vmatprep.mubr.bf16.mxu1 %v7147_v42  ;;  %v5408_v42 = vld [vmem:[%s7575_s5 + $0xd0] sm:$0xff]  }
 0x248   :  { %v7277_v4 = vpop.f32.mrf.mxu0  ;;  %4838 = vmatprep.subr.bf16.mxu1 %v5408_v42 }
 0x249   :  { %4839 = vmatpush3.bf16.msra.mxu1 %v5409_v58 }
 0x24a   :  { %v7280_v26 = vpop.f32.mrf.mxu0 }
 0x24c   :  { %v7288_v15 = vpop.f32.mrf.mxu0 }
 0x24e   :  { %3654 = vmatmul.mubr.bf16.gmra.mxu1 %v7152_v35  ;;  %v7290_v3 = vpop.f32.mrf.mxu0  ;;  %v5410_v35 = vld [vmem:[%s7575_s5 + $0xc8] sm:$0xff]  }
 0x24f   :  { %3663 = vmatprep.mubr.bf16.mxu1 %v7165_v29  ;;  %4840 = vmatprep.subr.bf16.mxu1 %v5410_v35  ;;  %v7335_v29 = vld [vmem:[%s7574_s4] sm:$0xf] }
 0x250   :  { %v7298_v6 = vpop.f32.mrf.mxu0  ;;  %4841 = vmatpush3.bf16.msra.mxu1 %v5411_v31  ;;  %v7347_v34 = vrot.slane %v7335_v29, %v7634_v8 }
 0x251   :  { %4842 = vmatprep.subr.bf16.mxu1 %v5412_v23 }
 0x252   :  { %v7306_v18 = vpop.f32.mrf.mxu0  ;;  %v3261_v49 = vadd.f32 %v7205_v52, %v7347_v34  ;;  %v3257_v38 = vadd.f32 %v7187_v57, %v7347_v34  ;;  %v3267_v58 = vadd.f32 %v7217_v55, %v7347_v34 }
 0x254   :  { %4843 = vmatpush3.bf16.msra.mxu1 %v5413_v25  ;;  %v7308_v33 = vpop.f32.mrf.mxu0 }
 0x256   :  { %3664 = vmatmul.mubr.bf16.gmra.mxu1 %v7170_v27  ;;  %v7310_v44 = vpop.f32.mrf.mxu0  ;;  %v7633_v27 = vsub.s32 1, %v7632_v7 }
 0x258   :  { %v7312_v5 = vpop.f32.mrf.mxu0  ;;  %v7342_v14 = vrot.slane %v7335_v29, %v7633_v27 }
 0x25a   :  { %v7314_v62 = vpop.f32.mrf.mxu0  ;;  %v3259_v48 = vadd.f32 %v7197_v10, %v7342_v14  ;;  %v3263_v36 = vadd.f32 %v7215_v1, %v7342_v14  ;;  %v3269_v57 = vadd.f32 %v7221_v28, %v7342_v14  ;;  %v3271_v1 = vadd.f32 %v7229_v30, %v7347_v34 }
 0x25b   :  { %v3273_v23 = vadd.f32 %v7233_v11, %v7342_v14  ;;  %v3279_v11 = vadd.f32 %v7245_v9, %v7342_v14 }
 0x25c   :  { %v7316_v53 = vpop.f32.mrf.mxu0 }
 0x25e   :  { %v7318_v19 = vpop.f32.mrf.mxu0 }
 0x260   :  { %v7320_v43 = vpop.f32.mrf.mxu0 }
 0x262   :  { %v7322_v20 = vpop.f32.mrf.mxu0 }
 0x264   :  { %v7324_v56 = vpop.f32.mrf.mxu0 }
 0x266   :  { %v7326_v45 = vpop.f32.mrf.mxu0 }
 0x268   :  { %v7328_v32 = vpop.f32.mrf.mxu0 }
 0x26a   :  { %v7330_v60 = vpop.f32.mrf.mxu0 }
 0x26c   :  { %v7337_v13 = vpop.f32.mrf.mxu0 }
 0x26e   :  { %v7349_v47 = vpop.f32.mrf.mxu0 }
 0x270   :  { %v7359_v61 = vpop.f32.mrf.mxu0 }
 0x272   :  { %v7361_v21 = vpop.f32.mrf.mxu0 }
 0x274   :  { %v7371_v8 = vpop.f32.mrf.mxu0 }
 0x29e   :  { %v3369_v0 = vpop.f32.mrf.mxu1 }
 0x29f   :  { %v3370_v24 = vadd.f32 %v3369_v0, %v3257_v38 }
 0x2a0   :  { %v3371_v46 = vpop.f32.mrf.mxu1 }
 0x2a1   :  { %v3372_v40 = vadd.f32 %v3371_v46, %v3259_v48  ;;  %v3674_v52 = vmax.f32 %v3370_v24, 0.0  ;;  %v3277_v24 = vadd.f32 %v7241_v59, %v7347_v34 }
 0x2a2   :  { %v3373_v41 = vpop.f32.mrf.mxu1 }
 0x2a3   :  { %v3374_v50 = vadd.f32 %v3373_v41, %v3261_v49  ;;  %v3675_v10 = vmax.f32 %v3372_v40, 0.0  ;;  %v7373_v41 = vpop.f32.mrf.mxu0  ;;  %v3281_v40 = vadd.f32 %v7253_v16, %v7347_v34 }
 0x2a4   :  { %v3375_v12 = vpop.f32.mrf.mxu1 }
 0x2a5   :  { %v3376_v17 = vadd.f32 %v3375_v12, %v3263_v36  ;;  %v3678_v37 = vmax.f32 %v3374_v50, 0.0 }
 0x2a6   :  { %v3379_v54 = vpop.f32.mrf.mxu1 }
 0x2a7   :  { %v3679_v2 = vmax.f32 %v3376_v17, 0.0  ;;  %v3738_v35 = vpack.c.bf16 %v3678_v37, %v3674_v52  ;;  %v3380_v0 = vadd.f32 %v3379_v54, %v3267_v58  ;;  %v3283_v37 = vadd.f32 %v7257_v51, %v7342_v14 }
 0x2a8   :  { %v3381_v39 = vpop.f32.mrf.mxu1  ;;  %v3289_v51 = vadd.f32 %v7269_v63, %v7342_v14 }
 0x2a9   :  { %v3739_v42 = vpack.c.bf16 %v3679_v2, %v3675_v10  ;;  %v3382_v25 = vadd.f32 %v3381_v39, %v3269_v57  ;;  %v3682_v55 = vmax.f32 %v3380_v0, 0.0  ;;  %v7383_v2 = vpop.f32.mrf.mxu0 }
 0x2aa   :  { %v3383_v31 = vpop.f32.mrf.mxu1 }
 0x2ab   :  { %v3384_v27 = vadd.f32 %v3383_v31, %v3271_v1  ;;  %4065 = vmatprep.mubr.bf16.mxu0 %v3739_v42  ;;  %v3683_v49 = vmax.f32 %v3382_v25, 0.0  ;;  %v7385_v58 = vpop.f32.mrf.mxu0  ;;  %v3291_v31 = vadd.f32 %v7277_v4, %v7347_v34  ;;  %v3287_v25 = vadd.f32 %v7265_v22, %v7347_v34 }
 0x2ac   :  { %v3385_v46 = vpop.f32.mrf.mxu1  ;;  %4066 = vmatmul.mubr.bf16.vlgmr.msra.gmra.mxu0 %v3738_v35 }
 0x2ad   :  { %v3386_v28 = vadd.f32 %v3385_v46, %v3273_v23  ;;  %v3686_v48 = vmax.f32 %v3384_v27, 0.0  ;;  %v3293_v46 = vadd.f32 %v7280_v26, %v7342_v14  ;;  %v3299_v26 = vadd.f32 %v7290_v3, %v7342_v14 }
 0x2ae   :  { %v3389_v30 = vpop.f32.mrf.mxu1 }
 0x2af   :  { %v3687_v38 = vmax.f32 %v3386_v28, 0.0  ;;  %v3742_v12 = vpack.c.bf16 %v3686_v48, %v3682_v55  ;;  %v3390_v52 = vadd.f32 %v3389_v30, %v3277_v24  ;;  %v7395_v30 = vpop.f32.mrf.mxu0  ;;  %v3301_v24 = vadd.f32 %v7298_v6, %v7347_v34 }
 0x2b0   :  { %v3391_v36 = vpop.f32.mrf.mxu1 }
 0x2b1   :  { %v3743_v50 = vpack.c.bf16 %v3687_v38, %v3683_v49  ;;  %v3392_v54 = vadd.f32 %v3391_v36, %v3279_v11  ;;  %v3690_v59 = vmax.f32 %v3390_v52, 0.0 }
 0x2b2   :  { %v3393_v17 = vpop.f32.mrf.mxu1 }
 0x2b3   :  { %v3394_v10 = vadd.f32 %v3393_v17, %v3281_v40  ;;  %4073 = vmatprep.mubr.bf16.mxu0 %v3743_v50  ;;  %v3691_v1 = vmax.f32 %v3392_v54, 0.0  ;;  %v7397_v40 = vpop.f32.mrf.mxu0  ;;  %v3297_v17 = vadd.f32 %v7288_v15, %v7347_v34 }
 0x2b4   :  { %v3395_v39 = vpop.f32.mrf.mxu1  ;;  %4074 = vmatmul.mubr.bf16.gmra.mxu0 %v3742_v12 }
 0x2b5   :  { %v3396_v9 = vadd.f32 %v3395_v39, %v3283_v37  ;;  %v3694_v57 = vmax.f32 %v3394_v10, 0.0  ;;  %v3303_v10 = vadd.f32 %v7306_v18, %v7342_v14  ;;  %v3309_v18 = vadd.f32 %v7310_v44, %v7342_v14 }
 0x2b6   :  { %v3399_v16 = vpop.f32.mrf.mxu1 }
 0x2b7   :  { %v3695_v42 = vmax.f32 %v3396_v9, 0.0  ;;  %v3746_v27 = vpack.c.bf16 %v3694_v57, %v3690_v59  ;;  %v3400_v49 = vadd.f32 %v3399_v16, %v3287_v25  ;;  %v7407_v9 = vpop.f32.mrf.mxu0  ;;  %v3307_v25 = vadd.f32 %v7308_v33, %v7347_v34 }
 0x2b8   :  { %v3401_v35 = vpop.f32.mrf.mxu1 }
 0x2b9   :  { %v3747_v23 = vpack.c.bf16 %v3695_v42, %v3691_v1  ;;  %v3402_v28 = vadd.f32 %v3401_v35, %v3289_v51  ;;  %v3698_v22 = vmax.f32 %v3400_v49, 0.0  ;;  %v7409_v35 = vpop.f32.mrf.mxu0 }
 0x2ba   :  { %v3403_v0 = vpop.f32.mrf.mxu1 }
 0x2bb   :  { %v3404_v48 = vadd.f32 %v3403_v0, %v3291_v31  ;;  %4081 = vmatprep.mubr.bf16.mxu0 %v3747_v23  ;;  %v3699_v36 = vmax.f32 %v3402_v28, 0.0  ;;  %v3311_v31 = vadd.f32 %v7312_v5, %v7347_v34  ;;  %v7419_v49 = vpop.f32.mrf.mxu0 }
 0x2bc   :  { %v3405_v38 = vpop.f32.mrf.mxu1  ;;  %4082 = vmatmul.mubr.bf16.gmra.mxu0 %v3746_v27 }
 0x2bd   :  { %v3406_v63 = vadd.f32 %v3405_v38, %v3293_v46  ;;  %v3702_v55 = vmax.f32 %v3404_v48, 0.0  ;;  %v3313_v46 = vadd.f32 %v7314_v62, %v7342_v14  ;;  %v3319_v62 = vadd.f32 %v7318_v19, %v7342_v14 }
 0x2be   :  { %v3409_v4 = vpop.f32.mrf.mxu1 }
 0x2bf   :  { %v3703_v11 = vmax.f32 %v3406_v63, 0.0  ;;  %v3750_v37 = vpack.c.bf16 %v3702_v55, %v3698_v22  ;;  %v3410_v57 = vadd.f32 %v3409_v4, %v3297_v17 }
 0x2c0   :  { %v3411_v50 = vpop.f32.mrf.mxu1 }
 0x2c1   :  { %v3751_v12 = vpack.c.bf16 %v3703_v11, %v3699_v36  ;;  %v3412_v52 = vadd.f32 %v3411_v50, %v3299_v26  ;;  %v3706_v15 = vmax.f32 %v3410_v57, 0.0  ;;  %v7421_v11 = vpop.f32.mrf.mxu0  ;;  %v3321_v50 = vadd.f32 %v7320_v43, %v7347_v34 }
 0x2c2   :  { %v3413_v54 = vpop.f32.mrf.mxu1 }
 0x2c3   :  { %v3414_v39 = vadd.f32 %v3413_v54, %v3301_v24  ;;  %4089 = vmatprep.mubr.bf16.mxu0 %v3751_v12  ;;  %v3707_v42 = vmax.f32 %v3412_v52, 0.0  ;;  %v3317_v24 = vadd.f32 %v7316_v53, %v7347_v34  ;;  %v7431_v52 = vpop.f32.mrf.mxu0 }
 0x2c4   :  { %v3415_v16 = vpop.f32.mrf.mxu1  ;;  %4090 = vmatmul.mubr.bf16.gmra.mxu0 %v3750_v37  ;;  %v3323_v37 = vadd.f32 %v7322_v20, %v7342_v14  ;;  %v3329_v20 = vadd.f32 %v7326_v45, %v7342_v14  ;;  %v7635_v45 = vsub.s32 3, %v7632_v7 }
 0x2c5   :  { %v3416_v3 = vadd.f32 %v3415_v16, %v3303_v10  ;;  %v3710_v1 = vmax.f32 %v3414_v39, 0.0 }
 0x2c6   :  { %v3419_v6 = vpop.f32.mrf.mxu1 }
 0x2c7   :  { %v3711_v59 = vmax.f32 %v3416_v3, 0.0  ;;  %v3754_v27 = vpack.c.bf16 %v3710_v1, %v3706_v15  ;;  %v3420_v38 = vadd.f32 %v3419_v6, %v3307_v25  ;;  %v7433_v6 = vpop.f32.mrf.mxu0 }
 0x2c8   :  { %v3421_v51 = vpop.f32.mrf.mxu1 }
 0x2c9   :  { %v3755_v23 = vpack.c.bf16 %v3711_v59, %v3707_v42  ;;  %v3422_v28 = vadd.f32 %v3421_v51, %v3309_v18  ;;  %v3714_v33 = vmax.f32 %v3420_v38, 0.0  ;;  %v3331_v59 = vadd.f32 %v7328_v32, %v7347_v34 }
 0x2ca   :  { %v3423_v0 = vpop.f32.mrf.mxu1  ;;  %v3327_v51 = vadd.f32 %v7324_v56, %v7347_v34  ;;  %v7448_v32 = vrot.slane %v7335_v29, %v7635_v45  ;;  %v7636_v56 = vsub.s32 2, %v7632_v7 }
 0x2cb   :  { %v3424_v48 = vadd.f32 %v3423_v0, %v3311_v31  ;;  %4097 = vmatprep.mubr.bf16.mxu0 %v3755_v23  ;;  %v3715_v4 = vmax.f32 %v3422_v28, 0.0  ;;  %v3333_v23 = vadd.f32 %v7330_v60, %v7342_v14  ;;  %v7443_v0 = vpop.f32.mrf.mxu0 }
 0x2cc   :  { %v3425_v63 = vpop.f32.mrf.mxu1  ;;  %4098 = vmatmul.mubr.bf16.gmra.mxu0 %v3754_v27  ;;  %v7453_v34 = vrot.slane %v7335_v29, %v7636_v56 }
 0x2cd   :  { %v3426_v44 = vadd.f32 %v3425_v63, %v3313_v46  ;;  %v3718_v55 = vmax.f32 %v3424_v48, 0.0 }
 0x2ce   :  { %v3429_v5 = vpop.f32.mrf.mxu1  ;;  %v3483_v7 = vadd.f32 %v7337_v13, %v7453_v34  ;;  %v3503_v45 = vadd.f32 %v7395_v30, %v7453_v34 }
 0x2cf   :  { %v3719_v36 = vmax.f32 %v3426_v44, 0.0  ;;  %v3758_v12 = vpack.c.bf16 %v3718_v55, %v3714_v33  ;;  %v3430_v39 = vadd.f32 %v3429_v5, %v3317_v24  ;;  %v7455_v44 = vpop.f32.mrf.mxu0 }
 0x2d0   :  { %v3431_v22 = vpop.f32.mrf.mxu1 }
 0x2d1   :  { %v3759_v26 = vpack.c.bf16 %v3719_v36, %v3715_v4  ;;  %v3432_v54 = vadd.f32 %v3431_v22, %v3319_v62  ;;  %v3722_v53 = vmax.f32 %v3430_v39, 0.0  ;;  %v3485_v4 = vadd.f32 %v7349_v47, %v7448_v32  ;;  %v7465_v24 = vpop.f32.mrf.mxu0 }
 0x2d2   :  { %v3433_v17 = vpop.f32.mrf.mxu1  ;;  %v3487_v36 = vadd.f32 %v7359_v61, %v7453_v34  ;;  %v3489_v62 = vadd.f32 %v7361_v21, %v7448_v32  ;;  %v3495_v21 = vadd.f32 %v7373_v41, %v7448_v32 }
 0x2d3   :  { %v3434_v10 = vadd.f32 %v3433_v17, %v3321_v50  ;;  %4105 = vmatprep.mubr.bf16.mxu0 %v3759_v26  ;;  %v3723_v3 = vmax.f32 %v3432_v54, 0.0  ;;  %v7467_v39 = vpop.f32.mrf.mxu0 }
 0x2d4   :  { %v3435_v57 = vpop.f32.mrf.mxu1  ;;  %4106 = vmatmul.mubr.bf16.gmra.mxu0 %v3758_v12 }
 0x2d5   :  { %v3436_v19 = vadd.f32 %v3435_v57, %v3323_v37  ;;  %v3726_v16 = vmax.f32 %v3434_v10, 0.0 }
 0x2d6   :  { %v3439_v43 = vpop.f32.mrf.mxu1 }
 0x2d7   :  { %v3727_v1 = vmax.f32 %v3436_v19, 0.0  ;;  %v3762_v18 = vpack.c.bf16 %v3726_v16, %v3722_v53  ;;  %v3440_v46 = vadd.f32 %v3439_v43, %v3327_v51  ;;  %v3497_v19 = vadd.f32 %v7383_v2, %v7453_v34 }
 0x2d8   :  { %v3441_v42 = vpop.f32.mrf.mxu1  ;;  %v3493_v43 = vadd.f32 %v7371_v8, %v7453_v34  ;;  %v3499_v53 = vadd.f32 %v7385_v58, %v7448_v32  ;;  %v3505_v58 = vadd.f32 %v7397_v40, %v7448_v32 }
 0x2d9   :  { %v3763_v15 = vpack.c.bf16 %v3727_v1, %v3723_v3  ;;  %v3442_v25 = vadd.f32 %v3441_v42, %v3329_v20  ;;  %v3730_v55 = vmax.f32 %v3440_v46, 0.0  ;;  %v3507_v46 = vadd.f32 %v7407_v9, %v7453_v34 }
 0x2da   :  { %v3443_v31 = vpop.f32.mrf.mxu1 }
 0x2db   :  { %v3444_v27 = vadd.f32 %v3443_v31, %v3331_v59  ;;  %4113 = vmatprep.mubr.bf16.mxu0 %v3763_v15  ;;  %v3731_v38 = vmax.f32 %v3442_v25, 0.0  ;;  %v7477_v59 = vpop.f32.mrf.mxu0 }
 0x2dc   :  { %v3445_v28 = vpop.f32.mrf.mxu1  ;;  %4114 = vmatmul.mubr.bf16.gmra.mxu0 %v3762_v18 }
 0x2dd   :  { %v3446_v48 = vadd.f32 %v3445_v28, %v3333_v23  ;;  %v3734_v60 = vmax.f32 %v3444_v27, 0.0  ;;  %v7479_v25 = vpop.f32.mrf.mxu0 }
 0x2de   :  { %v3595_v14 = vpop.f32.mrf.mxu1 }
 0x2df   :  { %v3735_v63 = vmax.f32 %v3446_v48, 0.0  ;;  %v3766_v29 = vpack.c.bf16 %v3734_v60, %v3730_v55  ;;  %v3596_v12 = vadd.f32 %v3595_v14, %v3483_v7  ;;  %v3509_v60 = vadd.f32 %v7409_v35, %v7448_v32 }
 0x2e0   :  { %v3597_v5 = vpop.f32.mrf.mxu1  ;;  %v3517_v35 = vadd.f32 %v7431_v52, %v7453_v34 }
 0x2e1   :  { %v3767_v33 = vpack.c.bf16 %v3735_v63, %v3731_v38  ;;  %v3598_v50 = vadd.f32 %v3597_v5, %v3485_v4  ;;  %v3676_v13 = vmax.f32 %v3596_v12, 0.0  ;;  %v3536_v63 = vpop.f32.mrf.mxu0 }
 0x2e2   :  { %v3599_v22 = vpop.f32.mrf.mxu1 }
 0x2e3   :  { %v3600_v26 = vadd.f32 %v3599_v22, %v3487_v36  ;;  %4121 = vmatprep.mubr.bf16.mxu0 %v3767_v33  ;;  %v3677_v54 = vmax.f32 %v3598_v50, 0.0  ;;  %v3538_v7 = vpop.f32.mrf.mxu0  ;;  %v3515_v22 = vadd.f32 %v7421_v11, %v7448_v32  ;;  %v3513_v50 = vadd.f32 %v7419_v49, %v7453_v34 }
 0x2e4   :  { %v3601_v17 = vpop.f32.mrf.mxu1  ;;  %4122 = vmatmul.mubr.bf16.gmra.mxu0 %v3766_v29 }
 0x2e5   :  { %v3602_v47 = vadd.f32 %v3601_v17, %v3489_v62  ;;  %v3680_v37 = vmax.f32 %v3600_v26, 0.0  ;;  %v3519_v17 = vadd.f32 %v7433_v6, %v7448_v32  ;;  %v3527_v6 = vadd.f32 %v7465_v24, %v7453_v34 }
 0x2e6   :  { %v3605_v61 = vpop.f32.mrf.mxu1 }
 0x2e7   :  { %v3681_v10 = vmax.f32 %v3602_v47, 0.0  ;;  %v3740_v3 = vpack.c.bf16 %v3680_v37, %v3676_v13  ;;  %v3606_v15 = vadd.f32 %v3605_v61, %v3493_v43  ;;  %v3542_v61 = vpop.f32.mrf.mxu0  ;;  %v3525_v43 = vadd.f32 %v7455_v44, %v7448_v32 }
 0x2e8   :  { %v3607_v57 = vpop.f32.mrf.mxu1 }
 0x2e9   :  { %v3741_v16 = vpack.c.bf16 %v3681_v10, %v3677_v54  ;;  %v3608_v42 = vadd.f32 %v3607_v57, %v3495_v21  ;;  %v3684_v8 = vmax.f32 %v3606_v15, 0.0 }
 0x2ea   :  { %v3609_v1 = vpop.f32.mrf.mxu1 }
 0x2eb   :  { %v3610_v20 = vadd.f32 %v3609_v1, %v3497_v19  ;;  %4162 = vmatprep.mubr.bf16.mxu1 %v3741_v16  ;;  %v3685_v31 = vmax.f32 %v3608_v42, 0.0  ;;  %v3544_v19 = vpop.f32.mrf.mxu0  ;;  %v3523_v1 = vadd.f32 %v7443_v0, %v7453_v34 }
 0x2ec   :  { %v3611_v51 = vpop.f32.mrf.mxu1  ;;  %4163 = vmatmul.mubr.bf16.vlgmr.msra.gmra.mxu1 %v3740_v3 }
 0x2ed   :  { %v3612_v41 = vadd.f32 %v3611_v51, %v3499_v53  ;;  %v3688_v18 = vmax.f32 %v3610_v20, 0.0  ;;  %v3529_v20 = vadd.f32 %v7467_v39, %v7448_v32  ;;  %v3537_v39 = vadd.f32 %v3536_v63, %v7453_v34 }
 0x2ee   :  { %v3615_v2 = vpop.f32.mrf.mxu1 }
 0x2ef   :  { %v3689_v23 = vmax.f32 %v3612_v41, 0.0  ;;  %v3744_v48 = vpack.c.bf16 %v3688_v18, %v3684_v8  ;;  %v3616_v55 = vadd.f32 %v3615_v2, %v3503_v45  ;;  %v3546_v41 = vpop.f32.mrf.mxu0  ;;  %v3533_v45 = vadd.f32 %v7477_v59, %v7453_v34 }
 0x2f0   :  { %v3617_v27 = vpop.f32.mrf.mxu1  ;;  %v3545_v59 = vadd.f32 %v3544_v19, %v7448_v32 }
 0x2f1   :  { %v3745_v28 = vpack.c.bf16 %v3689_v23, %v3685_v31  ;;  %v3618_v14 = vadd.f32 %v3617_v27, %v3505_v58  ;;  %v3692_v29 = vmax.f32 %v3616_v55, 0.0  ;;  %v3548_v27 = vpop.f32.mrf.mxu0 }
 0x2f2   :  { %v3619_v56 = vpop.f32.mrf.mxu1 }
 0x2f3   :  { %v3620_v38 = vadd.f32 %v3619_v56, %v3507_v46  ;;  %4170 = vmatprep.mubr.bf16.mxu1 %v3745_v28  ;;  %v3693_v9 = vmax.f32 %v3618_v14, 0.0  ;;  %v3535_v46 = vadd.f32 %v7479_v25, %v7448_v32  ;;  %v3552_v55 = vpop.f32.mrf.mxu0 }
 0x2f4   :  { %v3621_v5 = vpop.f32.mrf.mxu1  ;;  %4171 = vmatmul.mubr.bf16.gmra.mxu1 %v3744_v48 }
 0x2f5   :  { %v3622_v40 = vadd.f32 %v3621_v5, %v3509_v60  ;;  %v3696_v4 = vmax.f32 %v3620_v38, 0.0  ;;  %v3539_v60 = vadd.f32 %v3538_v7, %v7448_v32 }
 0x2f6   :  { %v3625_v36 = vpop.f32.mrf.mxu1 }
 0x2f7   :  { %v3697_v33 = vmax.f32 %v3622_v40, 0.0  ;;  %v3748_v26 = vpack.c.bf16 %v3696_v4, %v3692_v29  ;;  %v3626_v54 = vadd.f32 %v3625_v36, %v3513_v50 }
 0x2f8   :  { %v3627_v30 = vpop.f32.mrf.mxu1 }
 0x2f9   :  { %v3749_v62 = vpack.c.bf16 %v3697_v33, %v3693_v9  ;;  %v3628_v47 = vadd.f32 %v3627_v30, %v3515_v22  ;;  %v3700_v16 = vmax.f32 %v3626_v54, 0.0  ;;  %v3554_v33 = vpop.f32.mrf.mxu0  ;;  %v3547_v22 = vadd.f32 %v3546_v41, %v7453_v34 }
 0x2fa   :  { %v3629_v12 = vpop.f32.mrf.mxu1 }
 0x2fb   :  { %v3630_v37 = vadd.f32 %v3629_v12, %v3517_v35  ;;  %4178 = vmatprep.mubr.bf16.mxu1 %v3749_v62  ;;  %v3701_v52 = vmax.f32 %v3628_v47, 0.0  ;;  %v3543_v35 = vadd.f32 %v3542_v61, %v7453_v34  ;;  %v3556_v47 = vpop.f32.mrf.mxu0  ;;  %v3555_v61 = vadd.f32 %v3554_v33, %v7448_v32 }
 0x2fc   :  { %v3631_v10 = vpop.f32.mrf.mxu1  ;;  %4179 = vmatmul.mubr.bf16.gmra.mxu1 %v3748_v26  ;;  %v3549_v26 = vadd.f32 %v3548_v27, %v7448_v32 }
 0x2fd   :  { %v3632_v11 = vadd.f32 %v3631_v10, %v3519_v17  ;;  %v3704_v13 = vmax.f32 %v3630_v37, 0.0 }
 0x2fe   :  { %v3635_v57 = vpop.f32.mrf.mxu1 }
 0x2ff   :  { %v3705_v21 = vmax.f32 %v3632_v11, 0.0  ;;  %v3752_v53 = vpack.c.bf16 %v3704_v13, %v3700_v16  ;;  %v3636_v18 = vadd.f32 %v3635_v57, %v3523_v1 }
 0x300   :  { %v3637_v49 = vpop.f32.mrf.mxu1 }
 0x301   :  { %v3753_v3 = vpack.c.bf16 %v3705_v21, %v3701_v52  ;;  %v3638_v15 = vadd.f32 %v3637_v49, %v3525_v43  ;;  %v3708_v58 = vmax.f32 %v3636_v18, 0.0  ;;  %v3558_v21 = vpop.f32.mrf.mxu0  ;;  %v3557_v49 = vadd.f32 %v3556_v47, %v7453_v34 }
 0x302   :  { %v3639_v42 = vpop.f32.mrf.mxu1 }
 0x303   :  { %v3640_v51 = vadd.f32 %v3639_v42, %v3527_v6  ;;  %4186 = vmatprep.mubr.bf16.mxu1 %v3753_v3  ;;  %v3709_v24 = vmax.f32 %v3638_v15, 0.0  ;;  %v3553_v6 = vadd.f32 %v3552_v55, %v7453_v34 }
 0x304   :  { %v3641_v2 = vpop.f32.mrf.mxu1  ;;  %4187 = vmatmul.mubr.bf16.gmra.mxu1 %v3752_v53  ;;  %v3559_v53 = vadd.f32 %v3558_v21, %v7448_v32 }
 0x305   :  { %v3642_v44 = vadd.f32 %v3641_v2, %v3529_v20  ;;  %v3712_v31 = vmax.f32 %v3640_v51, 0.0 }
 0x306   :  { %v3645_v23 = vpop.f32.mrf.mxu1 }
 0x307   :  { %v3713_v8 = vmax.f32 %v3642_v44, 0.0  ;;  %v3756_v48 = vpack.c.bf16 %v3712_v31, %v3708_v58  ;;  %v3646_v5 = vadd.f32 %v3645_v23, %v3533_v45 }
 0x308   :  { %v3647_v0 = vpop.f32.mrf.mxu1 }
 0x309   :  { %v3757_v28 = vpack.c.bf16 %v3713_v8, %v3709_v24  ;;  %v3648_v14 = vadd.f32 %v3647_v0, %v3535_v46  ;;  %v3716_v29 = vmax.f32 %v3646_v5, 0.0 }
 0x30a   :  { %v3649_v56 = vpop.f32.mrf.mxu1 }
 0x30b   :  { %v3650_v38 = vadd.f32 %v3649_v56, %v3537_v39  ;;  %4194 = vmatprep.mubr.bf16.mxu1 %v3757_v28  ;;  %v3717_v9 = vmax.f32 %v3648_v14, 0.0 }
 0x30c   :  { %v3651_v40 = vpop.f32.mrf.mxu1  ;;  %4195 = vmatmul.mubr.bf16.gmra.mxu1 %v3756_v48 }
 0x30d   :  { %v3652_v4 = vadd.f32 %v3651_v40, %v3539_v60  ;;  %v3720_v36 = vmax.f32 %v3650_v38, 0.0 }
 0x30e   :  { %v3655_v25 = vpop.f32.mrf.mxu1 }
 0x30f   :  { %v3721_v63 = vmax.f32 %v3652_v4, 0.0  ;;  %v3760_v62 = vpack.c.bf16 %v3720_v36, %v3716_v29  ;;  %v3656_v37 = vadd.f32 %v3655_v25, %v3543_v35 }
 0x310   :  { %v3657_v30 = vpop.f32.mrf.mxu1 }
 0x311   :  { %v3761_v7 = vpack.c.bf16 %v3721_v63, %v3717_v9  ;;  %v3658_v12 = vadd.f32 %v3657_v30, %v3545_v59  ;;  %v3724_v19 = vmax.f32 %v3656_v37, 0.0  ;;  %v7526_v63 = vld [vmem:[%s7576_s6] ss:$0 sm:$0xff] }
 0x312   :  { %v3659_v50 = vpop.f32.mrf.mxu1 }
 0x313   :  { %v3660_v17 = vadd.f32 %v3659_v50, %v3547_v22  ;;  %4202 = vmatprep.mubr.bf16.mxu1 %v3761_v7  ;;  %v3725_v57 = vmax.f32 %v3658_v12, 0.0 }
 0x314   :  { %v3661_v54 = vpop.f32.mrf.mxu1  ;;  %4203 = vmatmul.mubr.bf16.gmra.mxu1 %v3760_v62 }
 0x315   :  { %v3662_v10 = vadd.f32 %v3661_v54, %v3549_v26  ;;  %v3728_v11 = vmax.f32 %v3660_v17, 0.0 }
 0x316   :  { %v3665_v13 = vpop.f32.mrf.mxu1 }
 0x317   :  { %v3729_v52 = vmax.f32 %v3662_v10, 0.0  ;;  %v3764_v3 = vpack.c.bf16 %v3728_v11, %v3724_v19  ;;  %v3666_v15 = vadd.f32 %v3665_v13, %v3553_v6 }
 0x318   :  { %v3667_v16 = vpop.f32.mrf.mxu1 }
 0x319   :  { %v3765_v43 = vpack.c.bf16 %v3729_v52, %v3725_v57  ;;  %v3668_v42 = vadd.f32 %v3667_v16, %v3555_v61  ;;  %v3732_v31 = vmax.f32 %v3666_v15, 0.0 }
 0x31a   :  { %v3669_v1 = vpop.f32.mrf.mxu1 }
 0x31b   :  { %v3670_v20 = vadd.f32 %v3669_v1, %v3557_v49  ;;  %4210 = vmatprep.mubr.bf16.mxu1 %v3765_v43  ;;  %v3733_v2 = vmax.f32 %v3668_v42, 0.0 }
 0x31c   :  { %v3671_v51 = vpop.f32.mrf.mxu1  ;;  %4211 = vmatmul.mubr.bf16.gmra.mxu1 %v3764_v3 }
 0x31d   :  { %v3672_v41 = vadd.f32 %v3671_v51, %v3559_v53  ;;  %v3736_v18 = vmax.f32 %v3670_v20, 0.0 }
 0x31f   :  { %v3737_v44 = vmax.f32 %v3672_v41, 0.0  ;;  %v3768_v24 = vpack.c.bf16 %v3736_v18, %v3732_v31 }
 0x321   :  { %v3769_v23 = vpack.c.bf16 %v3737_v44, %v3733_v2 }
 0x323   :  { %4218 = vmatprep.mubr.bf16.mxu1 %v3769_v23 }
 0x324   :  { %4219 = vmatmul.mubr.bf16.gmra.mxu1 %v3768_v24 }
 0x36c   :  { %v4780_v34 = vpop.f32.mrf.mxu0 }
 0x36e   :  { %v4781_v8 = vpop.f32.mrf.mxu0 }
 0x36f   :  { %v4782_v25 = vadd.f32 %v4781_v8, %v4780_v34 }
 0x370   :  { %v4783_v27 = vpop.f32.mrf.mxu0 }
 0x371   :  { %v4068_v22 = vadd.f32 %v4782_v25, %v7526_v63 }
 0x372   :  { %v4784_v58 = vpop.f32.mrf.mxu0 }
 0x373   :  { %v4785_v9 = vadd.f32 %v4784_v58, %v4783_v27 }
 0x374   :  { %v4786_v32 = vpop.f32.mrf.mxu0 }
 0x375   :  { %v4071_v7 = vadd.f32 %v4785_v9, %v7526_v63 }
 0x376   :  { %v4787_v0 = vpop.f32.mrf.mxu0 }
 0x377   :  { %v4788_v47 = vadd.f32 %v4787_v0, %v4786_v32 }
 0x378   :  { %v4789_v46 = vpop.f32.mrf.mxu0 }
 0x379   :  { %v4076_v52 = vadd.f32 %v4788_v47, %v7526_v63 }
 0x37a   :  { %v4790_v39 = vpop.f32.mrf.mxu0 }
 0x37b   :  { %v4791_v37 = vadd.f32 %v4790_v39, %v4789_v46 }
 0x37c   :  { %v4792_v28 = vpop.f32.mrf.mxu0 }
 0x37d   :  { %v4079_v21 = vadd.f32 %v4791_v37, %v7526_v63 }
 0x37e   :  { %v4793_v45 = vpop.f32.mrf.mxu0 }
 0x37f   :  { %v4794_v3 = vadd.f32 %v4793_v45, %v4792_v28 }
 0x380   :  { %v4795_v48 = vpop.f32.mrf.mxu0 }
 0x381   :  { %v4084_v41 = vadd.f32 %v4794_v3, %v7526_v63 }
 0x382   :  { %v4796_v56 = vpop.f32.mrf.mxu0 }
 0x383   :  { %v4797_v1 = vadd.f32 %v4796_v56, %v4795_v48 }
 0x384   :  { %v4798_v60 = vpop.f32.mrf.mxu0 }
 0x385   :  { %v4087_v18 = vadd.f32 %v4797_v1, %v7526_v63 }
 0x386   :  { %v4799_v14 = vpop.f32.mrf.mxu0 }
 0x387   :  { %v4800_v8 = vadd.f32 %v4799_v14, %v4798_v60 }
 0x388   :  { %v4801_v38 = vpop.f32.mrf.mxu0 }
 0x389   :  { %v4092_v28 = vadd.f32 %v4800_v8, %v7526_v63 }
 0x38a   :  { %v4802_v55 = vpop.f32.mrf.mxu0 }
 0x38b   :  { %v4803_v27 = vadd.f32 %v4802_v55, %v4801_v38 }
 0x38c   :  { %v7519_v5 = vpop.f32.mrf.mxu0 }
 0x38d   :  { %v4095_v45 = vadd.f32 %v4803_v27, %v7526_v63 }
 0x38e   :  { %v7521_v40 = vpop.f32.mrf.mxu0 }
 0x38f   :  { %v4806_v14 = vadd.f32 %v7521_v40, %v7519_v5 }
 0x390   :  { %v4807_v33 = vpop.f32.mrf.mxu0 }
 0x392   :  { %v4808_v62 = vpop.f32.mrf.mxu0 }
 0x393   :  { %v4809_v38 = vadd.f32 %v4808_v62, %v4807_v33 }
 0x394   :  { %v4810_v10 = vpop.f32.mrf.mxu0 }
 0x396   :  { %v4811_v16 = vpop.f32.mrf.mxu0 }
 0x397   :  { %v4812_v40 = vadd.f32 %v4811_v16, %v4810_v10 }
 0x398   :  { %v4813_v42 = vpop.f32.mrf.mxu0 }
 0x39a   :  { %v4814_v44 = vpop.f32.mrf.mxu0 }
 0x39b   :  { %v4815_v33 = vadd.f32 %v4814_v44, %v4813_v42 }
 0x39c   :  { %v4816_v32 = vpop.f32.mrf.mxu0 }
 0x39e   :  { %v4817_v56 = vpop.f32.mrf.mxu0 }
 0x39f   :  { %v4818_v16 = vadd.f32 %v4817_v56, %v4816_v32 }
 0x3a0   :  { %v4819_v9 = vpop.f32.mrf.mxu0 }
 0x3ac   :  { %v4844_v4 = vpop.f32.mrf.mxu1 }
 0x3ae   :  { %v4845_v36 = vpop.f32.mrf.mxu1 }
 0x3af   :  { %v4846_v30 = vadd.f32 %v4845_v36, %v4844_v4 }
 0x3b0   :  { %v4847_v29 = vpop.f32.mrf.mxu1 }
 0x3b1   :  { %v4165_v26 = vadd.f32 %v4846_v30, %v4068_v22  ;;  %v4100_v22 = vadd.f32 %v4806_v14, %v7526_v63 }
 0x3b2   :  { %v4848_v59 = vpop.f32.mrf.mxu1 }
 0x3b3   :  { %v4849_v35 = vadd.f32 %v4848_v59, %v4847_v29 }
 0x3b4   :  { %v4850_v50 = vpop.f32.mrf.mxu1 }
 0x3b5   :  { %v4168_v12 = vadd.f32 %v4849_v35, %v4071_v7  ;;  %v4103_v7 = vadd.f32 %v4809_v38, %v7526_v63 }
 0x3b6   :  { %v4851_v17 = vpop.f32.mrf.mxu1 }
 0x3b7   :  { %v4720_v54 = vpack.c.bf16 %v4168_v12, %v4165_v26  ;;  %v4852_v13 = vadd.f32 %v4851_v17, %v4850_v50  ;;  %v4820_v50 = vpop.f32.mrf.mxu0 }
 0x3b8   :  { %v4853_v11 = vpop.f32.mrf.mxu1 }
 0x3b9   :  { %4721 = vst [vmem:[%s7577_s7] sm:$0xff] %v4720_v54   ;;  %v4173_v49 = vadd.f32 %v4852_v13, %v4076_v52  ;;  %v4822_v47 = vpop.f32.mrf.mxu0  ;;  %v4108_v13 = vadd.f32 %v4812_v40, %v7526_v63 }
 0x3ba   :  { %v4854_v57 = vpop.f32.mrf.mxu1 }
 0x3bb   :  { %v4855_v19 = vadd.f32 %v4854_v57, %v4853_v11  ;;  %v4111_v57 = vadd.f32 %v4815_v33, %v7526_v63 }
 0x3bc   :  { %v4856_v61 = vpop.f32.mrf.mxu1 }
 0x3bd   :  { %v4176_v43 = vadd.f32 %v4855_v19, %v4079_v21  ;;  %v4823_v21 = vpop.f32.mrf.mxu0 }
 0x3be   :  { %v4857_v6 = vpop.f32.mrf.mxu1 }
 0x3bf   :  { %v4725_v53 = vpack.c.bf16 %v4176_v43, %v4173_v49  ;;  %v4858_v15 = vadd.f32 %v4857_v6, %v4856_v61  ;;  %v4821_v43 = vadd.f32 %v4820_v50, %v4819_v9  ;;  %v4825_v3 = vpop.f32.mrf.mxu0 }
 0x3c0   :  { %v4859_v20 = vpop.f32.mrf.mxu1 }
 0x3c1   :  { %4757 = vst [vmem:[%s7577_s7 + $0x8] sm:$0xff] %v4725_v53   ;;  %v4181_v23 = vadd.f32 %v4858_v15, %v4084_v41  ;;  %v4119_v15 = vadd.f32 %v4821_v43, %v7526_v63  ;;  %v4826_v41 = vpop.f32.mrf.mxu0 }
 0x3c2   :  { %v4860_v51 = vpop.f32.mrf.mxu1 }
 0x3c3   :  { %v4861_v2 = vadd.f32 %v4860_v51, %v4859_v20  ;;  %v4116_v20 = vadd.f32 %v4818_v16, %v7526_v63 }
 0x3c4   :  { %v4862_v31 = vpop.f32.mrf.mxu1 }
 0x3c5   :  { %v4184_v24 = vadd.f32 %v4861_v2, %v4087_v18 }
 0x3c6   :  { %v4863_v34 = vpop.f32.mrf.mxu1 }
 0x3c7   :  { %v4730_v58 = vpack.c.bf16 %v4184_v24, %v4181_v23  ;;  %v4864_v46 = vadd.f32 %v4863_v34, %v4862_v31  ;;  %v4824_v23 = vadd.f32 %v4823_v21, %v4822_v47  ;;  %v4827_v24 = vadd.f32 %v4826_v41, %v4825_v3 }
 0x3c8   :  { %v4865_v0 = vpop.f32.mrf.mxu1 }
 0x3c9   :  { %4758 = vst [vmem:[%s7577_s7 + $0x10] sm:$0xff] %v4730_v58   ;;  %v4189_v36 = vadd.f32 %v4864_v46, %v4092_v28  ;;  %v4124_v32 = vadd.f32 %v4824_v23, %v7526_v63 }
 0x3ca   :  { %v4866_v39 = vpop.f32.mrf.mxu1 }
 0x3cb   :  { %v4867_v48 = vadd.f32 %v4866_v39, %v4865_v0  ;;  %v4127_v0 = vadd.f32 %v4827_v24, %v7526_v63 }
 0x3cc   :  { %v4868_v4 = vpop.f32.mrf.mxu1 }
 0x3cd   :  { %v4192_v25 = vadd.f32 %v4867_v48, %v4095_v45 }
 0x3ce   :  { %v4869_v60 = vpop.f32.mrf.mxu1 }
 0x3cf   :  { %v4735_v55 = vpack.c.bf16 %v4192_v25, %v4189_v36  ;;  %v4870_v30 = vadd.f32 %v4869_v60, %v4868_v4 }
 0x3d0   :  { %v4871_v29 = vpop.f32.mrf.mxu1 }
 0x3d1   :  { %4759 = vst [vmem:[%s7577_s7 + $0x18] sm:$0xff] %v4735_v55   ;;  %v4197_v12 = vadd.f32 %v4870_v30, %v4100_v22 }
 0x3d2   :  { %v4872_v59 = vpop.f32.mrf.mxu1 }
 0x3d3   :  { %v4873_v35 = vadd.f32 %v4872_v59, %v4871_v29 }
 0x3d4   :  { %v4874_v26 = vpop.f32.mrf.mxu1 }
 0x3d5   :  { %v4200_v17 = vadd.f32 %v4873_v35, %v4103_v7 }
 0x3d6   :  { %v4875_v5 = vpop.f32.mrf.mxu1 }
 0x3d7   :  { %v4740_v62 = vpack.c.bf16 %v4200_v17, %v4197_v12  ;;  %v4876_v54 = vadd.f32 %v4875_v5, %v4874_v26 }
 0x3d8   :  { %v4877_v37 = vpop.f32.mrf.mxu1 }
 0x3d9   :  { %4760 = vst [vmem:[%s7577_s7 + $0x20] sm:$0xff] %v4740_v62   ;;  %v4205_v61 = vadd.f32 %v4876_v54, %v4108_v13 }
 0x3da   :  { %v4878_v11 = vpop.f32.mrf.mxu1 }
 0x3db   :  { %v4879_v52 = vadd.f32 %v4878_v11, %v4877_v37 }
 0x3dc   :  { %v4880_v19 = vpop.f32.mrf.mxu1 }
 0x3dd   :  { %v4208_v49 = vadd.f32 %v4879_v52, %v4111_v57 }
 0x3de   :  { %v4881_v10 = vpop.f32.mrf.mxu1 }
 0x3df   :  { %v4745_v6 = vpack.c.bf16 %v4208_v49, %v4205_v61  ;;  %v4882_v53 = vadd.f32 %v4881_v10, %v4880_v19 }
 0x3e0   :  { %v4883_v1 = vpop.f32.mrf.mxu1 }
 0x3e1   :  { %4761 = vst [vmem:[%s7577_s7 + $0x28] sm:$0xff] %v4745_v6   ;;  %v4213_v2 = vadd.f32 %v4882_v53, %v4116_v20 }
 0x3e2   :  { %v4884_v42 = vpop.f32.mrf.mxu1 }
 0x3e3   :  { %v4885_v51 = vadd.f32 %v4884_v42, %v4883_v1 }
 0x3e4   :  { %v4886_v18 = vpop.f32.mrf.mxu1 }
 0x3e5   :  { %v4216_v44 = vadd.f32 %v4885_v51, %v4119_v15 }
 0x3e6   :  { %v4887_v31 = vpop.f32.mrf.mxu1 }
 0x3e7   :  { %v4750_v34 = vpack.c.bf16 %v4216_v44, %v4213_v2  ;;  %v4888_v27 = vadd.f32 %v4887_v31, %v4886_v18 }
 0x3e8   :  { %v4889_v8 = vpop.f32.mrf.mxu1 }
 0x3e9   :  { %4762 = vst [vmem:[%s7577_s7 + $0x30] sm:$0xff] %v4750_v34   ;;  %v4221_v39 = vadd.f32 %v4888_v27, %v4124_v32 }
 0x3ea   :  { %v4890_v58 = vpop.f32.mrf.mxu1 }
 0x3eb   :  { %v4891_v46 = vadd.f32 %v4890_v58, %v4889_v8 }
 0x3ed   :  { %v4224_v28 = vadd.f32 %v4891_v46, %v4127_v0 }
 0x3ef   :  { %v4755_v45 = vpack.c.bf16 %v4224_v28, %v4221_v39 }
 0x3f1   :  { %4763 = vst [vmem:[%s7577_s7 + $0x38] sm:$0xff] %v4755_v45  }
 0x3f2   :  { %4311 = vsyncpa [#allocation3], 1 }

</bundles_post_ra>
